<compile_context>
chip_gen: v5e
topology: v5e:2x2
jax: 0.10.0
libtpu: 0.0.40
codegen_flags: <defaults>
</compile_context>

<pallas_src>
import jax
import jax.numpy as jnp
from jax.experimental import pallas as pl
from jax.experimental.pallas import tpu as pltpu

N_IN = 8        # residual / layer-norm width
N_LATENT = 128  # hidden width of each residual block
N_BLOCKS = 4
K_AUG = 16      # augmented contraction width: 8 features + 1 bias row + 7 zero pad
LN_EPS = 1e-5


def _round_up(n, m):
    return ((n + m - 1) // m) * m


def _cdiv(a, b):
    return (a + b - 1) // b


def _gelu_exact(x):
    # PyTorch F.gelu default: 0.5 * x * (1 + erf(x / sqrt(2)))
    return 0.5 * x * (1.0 + jax.lax.erf(x * jnp.float32(0.7071067811865476)))


def _nn_kernel(x_ref, w1a_ref, w2t_ref, vec_ref, wfa_ref, o_ref):
    # x: (8, TB) -- features on sublanes, batch tile on lanes.
    tb = x_ref.shape[1]
    x = x_ref[...].astype(jnp.float32)

    # Constant augmentation rows: row 0 = 1.0 (bias input), rows 1..7 = 0.0 (alignment
    # padding).  Built once per grid step; reused for all 4 blocks and the head.
    aug = (jax.lax.broadcasted_iota(jnp.int32, (N_IN, tb), 0) == 0).astype(jnp.float32)

    for i in range(N_BLOCKS):                              # static unroll, 4 blocks
        v = vec_ref[i]                                     # (24, 1) = [b2; gamma; beta]
        b2 = v[0:N_IN]                                     # (8, 1)
        gamma = v[N_IN:2 * N_IN]                           # (8, 1)
        beta = v[2 * N_IN:3 * N_IN]                        # (8, 1)

        # dense1 with b1 folded into column 8 of W1^T: (128,16) @ (16,TB) -> (128,TB)
        x16 = jnp.concatenate([x, aug], axis=0)            # (16, TB)
        h = jnp.dot(w1a_ref[i], x16, preferred_element_type=jnp.float32)
        h = _gelu_exact(h)
        # TODO(synk): Dropout(0.1) is eval-mode identity; training-mode RNG masking
        # is not implemented in this forward kernel.
        # dense2: (8,128) @ (128,TB) + b2 -> (8,TB)
        h2 = jnp.dot(w2t_ref[i], h, preferred_element_type=jnp.float32) + b2
        h2 = _gelu_exact(h2)
        # residual + LayerNorm over the 8-feature sublane axis (axis 0)
        y = h2 + x
        mu = jnp.mean(y, axis=0, keepdims=True)                     # (1, TB)
        var = jnp.mean((y - mu) * (y - mu), axis=0, keepdims=True)  # (1, TB)
        x = (y - mu) * jax.lax.rsqrt(var + jnp.float32(LN_EPS)) * gamma + beta

    # Head: (1,16) @ (16,TB) with bf folded into column 8; sigmoid; lane-dense store.
    x16 = jnp.concatenate([x, aug], axis=0)
    out = jnp.dot(wfa_ref[...], x16, preferred_element_type=jnp.float32)  # (1, TB)
    o_ref[...] = jax.nn.sigmoid(out).astype(o_ref.dtype)


def _choose_tile(B, tile_b):
    """Lane-aligned batch tile; keeps >=2 balanced grid steps when B > 128 (v7x megacore)."""
    assert tile_b % 128 == 0 and tile_b >= 128, "tile_b must be a positive multiple of 128"
    n128 = _cdiv(B, 128)
    if n128 <= 1:
        return 128
    max_tiles = tile_b // 128
    g = max(2, _cdiv(n128, max_tiles))       # at least 2 grid steps
    return _cdiv(n128, g) * 128              # balanced -> tail padding < one tile


def neural_network_forward(x, params, *, tile_b=2048):
    """x: (B, 8) float32 -> (B, 1) float32. PyTorch-layout params (see init_params)."""
    B, d = x.shape
    assert d == N_IN
    (w1, b1, w2, b2, gamma, beta, wf, bf) = params

    tb = _choose_tile(B, int(tile_b))
    grid = (_cdiv(B, tb),)
    Bp = grid[0] * tb

    # Batch-on-lanes input layout + zero-pad of the batch tail (kept in the wrapper:
    # the kernel's (8, TB) block then DMAs densely; see header comment).
    x_t = jnp.zeros((N_IN, Bp), jnp.float32).at[:, :B].set(x.astype(jnp.float32).T)

    # One-time parameter repacking (tiny XLA ops).
    f32 = jnp.float32
    w1t = jnp.swapaxes(w1, 1, 2).astype(f32)                          # (4, 128, 8)
    w1a = jnp.concatenate(
        [w1t, b1.astype(f32)[:, :, None],
         jnp.zeros((N_BLOCKS, N_LATENT, K_AUG - N_IN - 1), f32)], axis=2)   # (4, 128, 16)
    w2t = jnp.swapaxes(w2, 1, 2).astype(f32)                          # (4, 8, 128)
    vec = jnp.concatenate(
        [b2.astype(f32), gamma.astype(f32), beta.astype(f32)], axis=1)[:, :, None]  # (4, 24, 1)
    wfa = jnp.concatenate(
        [wf.astype(f32).T, bf.astype(f32).reshape(1, 1),
         jnp.zeros((1, K_AUG - N_IN - 1), f32)], axis=1)              # (1, 16)

    rep2 = lambda i: (0, 0)
    rep3 = lambda i: (0, 0, 0)

    out_t = pl.pallas_call(
        _nn_kernel,
        out_shape=jax.ShapeDtypeStruct((1, Bp), jnp.float32),
        grid_spec=pltpu.PrefetchScalarGridSpec(
            num_scalar_prefetch=0,
            grid=grid,
            in_specs=[
                pl.BlockSpec((N_IN, tb), lambda i: (0, i)),           # x tile (8, TB)
                pl.BlockSpec((N_BLOCKS, N_LATENT, K_AUG), rep3),      # [W1^T | b1 | 0] stack
                pl.BlockSpec((N_BLOCKS, N_IN, N_LATENT), rep3),       # W2^T stack
                pl.BlockSpec((N_BLOCKS, 3 * N_IN, 1), rep3),          # [b2; gamma; beta] stack
                pl.BlockSpec((1, K_AUG), rep2),                       # [wf^T | bf | 0]
            ],
            out_specs=pl.BlockSpec((1, tb), lambda i: (0, i)),        # lane-dense (1, TB)
        ),
        compiler_params=pltpu.CompilerParams(
            dimension_semantics=("parallel",)),
    )(x_t, w1a, w2t, vec, wfa)

    # back to (B, 1), dropping batch padding
    return out_t[:, :B].T


def init_params(key):
    """PyTorch-style params: nn.Linear uniform +-1/sqrt(fan_in); LN gamma=1, beta=0."""
    ks = jax.random.split(key, 2 * N_BLOCKS * 2 + 2)
    w1s, b1s, w2s, b2s = [], [], [], []
    ki = 0
    for _ in range(N_BLOCKS):
        lim1 = 1.0 / jnp.sqrt(N_IN)
        w1s.append(jax.random.uniform(ks[ki], (N_IN, N_LATENT), jnp.float32, -lim1, lim1)); ki += 1
        b1s.append(jax.random.uniform(ks[ki], (N_LATENT,), jnp.float32, -lim1, lim1)); ki += 1
        lim2 = 1.0 / jnp.sqrt(N_LATENT)
        w2s.append(jax.random.uniform(ks[ki], (N_LATENT, N_IN), jnp.float32, -lim2, lim2)); ki += 1
        b2s.append(jax.random.uniform(ks[ki], (N_IN,), jnp.float32, -lim2, lim2)); ki += 1
    limf = 1.0 / jnp.sqrt(N_IN)
    wf = jax.random.uniform(ks[ki], (N_IN, 1), jnp.float32, -limf, limf); ki += 1
    bf = jax.random.uniform(ks[ki], (1,), jnp.float32, -limf, limf); ki += 1
    gammas = jnp.ones((N_BLOCKS, N_IN), jnp.float32)
    betas = jnp.zeros((N_BLOCKS, N_IN), jnp.float32)
    return (jnp.stack(w1s), jnp.stack(b1s), jnp.stack(w2s), jnp.stack(b2s),
            gammas, betas, wf, bf)


def reference_forward(x, params):
    """Plain-JAX reference matching the PyTorch module in eval mode."""
    (w1, b1, w2, b2, gamma, beta, wf, bf) = params
    gelu = lambda v: 0.5 * v * (1.0 + jax.lax.erf(v / jnp.sqrt(2.0)))
    for i in range(N_BLOCKS):
        h = gelu(x @ w1[i] + b1[i])
        h2 = gelu(h @ w2[i] + b2[i])
        y = h2 + x
        mu = jnp.mean(y, axis=-1, keepdims=True)
        var = jnp.mean((y - mu) ** 2, axis=-1, keepdims=True)
        x = (y - mu) / jnp.sqrt(var + LN_EPS) * gamma[i] + beta[i]
    return jax.nn.sigmoid(x @ wf + bf)


if __name__ == "__main__":
    key = jax.random.PRNGKey(0)
    kx, kp = jax.random.split(key)
    params = init_params(kp)

    # Small primary test (single grid step).
    B = 16
    x = jax.random.normal(kx, (B, N_IN), jnp.float32)
    out = jax.block_until_ready(neural_network_forward(x, params))
    ref = reference_forward(x, params)
    assert out.shape == (B, 1)
    assert jnp.allclose(out, ref, atol=2e-3, rtol=2e-3), (
        f"max diff {jnp.max(jnp.abs(out - ref))}")

    # Secondary check exercising the multi-step grid (>=2 for v7x) + batch-tail padding.
    B2 = 384
    x2 = jax.random.normal(jax.random.PRNGKey(1), (B2, N_IN), jnp.float32)
    out2 = jax.block_until_ready(neural_network_forward(x2, params))
    ref2 = reference_forward(x2, params)
    assert out2.shape == (B2, 1)
    assert jnp.allclose(out2, ref2, atol=2e-3, rtol=2e-3), (
        f"max diff {jnp.max(jnp.abs(out2 - ref2))}")

    print("KERNEL_OK")
</pallas_src>

<mosaic_0001>
module attributes {stable_mosaic.version = 11 : i64} {
  func.func @_nn_kernel(%arg0: i32, %arg1: memref<8x128xf32, #tpu.memory_space<vmem>>, %arg2: memref<4x128x16xf32, #tpu.memory_space<vmem>>, %arg3: memref<4x8x128xf32, #tpu.memory_space<vmem>>, %arg4: memref<4x24x1xf32, #tpu.memory_space<vmem>>, %arg5: memref<1x16xf32, #tpu.memory_space<vmem>>, %arg6: memref<1x128xf32, #tpu.memory_space<vmem>>) attributes {dimension_semantics = [#tpu.dimension_semantics<parallel>], iteration_bounds = array<i64: 1>, scalar_prefetch = 0 : i64, scratch_operands = 0 : i64, tpu.core_type = #tpu.core_type<tc>, window_params = [{transform_indices = @transform_0, window_bounds = array<i64: 8, 128>}, {pipeline_mode = #tpu.pipeline_mode<synchronous>, transform_indices = @transform_1, window_bounds = array<i64: 4, 128, 16>}, {pipeline_mode = #tpu.pipeline_mode<synchronous>, transform_indices = @transform_2, window_bounds = array<i64: 4, 8, 128>}, {pipeline_mode = #tpu.pipeline_mode<synchronous>, transform_indices = @transform_3, window_bounds = array<i64: 4, 24, 1>}, {pipeline_mode = #tpu.pipeline_mode<synchronous>, transform_indices = @transform_4, window_bounds = array<i64: 1, 16>}, {transform_indices = @transform_5, window_bounds = array<i64: 1, 128>}]} {
    %c0 = arith.constant 0 : index
    %c0_0 = arith.constant 0 : index
    %0 = vector.load %arg1[%c0, %c0_0] : memref<8x128xf32, #tpu.memory_space<vmem>>, vector<8x128xf32>
    %1 = tpu.iota {dimensions = array<i32: 0>} : vector<8x128xi32>
    %c0_i32 = arith.constant 0 : i32
    %2 = vector.broadcast %c0_i32 : i32 to vector<8x128xi32>
    %3 = arith.cmpi eq, %1, %2 : vector<8x128xi32>
    %4 = arith.extui %3 : vector<8x128xi1> to vector<8x128xi32>
    %5 = arith.sitofp %4 : vector<8x128xi32> to vector<8x128xf32>
    %c0_1 = arith.constant 0 : index
    %c0_2 = arith.constant 0 : index
    %c0_3 = arith.constant 0 : index
    %6 = vector.load %arg4[%c0_1, %c0_2, %c0_3] : memref<4x24x1xf32, #tpu.memory_space<vmem>>, vector<1x24x1xf32>
    %7 = vector.shape_cast %6 : vector<1x24x1xf32> to vector<24x1xf32>
    %8 = vector.extract_strided_slice %7 {offsets = [0, 0], sizes = [8, 1], strides = [1, 1]} : vector<24x1xf32> to vector<8x1xf32>
    %9 = vector.extract_strided_slice %7 {offsets = [8, 0], sizes = [8, 1], strides = [1, 1]} : vector<24x1xf32> to vector<8x1xf32>
    %10 = vector.extract_strided_slice %7 {offsets = [16, 0], sizes = [8, 1], strides = [1, 1]} : vector<24x1xf32> to vector<8x1xf32>
    %11 = tpu.concatenate %0, %5 in 0 : vector<8x128xf32>, vector<8x128xf32> -> vector<16x128xf32>
    %c0_4 = arith.constant 0 : index
    %c0_5 = arith.constant 0 : index
    %c0_6 = arith.constant 0 : index
    %12 = vector.load %arg2[%c0_4, %c0_5, %c0_6] : memref<4x128x16xf32, #tpu.memory_space<vmem>>, vector<1x128x16xf32>
    %13 = vector.shape_cast %12 : vector<1x128x16xf32> to vector<128x16xf32>
    %cst = arith.constant dense<0.000000e+00> : vector<128x128xf32>
    %14 = tpu.matmul %13, %11, %cst {dimension_numbers = #tpu.dot_dimension_numbers<[1], [0], [0], [1], [0, 0, 1, 1], [], []>} : vector<128x16xf32>, vector<16x128xf32>, vector<128x128xf32> -> vector<128x128xf32>
    %cst_7 = arith.constant 5.000000e-01 : f32
    %15 = vector.broadcast %cst_7 : f32 to vector<128x128xf32>
    %16 = arith.mulf %15, %14 : vector<128x128xf32>
    %cst_8 = arith.constant 0.707106769 : f32
    %17 = vector.broadcast %cst_8 : f32 to vector<128x128xf32>
    %18 = arith.mulf %14, %17 : vector<128x128xf32>
    %19 = math.erf %18 : vector<128x128xf32>
    %cst_9 = arith.constant 1.000000e+00 : f32
    %20 = vector.broadcast %cst_9 : f32 to vector<128x128xf32>
    %21 = arith.addf %20, %19 : vector<128x128xf32>
    %22 = arith.mulf %16, %21 : vector<128x128xf32>
    %c0_10 = arith.constant 0 : index
    %c0_11 = arith.constant 0 : index
    %c0_12 = arith.constant 0 : index
    %23 = vector.load %arg3[%c0_10, %c0_11, %c0_12] : memref<4x8x128xf32, #tpu.memory_space<vmem>>, vector<1x8x128xf32>
    %24 = vector.shape_cast %23 : vector<1x8x128xf32> to vector<8x128xf32>
    %cst_13 = arith.constant dense<0.000000e+00> : vector<8x128xf32>
    %25 = tpu.matmul %24, %22, %cst_13 {dimension_numbers = #tpu.dot_dimension_numbers<[1], [0], [0], [1], [0, 0, 1, 1], [], []>} : vector<8x128xf32>, vector<128x128xf32>, vector<8x128xf32> -> vector<8x128xf32>
    %26 = vector.broadcast %8 : vector<8x1xf32> to vector<8x128xf32>
    %27 = arith.addf %25, %26 : vector<8x128xf32>
    %cst_14 = arith.constant 5.000000e-01 : f32
    %28 = vector.broadcast %cst_14 : f32 to vector<8x128xf32>
    %29 = arith.mulf %28, %27 : vector<8x128xf32>
    %cst_15 = arith.constant 0.707106769 : f32
    %30 = vector.broadcast %cst_15 : f32 to vector<8x128xf32>
    %31 = arith.mulf %27, %30 : vector<8x128xf32>
    %32 = math.erf %31 : vector<8x128xf32>
    %cst_16 = arith.constant 1.000000e+00 : f32
    %33 = vector.broadcast %cst_16 : f32 to vector<8x128xf32>
    %34 = arith.addf %33, %32 : vector<8x128xf32>
    %35 = arith.mulf %29, %34 : vector<8x128xf32>
    %36 = arith.addf %35, %0 : vector<8x128xf32>
    %cst_17 = arith.constant dense<0.000000e+00> : vector<128xf32>
    %37 = vector.multi_reduction <add>, %36, %cst_17 [0] : vector<8x128xf32> to vector<128xf32>
    %38 = vector.shape_cast %37 : vector<128xf32> to vector<1x128xf32>
    %cst_18 = arith.constant 8.000000e+00 : f32
    %39 = vector.broadcast %cst_18 : f32 to vector<1x128xf32>
    %40 = arith.divf %38, %39 : vector<1x128xf32>
    %41 = vector.broadcast %40 : vector<1x128xf32> to vector<8x128xf32>
    %42 = arith.subf %36, %41 : vector<8x128xf32>
    %43 = vector.broadcast %40 : vector<1x128xf32> to vector<8x128xf32>
    %44 = arith.subf %36, %43 : vector<8x128xf32>
    %45 = arith.mulf %42, %44 : vector<8x128xf32>
    %cst_19 = arith.constant dense<0.000000e+00> : vector<128xf32>
    %46 = vector.multi_reduction <add>, %45, %cst_19 [0] : vector<8x128xf32> to vector<128xf32>
    %47 = vector.shape_cast %46 : vector<128xf32> to vector<1x128xf32>
    %cst_20 = arith.constant 8.000000e+00 : f32
    %48 = vector.broadcast %cst_20 : f32 to vector<1x128xf32>
    %49 = arith.divf %47, %48 : vector<1x128xf32>
    %50 = vector.broadcast %40 : vector<1x128xf32> to vector<8x128xf32>
    %51 = arith.subf %36, %50 : vector<8x128xf32>
    %cst_21 = arith.constant 9.99999974E-6 : f32
    %52 = vector.broadcast %cst_21 : f32 to vector<1x128xf32>
    %53 = arith.addf %49, %52 : vector<1x128xf32>
    %54 = math.rsqrt %53 : vector<1x128xf32>
    %55 = vector.broadcast %54 : vector<1x128xf32> to vector<8x128xf32>
    %56 = arith.mulf %51, %55 : vector<8x128xf32>
    %57 = vector.broadcast %9 : vector<8x1xf32> to vector<8x128xf32>
    %58 = arith.mulf %56, %57 : vector<8x128xf32>
    %59 = vector.broadcast %10 : vector<8x1xf32> to vector<8x128xf32>
    %60 = arith.addf %58, %59 : vector<8x128xf32>
    %c1 = arith.constant 1 : index
    %c0_22 = arith.constant 0 : index
    %c0_23 = arith.constant 0 : index
    %61 = vector.load %arg4[%c1, %c0_22, %c0_23] : memref<4x24x1xf32, #tpu.memory_space<vmem>>, vector<1x24x1xf32>
    %62 = vector.shape_cast %61 : vector<1x24x1xf32> to vector<24x1xf32>
    %63 = vector.extract_strided_slice %62 {offsets = [0, 0], sizes = [8, 1], strides = [1, 1]} : vector<24x1xf32> to vector<8x1xf32>
    %64 = vector.extract_strided_slice %62 {offsets = [8, 0], sizes = [8, 1], strides = [1, 1]} : vector<24x1xf32> to vector<8x1xf32>
    %65 = vector.extract_strided_slice %62 {offsets = [16, 0], sizes = [8, 1], strides = [1, 1]} : vector<24x1xf32> to vector<8x1xf32>
    %66 = tpu.concatenate %60, %5 in 0 : vector<8x128xf32>, vector<8x128xf32> -> vector<16x128xf32>
    %c1_24 = arith.constant 1 : index
    %c0_25 = arith.constant 0 : index
    %c0_26 = arith.constant 0 : index
    %67 = vector.load %arg2[%c1_24, %c0_25, %c0_26] : memref<4x128x16xf32, #tpu.memory_space<vmem>>, vector<1x128x16xf32>
    %68 = vector.shape_cast %67 : vector<1x128x16xf32> to vector<128x16xf32>
    %cst_27 = arith.constant dense<0.000000e+00> : vector<128x128xf32>
    %69 = tpu.matmul %68, %66, %cst_27 {dimension_numbers = #tpu.dot_dimension_numbers<[1], [0], [0], [1], [0, 0, 1, 1], [], []>} : vector<128x16xf32>, vector<16x128xf32>, vector<128x128xf32> -> vector<128x128xf32>
    %cst_28 = arith.constant 5.000000e-01 : f32
    %70 = vector.broadcast %cst_28 : f32 to vector<128x128xf32>
    %71 = arith.mulf %70, %69 : vector<128x128xf32>
    %cst_29 = arith.constant 0.707106769 : f32
    %72 = vector.broadcast %cst_29 : f32 to vector<128x128xf32>
    %73 = arith.mulf %69, %72 : vector<128x128xf32>
    %74 = math.erf %73 : vector<128x128xf32>
    %cst_30 = arith.constant 1.000000e+00 : f32
    %75 = vector.broadcast %cst_30 : f32 to vector<128x128xf32>
    %76 = arith.addf %75, %74 : vector<128x128xf32>
    %77 = arith.mulf %71, %76 : vector<128x128xf32>
    %c1_31 = arith.constant 1 : index
    %c0_32 = arith.constant 0 : index
    %c0_33 = arith.constant 0 : index
    %78 = vector.load %arg3[%c1_31, %c0_32, %c0_33] : memref<4x8x128xf32, #tpu.memory_space<vmem>>, vector<1x8x128xf32>
    %79 = vector.shape_cast %78 : vector<1x8x128xf32> to vector<8x128xf32>
    %cst_34 = arith.constant dense<0.000000e+00> : vector<8x128xf32>
    %80 = tpu.matmul %79, %77, %cst_34 {dimension_numbers = #tpu.dot_dimension_numbers<[1], [0], [0], [1], [0, 0, 1, 1], [], []>} : vector<8x128xf32>, vector<128x128xf32>, vector<8x128xf32> -> vector<8x128xf32>
    %81 = vector.broadcast %63 : vector<8x1xf32> to vector<8x128xf32>
    %82 = arith.addf %80, %81 : vector<8x128xf32>
    %cst_35 = arith.constant 5.000000e-01 : f32
    %83 = vector.broadcast %cst_35 : f32 to vector<8x128xf32>
    %84 = arith.mulf %83, %82 : vector<8x128xf32>
    %cst_36 = arith.constant 0.707106769 : f32
    %85 = vector.broadcast %cst_36 : f32 to vector<8x128xf32>
    %86 = arith.mulf %82, %85 : vector<8x128xf32>
    %87 = math.erf %86 : vector<8x128xf32>
    %cst_37 = arith.constant 1.000000e+00 : f32
    %88 = vector.broadcast %cst_37 : f32 to vector<8x128xf32>
    %89 = arith.addf %88, %87 : vector<8x128xf32>
    %90 = arith.mulf %84, %89 : vector<8x128xf32>
    %91 = arith.addf %90, %60 : vector<8x128xf32>
    %cst_38 = arith.constant dense<0.000000e+00> : vector<128xf32>
    %92 = vector.multi_reduction <add>, %91, %cst_38 [0] : vector<8x128xf32> to vector<128xf32>
    %93 = vector.shape_cast %92 : vector<128xf32> to vector<1x128xf32>
    %cst_39 = arith.constant 8.000000e+00 : f32
    %94 = vector.broadcast %cst_39 : f32 to vector<1x128xf32>
    %95 = arith.divf %93, %94 : vector<1x128xf32>
    %96 = vector.broadcast %95 : vector<1x128xf32> to vector<8x128xf32>
    %97 = arith.subf %91, %96 : vector<8x128xf32>
    %98 = vector.broadcast %95 : vector<1x128xf32> to vector<8x128xf32>
    %99 = arith.subf %91, %98 : vector<8x128xf32>
    %100 = arith.mulf %97, %99 : vector<8x128xf32>
    %cst_40 = arith.constant dense<0.000000e+00> : vector<128xf32>
    %101 = vector.multi_reduction <add>, %100, %cst_40 [0] : vector<8x128xf32> to vector<128xf32>
    %102 = vector.shape_cast %101 : vector<128xf32> to vector<1x128xf32>
    %cst_41 = arith.constant 8.000000e+00 : f32
    %103 = vector.broadcast %cst_41 : f32 to vector<1x128xf32>
    %104 = arith.divf %102, %103 : vector<1x128xf32>
    %105 = vector.broadcast %95 : vector<1x128xf32> to vector<8x128xf32>
    %106 = arith.subf %91, %105 : vector<8x128xf32>
    %cst_42 = arith.constant 9.99999974E-6 : f32
    %107 = vector.broadcast %cst_42 : f32 to vector<1x128xf32>
    %108 = arith.addf %104, %107 : vector<1x128xf32>
    %109 = math.rsqrt %108 : vector<1x128xf32>
    %110 = vector.broadcast %109 : vector<1x128xf32> to vector<8x128xf32>
    %111 = arith.mulf %106, %110 : vector<8x128xf32>
    %112 = vector.broadcast %64 : vector<8x1xf32> to vector<8x128xf32>
    %113 = arith.mulf %111, %112 : vector<8x128xf32>
    %114 = vector.broadcast %65 : vector<8x1xf32> to vector<8x128xf32>
    %115 = arith.addf %113, %114 : vector<8x128xf32>
    %c2 = arith.constant 2 : index
    %c0_43 = arith.constant 0 : index
    %c0_44 = arith.constant 0 : index
    %116 = vector.load %arg4[%c2, %c0_43, %c0_44] : memref<4x24x1xf32, #tpu.memory_space<vmem>>, vector<1x24x1xf32>
    %117 = vector.shape_cast %116 : vector<1x24x1xf32> to vector<24x1xf32>
    %118 = vector.extract_strided_slice %117 {offsets = [0, 0], sizes = [8, 1], strides = [1, 1]} : vector<24x1xf32> to vector<8x1xf32>
    %119 = vector.extract_strided_slice %117 {offsets = [8, 0], sizes = [8, 1], strides = [1, 1]} : vector<24x1xf32> to vector<8x1xf32>
    %120 = vector.extract_strided_slice %117 {offsets = [16, 0], sizes = [8, 1], strides = [1, 1]} : vector<24x1xf32> to vector<8x1xf32>
    %121 = tpu.concatenate %115, %5 in 0 : vector<8x128xf32>, vector<8x128xf32> -> vector<16x128xf32>
    %c2_45 = arith.constant 2 : index
    %c0_46 = arith.constant 0 : index
    %c0_47 = arith.constant 0 : index
    %122 = vector.load %arg2[%c2_45, %c0_46, %c0_47] : memref<4x128x16xf32, #tpu.memory_space<vmem>>, vector<1x128x16xf32>
    %123 = vector.shape_cast %122 : vector<1x128x16xf32> to vector<128x16xf32>
    %cst_48 = arith.constant dense<0.000000e+00> : vector<128x128xf32>
    %124 = tpu.matmul %123, %121, %cst_48 {dimension_numbers = #tpu.dot_dimension_numbers<[1], [0], [0], [1], [0, 0, 1, 1], [], []>} : vector<128x16xf32>, vector<16x128xf32>, vector<128x128xf32> -> vector<128x128xf32>
    %cst_49 = arith.constant 5.000000e-01 : f32
    %125 = vector.broadcast %cst_49 : f32 to vector<128x128xf32>
    %126 = arith.mulf %125, %124 : vector<128x128xf32>
    %cst_50 = arith.constant 0.707106769 : f32
    %127 = vector.broadcast %cst_50 : f32 to vector<128x128xf32>
    %128 = arith.mulf %124, %127 : vector<128x128xf32>
    %129 = math.erf %128 : vector<128x128xf32>
    %cst_51 = arith.constant 1.000000e+00 : f32
    %130 = vector.broadcast %cst_51 : f32 to vector<128x128xf32>
    %131 = arith.addf %130, %129 : vector<128x128xf32>
    %132 = arith.mulf %126, %131 : vector<128x128xf32>
    %c2_52 = arith.constant 2 : index
    %c0_53 = arith.constant 0 : index
    %c0_54 = arith.constant 0 : index
    %133 = vector.load %arg3[%c2_52, %c0_53, %c0_54] : memref<4x8x128xf32, #tpu.memory_space<vmem>>, vector<1x8x128xf32>
    %134 = vector.shape_cast %133 : vector<1x8x128xf32> to vector<8x128xf32>
    %cst_55 = arith.constant dense<0.000000e+00> : vector<8x128xf32>
    %135 = tpu.matmul %134, %132, %cst_55 {dimension_numbers = #tpu.dot_dimension_numbers<[1], [0], [0], [1], [0, 0, 1, 1], [], []>} : vector<8x128xf32>, vector<128x128xf32>, vector<8x128xf32> -> vector<8x128xf32>
    %136 = vector.broadcast %118 : vector<8x1xf32> to vector<8x128xf32>
    %137 = arith.addf %135, %136 : vector<8x128xf32>
    %cst_56 = arith.constant 5.000000e-01 : f32
    %138 = vector.broadcast %cst_56 : f32 to vector<8x128xf32>
    %139 = arith.mulf %138, %137 : vector<8x128xf32>
    %cst_57 = arith.constant 0.707106769 : f32
    %140 = vector.broadcast %cst_57 : f32 to vector<8x128xf32>
    %141 = arith.mulf %137, %140 : vector<8x128xf32>
    %142 = math.erf %141 : vector<8x128xf32>
    %cst_58 = arith.constant 1.000000e+00 : f32
    %143 = vector.broadcast %cst_58 : f32 to vector<8x128xf32>
    %144 = arith.addf %143, %142 : vector<8x128xf32>
    %145 = arith.mulf %139, %144 : vector<8x128xf32>
    %146 = arith.addf %145, %115 : vector<8x128xf32>
    %cst_59 = arith.constant dense<0.000000e+00> : vector<128xf32>
    %147 = vector.multi_reduction <add>, %146, %cst_59 [0] : vector<8x128xf32> to vector<128xf32>
    %148 = vector.shape_cast %147 : vector<128xf32> to vector<1x128xf32>
    %cst_60 = arith.constant 8.000000e+00 : f32
    %149 = vector.broadcast %cst_60 : f32 to vector<1x128xf32>
    %150 = arith.divf %148, %149 : vector<1x128xf32>
    %151 = vector.broadcast %150 : vector<1x128xf32> to vector<8x128xf32>
    %152 = arith.subf %146, %151 : vector<8x128xf32>
    %153 = vector.broadcast %150 : vector<1x128xf32> to vector<8x128xf32>
    %154 = arith.subf %146, %153 : vector<8x128xf32>
    %155 = arith.mulf %152, %154 : vector<8x128xf32>
    %cst_61 = arith.constant dense<0.000000e+00> : vector<128xf32>
    %156 = vector.multi_reduction <add>, %155, %cst_61 [0] : vector<8x128xf32> to vector<128xf32>
    %157 = vector.shape_cast %156 : vector<128xf32> to vector<1x128xf32>
    %cst_62 = arith.constant 8.000000e+00 : f32
    %158 = vector.broadcast %cst_62 : f32 to vector<1x128xf32>
    %159 = arith.divf %157, %158 : vector<1x128xf32>
    %160 = vector.broadcast %150 : vector<1x128xf32> to vector<8x128xf32>
    %161 = arith.subf %146, %160 : vector<8x128xf32>
    %cst_63 = arith.constant 9.99999974E-6 : f32
    %162 = vector.broadcast %cst_63 : f32 to vector<1x128xf32>
    %163 = arith.addf %159, %162 : vector<1x128xf32>
    %164 = math.rsqrt %163 : vector<1x128xf32>
    %165 = vector.broadcast %164 : vector<1x128xf32> to vector<8x128xf32>
    %166 = arith.mulf %161, %165 : vector<8x128xf32>
    %167 = vector.broadcast %119 : vector<8x1xf32> to vector<8x128xf32>
    %168 = arith.mulf %166, %167 : vector<8x128xf32>
    %169 = vector.broadcast %120 : vector<8x1xf32> to vector<8x128xf32>
    %170 = arith.addf %168, %169 : vector<8x128xf32>
    %c3 = arith.constant 3 : index
    %c0_64 = arith.constant 0 : index
    %c0_65 = arith.constant 0 : index
    %171 = vector.load %arg4[%c3, %c0_64, %c0_65] : memref<4x24x1xf32, #tpu.memory_space<vmem>>, vector<1x24x1xf32>
    %172 = vector.shape_cast %171 : vector<1x24x1xf32> to vector<24x1xf32>
    %173 = vector.extract_strided_slice %172 {offsets = [0, 0], sizes = [8, 1], strides = [1, 1]} : vector<24x1xf32> to vector<8x1xf32>
    %174 = vector.extract_strided_slice %172 {offsets = [8, 0], sizes = [8, 1], strides = [1, 1]} : vector<24x1xf32> to vector<8x1xf32>
    %175 = vector.extract_strided_slice %172 {offsets = [16, 0], sizes = [8, 1], strides = [1, 1]} : vector<24x1xf32> to vector<8x1xf32>
    %176 = tpu.concatenate %170, %5 in 0 : vector<8x128xf32>, vector<8x128xf32> -> vector<16x128xf32>
    %c3_66 = arith.constant 3 : index
    %c0_67 = arith.constant 0 : index
    %c0_68 = arith.constant 0 : index
    %177 = vector.load %arg2[%c3_66, %c0_67, %c0_68] : memref<4x128x16xf32, #tpu.memory_space<vmem>>, vector<1x128x16xf32>
    %178 = vector.shape_cast %177 : vector<1x128x16xf32> to vector<128x16xf32>
    %cst_69 = arith.constant dense<0.000000e+00> : vector<128x128xf32>
    %179 = tpu.matmul %178, %176, %cst_69 {dimension_numbers = #tpu.dot_dimension_numbers<[1], [0], [0], [1], [0, 0, 1, 1], [], []>} : vector<128x16xf32>, vector<16x128xf32>, vector<128x128xf32> -> vector<128x128xf32>
    %cst_70 = arith.constant 5.000000e-01 : f32
    %180 = vector.broadcast %cst_70 : f32 to vector<128x128xf32>
    %181 = arith.mulf %180, %179 : vector<128x128xf32>
    %cst_71 = arith.constant 0.707106769 : f32
    %182 = vector.broadcast %cst_71 : f32 to vector<128x128xf32>
    %183 = arith.mulf %179, %182 : vector<128x128xf32>
    %184 = math.erf %183 : vector<128x128xf32>
    %cst_72 = arith.constant 1.000000e+00 : f32
    %185 = vector.broadcast %cst_72 : f32 to vector<128x128xf32>
    %186 = arith.addf %185, %184 : vector<128x128xf32>
    %187 = arith.mulf %181, %186 : vector<128x128xf32>
    %c3_73 = arith.constant 3 : index
    %c0_74 = arith.constant 0 : index
    %c0_75 = arith.constant 0 : index
    %188 = vector.load %arg3[%c3_73, %c0_74, %c0_75] : memref<4x8x128xf32, #tpu.memory_space<vmem>>, vector<1x8x128xf32>
    %189 = vector.shape_cast %188 : vector<1x8x128xf32> to vector<8x128xf32>
    %cst_76 = arith.constant dense<0.000000e+00> : vector<8x128xf32>
    %190 = tpu.matmul %189, %187, %cst_76 {dimension_numbers = #tpu.dot_dimension_numbers<[1], [0], [0], [1], [0, 0, 1, 1], [], []>} : vector<8x128xf32>, vector<128x128xf32>, vector<8x128xf32> -> vector<8x128xf32>
    %191 = vector.broadcast %173 : vector<8x1xf32> to vector<8x128xf32>
    %192 = arith.addf %190, %191 : vector<8x128xf32>
    %cst_77 = arith.constant 5.000000e-01 : f32
    %193 = vector.broadcast %cst_77 : f32 to vector<8x128xf32>
    %194 = arith.mulf %193, %192 : vector<8x128xf32>
    %cst_78 = arith.constant 0.707106769 : f32
    %195 = vector.broadcast %cst_78 : f32 to vector<8x128xf32>
    %196 = arith.mulf %192, %195 : vector<8x128xf32>
    %197 = math.erf %196 : vector<8x128xf32>
    %cst_79 = arith.constant 1.000000e+00 : f32
    %198 = vector.broadcast %cst_79 : f32 to vector<8x128xf32>
    %199 = arith.addf %198, %197 : vector<8x128xf32>
    %200 = arith.mulf %194, %199 : vector<8x128xf32>
    %201 = arith.addf %200, %170 : vector<8x128xf32>
    %cst_80 = arith.constant dense<0.000000e+00> : vector<128xf32>
    %202 = vector.multi_reduction <add>, %201, %cst_80 [0] : vector<8x128xf32> to vector<128xf32>
    %203 = vector.shape_cast %202 : vector<128xf32> to vector<1x128xf32>
    %cst_81 = arith.constant 8.000000e+00 : f32
    %204 = vector.broadcast %cst_81 : f32 to vector<1x128xf32>
    %205 = arith.divf %203, %204 : vector<1x128xf32>
    %206 = vector.broadcast %205 : vector<1x128xf32> to vector<8x128xf32>
    %207 = arith.subf %201, %206 : vector<8x128xf32>
    %208 = vector.broadcast %205 : vector<1x128xf32> to vector<8x128xf32>
    %209 = arith.subf %201, %208 : vector<8x128xf32>
    %210 = arith.mulf %207, %209 : vector<8x128xf32>
    %cst_82 = arith.constant dense<0.000000e+00> : vector<128xf32>
    %211 = vector.multi_reduction <add>, %210, %cst_82 [0] : vector<8x128xf32> to vector<128xf32>
    %212 = vector.shape_cast %211 : vector<128xf32> to vector<1x128xf32>
    %cst_83 = arith.constant 8.000000e+00 : f32
    %213 = vector.broadcast %cst_83 : f32 to vector<1x128xf32>
    %214 = arith.divf %212, %213 : vector<1x128xf32>
    %215 = vector.broadcast %205 : vector<1x128xf32> to vector<8x128xf32>
    %216 = arith.subf %201, %215 : vector<8x128xf32>
    %cst_84 = arith.constant 9.99999974E-6 : f32
    %217 = vector.broadcast %cst_84 : f32 to vector<1x128xf32>
    %218 = arith.addf %214, %217 : vector<1x128xf32>
    %219 = math.rsqrt %218 : vector<1x128xf32>
    %220 = vector.broadcast %219 : vector<1x128xf32> to vector<8x128xf32>
    %221 = arith.mulf %216, %220 : vector<8x128xf32>
    %222 = vector.broadcast %174 : vector<8x1xf32> to vector<8x128xf32>
    %223 = arith.mulf %221, %222 : vector<8x128xf32>
    %224 = vector.broadcast %175 : vector<8x1xf32> to vector<8x128xf32>
    %225 = arith.addf %223, %224 : vector<8x128xf32>
    %226 = tpu.concatenate %225, %5 in 0 : vector<8x128xf32>, vector<8x128xf32> -> vector<16x128xf32>
    %c0_85 = arith.constant 0 : index
    %c0_86 = arith.constant 0 : index
    %227 = vector.load %arg5[%c0_85, %c0_86] : memref<1x16xf32, #tpu.memory_space<vmem>>, vector<1x16xf32>
    %cst_87 = arith.constant dense<0.000000e+00> : vector<1x128xf32>
    %228 = tpu.matmul %227, %226, %cst_87 {dimension_numbers = #tpu.dot_dimension_numbers<[1], [0], [0], [1], [0, 0, 1, 1], [], []>} : vector<1x16xf32>, vector<16x128xf32>, vector<1x128xf32> -> vector<1x128xf32>
    %229 = arith.negf %228 : vector<1x128xf32>
    %230 = math.exp %229 : vector<1x128xf32>
    %cst_88 = arith.constant 1.000000e+00 : f32
    %231 = vector.broadcast %cst_88 : f32 to vector<1x128xf32>
    %232 = arith.addf %231, %230 : vector<1x128xf32>
    %233 = arith.divf %231, %232 : vector<1x128xf32>
    %c0_89 = arith.constant 0 : index
    %c0_90 = arith.constant 0 : index
    %234 = vector.load %arg6[%c0_89, %c0_90] : memref<1x128xf32, #tpu.memory_space<vmem>>, vector<1x128xf32>
    tpu.vector_store %arg6[%c0_89, %c0_90], %233 {strides = array<i32>} : memref<1x128xf32, #tpu.memory_space<vmem>>, vector<1x128xf32>,
    return
  }
  func.func @transform_0(%arg0: i32) -> (i32, i32) {
    %c0_i32 = arith.constant 0 : i32
    %c0_i32_0 = arith.constant 0 : i32
    return %c0_i32, %arg0 : i32, i32
  }
  func.func @transform_1(%arg0: i32) -> (i32, i32, i32) {
    %c0_i32 = arith.constant 0 : i32
    %c0_i32_0 = arith.constant 0 : i32
    %c0_i32_1 = arith.constant 0 : i32
    %c0_i32_2 = arith.constant 0 : i32
    return %c0_i32, %c0_i32_0, %c0_i32_1 : i32, i32, i32
  }
  func.func @transform_2(%arg0: i32) -> (i32, i32, i32) {
    %c0_i32 = arith.constant 0 : i32
    %c0_i32_0 = arith.constant 0 : i32
    %c0_i32_1 = arith.constant 0 : i32
    %c0_i32_2 = arith.constant 0 : i32
    return %c0_i32, %c0_i32_0, %c0_i32_1 : i32, i32, i32
  }
  func.func @transform_3(%arg0: i32) -> (i32, i32, i32) {
    %c0_i32 = arith.constant 0 : i32
    %c0_i32_0 = arith.constant 0 : i32
    %c0_i32_1 = arith.constant 0 : i32
    %c0_i32_2 = arith.constant 0 : i32
    return %c0_i32, %c0_i32_0, %c0_i32_1 : i32, i32, i32
  }
  func.func @transform_4(%arg0: i32) -> (i32, i32) {
    %c0_i32 = arith.constant 0 : i32
    %c0_i32_0 = arith.constant 0 : i32
    %c0_i32_1 = arith.constant 0 : i32
    return %c0_i32, %c0_i32_0 : i32, i32
  }
  func.func @transform_5(%arg0: i32) -> (i32, i32) {
    %c0_i32 = arith.constant 0 : i32
    %c0_i32_0 = arith.constant 0 : i32
    return %c0_i32, %arg0 : i32, i32
  }
}

</mosaic_0001>

<bundles_post_ra>
// kernel: tpu_custom_call.1
= control target key start
LH: loop header
LB: loop body
LE: loop exit
PB: predicated region body
PF: predicated region fallthrough
CT: control target
= control target key end

     0   :  { %v22_v0 = vlaneseq  ;;  %s7148_s0 = inlined_call_operand.vmem [shape: f32[8,128], index: 0, kind: input, shape index: {}]   ;;  %s7149_s1 = inlined_call_operand.vmem [shape: f32[4,128,16], index: 1, kind: input, shape index: {}]   ;;  %s7150_s2 = inlined_call_operand.vmem [shape: f32[4,8,128], index: 2, kind: input, shape index: {}]   ;;  %s7151_s3 = inlined_call_operand.vmem [shape: f32[4,24,1], index: 3, kind: input, shape index: {}]   ;;  %s7152_s4 = inlined_call_operand.vmem [shape: f32[1,16], index: 4, kind: input, shape index: {}]   ;;  %s7153_s5 = inlined_call_operand.hbm [shape: f32[1,128], index: 5, kind: output, shape index: {}]  }
   0x2   :  { %v4310_v1 = vshrl.u32 %v22_v0, 7 }
   0x4   :  { %7212 = vst [vmem:[#allocation5_spill] sm:$0xff] %v4310_v1 }
   0x5   :  { %10 = vsyncpa [#allocation3], 0  ;;  %vm24_vm0 = vcmp.eq.s32.totalorder %v4310_v1, 0  ;;  %v21_v2 = vld [vmem:[%s7148_s0] sm:$0xff]  ;;  %v7154_v3 = vmov 1.0   ;;  %vm46_vm1 = vcmask 130048  }
   0x6   :  { %3893 = vmatpush.msk.msra.mxu0 %vm24_vm0, %v7154_v3  ;;  %v30_v4 = vld [vmem:[%s7149_s1] sm:$0xff]  ;;  %3946 = vmatpush.msk.msra.mxu2 %vm24_vm0, %v7154_v3  ;;  %v31_v5 = vld [vmem:[%s7149_s1 + $0x8] sm:$0xff]  ;;  %v32_v6 = vld [vmem:[%s7149_s1 + $0x10] sm:$0xff]  ;;  %s4279_s24 = smov [#allocation2]   ;;  %s3883_s27 = sshll.u32 %s7153_s5, 4  ;;  %s3884_s27 = int_to_ptr.hbm [resolvable:$true] %s3883_s27 }
   0x7   :  { %v33_v7 = vld [vmem:[%s7149_s1 + $0x18] sm:$0xff]  ;;  %v34_v8 = vld [vmem:[%s7149_s1 + $0x20] sm:$0xff]  ;;  %v35_v9 = vld [vmem:[%s7149_s1 + $0x28] sm:$0xff]  ;;  %s3881_s25 = sshll.u32 %s4279_s24, 4  ;;  %s3882_s25 = int_to_ptr.vmem [resolvable:$true] %s3881_s25 }
   0x8   :  { %110 = vmatpush.msra.mxu0 %v21_v2  ;;  %v36_v10 = vld [vmem:[%s7149_s1 + $0x30] sm:$0xff]  ;;  %v37_v11 = vld [vmem:[%s7149_s1 + $0x38] sm:$0xff]  ;;  %v38_v12 = vld [vmem:[%s7149_s1 + $0x40] sm:$0xff] }
   0x9   :  { %3894 = vmatmul.msk.f32.vlgmr.msra.gmra.mxu0 %vm46_vm1, %v30_v4  ;;  %v39_v13 = vld [vmem:[%s7149_s1 + $0x48] sm:$0xff]  ;;  %v40_v14 = vld [vmem:[%s7149_s1 + $0x50] sm:$0xff]  ;;  %v41_v15 = vld [vmem:[%s7149_s1 + $0x58] sm:$0xff] }
   0xa   :  { %v42_v16 = vld [vmem:[%s7149_s1 + $0x60] sm:$0xff]  ;;  %v43_v17 = vld [vmem:[%s7149_s1 + $0x68] sm:$0xff]  ;;  %v44_v18 = vld [vmem:[%s7149_s1 + $0x70] sm:$0xff] }
   0xb   :  { %v45_v19 = vld [vmem:[%s7149_s1 + $0x78] sm:$0xff] }
  0x11   :  { %3895 = vmatmul.msk.f32.gmra.mxu0 %vm46_vm1, %v31_v5 }
  0x19   :  { %3896 = vmatmul.msk.f32.gmra.mxu0 %vm46_vm1, %v32_v6 }
  0x21   :  { %3897 = vmatmul.msk.f32.gmra.mxu0 %vm46_vm1, %v33_v7 }
  0x29   :  { %3898 = vmatmul.msk.f32.gmra.mxu0 %vm46_vm1, %v34_v8 }
  0x31   :  { %3899 = vmatmul.msk.f32.gmra.mxu0 %vm46_vm1, %v35_v9 }
  0x39   :  { %3900 = vmatmul.msk.f32.gmra.mxu0 %vm46_vm1, %v36_v10 }
  0x41   :  { %3901 = vmatmul.msk.f32.gmra.mxu0 %vm46_vm1, %v37_v11 }
  0x49   :  { %3902 = vmatmul.msk.f32.gmra.mxu0 %vm46_vm1, %v38_v12 }
  0x51   :  { %3903 = vmatmul.msk.f32.gmra.mxu0 %vm46_vm1, %v39_v13 }
  0x59   :  { %3904 = vmatmul.msk.f32.gmra.mxu0 %vm46_vm1, %v40_v14 }
  0x61   :  { %3905 = vmatmul.msk.f32.gmra.mxu0 %vm46_vm1, %v41_v15 }
  0x69   :  { %3906 = vmatmul.msk.f32.gmra.mxu0 %vm46_vm1, %v42_v16 }
  0x71   :  { %3907 = vmatmul.msk.f32.gmra.mxu0 %vm46_vm1, %v43_v17 }
  0x79   :  { %3908 = vmatmul.msk.f32.gmra.mxu0 %vm46_vm1, %v44_v18 }
  0x81   :  { %3909 = vmatmul.msk.f32.gmra.mxu0 %vm46_vm1, %v45_v19 }
  0x86   :  { %v4386_v20 = vpop.f32.mrf.mxu0 }
  0x87   :  { %7213 = vst [vmem:[#allocation6_spill] sm:$0xff] %v4386_v20  ;;  %v4457_v56 = vmul.f32 0.70710677, %v4386_v20 }
  0x89   :  { %7223 = vst [vmem:[#allocation16_spill] sm:$0xff] %v4457_v56  ;;  %v192_v6 = vmul.f32 %v4457_v56, %v4457_v56 }
  0x8b   :  { %v4479_v16 = vmin.f32 %v192_v6, 16.0 }
  0x8e   :  { %v4388_v21 = vpop.f32.mrf.mxu0 }
  0x8f   :  { %7214 = vst [vmem:[#allocation7_spill] sm:$0xff] %v4388_v21  ;;  %v4405_v28 = vmul.f32 0.70710677, %v4388_v21 }
  0x91   :  { %7219 = vst [vmem:[#allocation12_spill] sm:$0xff] %v4405_v28  ;;  %v232_v34 = vmul.f32 %v4405_v28, %v4405_v28 }
  0x93   :  { %v4432_v40 = vmin.f32 %v232_v34, 16.0 }
  0x95   :  { %v234_v48 = vmul.f32 2.1237322e-06, %v4432_v40 }
  0x96   :  { %v4390_v22 = vpop.f32.mrf.mxu0 }
  0x97   :  { %7215 = vst [vmem:[#allocation8_spill] sm:$0xff] %v4390_v22  ;;  %v4399_v26 = vmul.f32 0.70710677, %v4390_v22  ;;  %v235_v57 = vadd.f32 0.00028619796, %v234_v48 }
  0x98   :  { %v194_v48 = vmul.f32 2.1237322e-06, %v4479_v16 }
  0x99   :  { %7218 = vst [vmem:[#allocation11_spill] sm:$0xff] %v4399_v26  ;;  %v272_v31 = vmul.f32 %v4399_v26, %v4399_v26  ;;  %v236_v7 = vmul.f32 %v235_v57, %v4432_v40 }
  0x9b   :  { %v4428_v38 = vmin.f32 %v272_v31, 16.0  ;;  %v237_v17 = vadd.f32 0.0036580483, %v236_v7 }
  0x9d   :  { %v274_v45 = vmul.f32 2.1237322e-06, %v4428_v38 }
  0x9e   :  { %v4392_v23 = vpop.f32.mrf.mxu0 }
  0x9f   :  { %7216 = vst [vmem:[#allocation9_spill] sm:$0xff] %v4392_v23  ;;  %v4408_v29 = vmul.f32 0.70710677, %v4392_v23  ;;  %v275_v53 = vadd.f32 0.00028619796, %v274_v45 }
  0xa1   :  { %7220 = vst [vmem:[#allocation13_spill] sm:$0xff] %v4408_v29  ;;  %v312_v35 = vmul.f32 %v4408_v29, %v4408_v29  ;;  %v276_v0 = vmul.f32 %v275_v53, %v4428_v38 }
  0xa3   :  { %v4434_v41 = vmin.f32 %v312_v35, 16.0  ;;  %v277_v12 = vadd.f32 0.0036580483, %v276_v0  ;;  %v195_v0 = vadd.f32 0.00028619796, %v194_v48 }
  0xa5   :  { %v314_v49 = vmul.f32 2.1237322e-06, %v4434_v41  ;;  %v278_v35 = vmul.f32 %v277_v12, %v4428_v38 }
  0xa6   :  { %v4394_v24 = vpop.f32.mrf.mxu0 }
  0xa7   :  { %7217 = vst [vmem:[#allocation10_spill] sm:$0xff] %v4394_v24  ;;  %v4424_v36 = vmul.f32 0.70710677, %v4394_v24  ;;  %v315_v58 = vadd.f32 0.00028619796, %v314_v49  ;;  %v238_v49 = vmul.f32 %v237_v17, %v4432_v40 }
  0xa8   :  { %v279_v57 = vadd.f32 0.05243302, %v278_v35 }
  0xa9   :  { %7222 = vst [vmem:[#allocation15_spill] sm:$0xff] %v4424_v36  ;;  %v352_v43 = vmul.f32 %v4424_v36, %v4424_v36  ;;  %v316_v8 = vmul.f32 %v315_v58, %v4434_v41 }
  0xab   :  { %v4451_v51 = vmin.f32 %v352_v43, 16.0  ;;  %v317_v18 = vadd.f32 0.0036580483, %v316_v8 }
  0xad   :  { %v354_v61 = vmul.f32 2.1237322e-06, %v4451_v51 }
  0xae   :  { %v4396_v25 = vpop.f32.mrf.mxu0 }
  0xaf   :  { %v4402_v27 = vmul.f32 0.70710677, %v4396_v25  ;;  %v355_v9 = vadd.f32 0.00028619796, %v354_v61 }
  0xb1   :  { %v392_v32 = vmul.f32 %v4402_v27, %v4402_v27  ;;  %v356_v31 = vmul.f32 %v355_v9, %v4451_v51  ;;  %v280_v9 = vmul.f32 %v279_v57, %v4428_v38 }
  0xb3   :  { %v4430_v39 = vmin.f32 %v392_v32, 16.0  ;;  %v281_v48 = vadd.f32 0.18741608, %v280_v9 }
  0xb5   :  { %v394_v46 = vmul.f32 2.1237322e-06, %v4430_v39 }
  0xb6   :  { %v4410_v30 = vpop.f32.mrf.mxu0 }
  0xb7   :  { %7221 = vst [vmem:[#allocation14_spill] sm:$0xff] %v4410_v30  ;;  %v4417_v33 = vmul.f32 0.70710677, %v4410_v30  ;;  %v395_v54 = vadd.f32 0.00028619796, %v394_v46 }
  0xb9   :  { %v432_v37 = vmul.f32 %v4417_v33, %v4417_v33  ;;  %v396_v2 = vmul.f32 %v395_v54, %v4430_v39 }
  0xbb   :  { %v4440_v44 = vmin.f32 %v432_v37, 16.0  ;;  %v397_v13 = vadd.f32 0.0036580483, %v396_v2  ;;  %v239_v2 = vadd.f32 0.05243302, %v238_v49 }
  0xbd   :  { %v434_v52 = vmul.f32 2.1237322e-06, %v4440_v44  ;;  %v398_v37 = vmul.f32 %v397_v13, %v4430_v39 }
  0xbe   :  { %v4436_v42 = vpop.f32.mrf.mxu0 }
  0xbf   :  { %v4445_v47 = vmul.f32 0.70710677, %v4436_v42  ;;  %v435_v62 = vadd.f32 0.00028619796, %v434_v52  ;;  %v357_v52 = vadd.f32 0.0036580483, %v356_v31  ;;  %v240_v31 = vmul.f32 %v239_v2, %v4432_v40 }
  0xc0   :  { %v399_v58 = vadd.f32 0.05243302, %v398_v37 }
  0xc1   :  { %v472_v50 = vmul.f32 %v4445_v47, %v4445_v47  ;;  %v436_v10 = vmul.f32 %v435_v62, %v4440_v44  ;;  %v358_v6 = vmul.f32 %v357_v52, %v4451_v51  ;;  %v4528_v2 = vadd.f32 0.18741608, %v240_v31 }
  0xc3   :  { %v4454_v55 = vmin.f32 %v472_v50, 16.0  ;;  %v437_v32 = vadd.f32 0.0036580483, %v436_v10  ;;  %v318_v50 = vmul.f32 %v317_v18, %v4434_v41  ;;  %v400_v10 = vmul.f32 %v399_v58, %v4430_v39  ;;  %7225 = vst [vmem:[#allocation18_spill] sm:$0xff] %v4528_v2 }
  0xc4   :  { %v196_v18 = vmul.f32 %v195_v0, %v4479_v16  ;;  %v359_v37 = vadd.f32 0.05243302, %v358_v6 }
  0xc5   :  { %v474_v59 = vmul.f32 2.1237322e-06, %v4454_v55  ;;  %v438_v53 = vmul.f32 %v437_v32, %v4440_v44 }
  0xc6   :  { %v4460_v60 = vpop.f32.mrf.mxu0  ;;  %v4521_v58 = vadd.f32 0.0036580483, %v196_v18  ;;  %v360_v6 = vmul.f32 %v359_v37, %v4451_v51 }
  0xc7   :  { %v4464_v63 = vmul.f32 0.70710677, %v4460_v60  ;;  %v475_v4 = vadd.f32 0.00028619796, %v474_v59  ;;  %v439_v7 = vadd.f32 0.05243302, %v438_v53 }
  0xc8   :  { %7224 = vst [vmem:[#allocation17_spill] sm:$0xff] %v4521_v58 }
  0xc9   :  { %v512_v5 = vmul.f32 %v4464_v63, %v4464_v63  ;;  %v476_v14 = vmul.f32 %v475_v4, %v4454_v55  ;;  %v319_v4 = vadd.f32 0.05243302, %v318_v50  ;;  %v401_v50 = vadd.f32 0.18741608, %v400_v10 }
  0xcb   :  { %v4475_v11 = vmin.f32 %v512_v5, 16.0  ;;  %v477_v43 = vadd.f32 0.0036580483, %v476_v14  ;;  %v320_v32 = vmul.f32 %v319_v4, %v4434_v41 }
  0xcd   :  { %v514_v15 = vmul.f32 2.1237322e-06, %v4475_v11  ;;  %v478_v59 = vmul.f32 %v477_v43, %v4454_v55  ;;  %v440_v43 = vmul.f32 %v439_v7, %v4440_v44  ;;  %v321_v4 = vadd.f32 0.18741608, %v320_v32 }
  0xce   :  { %v4481_v19 = vpop.f32.mrf.mxu0 }
  0xcf   :  { %v4485_v34 = vmul.f32 0.70710677, %v4481_v19  ;;  %v515_v45 = vadd.f32 0.00028619796, %v514_v15  ;;  %v479_v13 = vadd.f32 0.05243302, %v478_v59 }
  0xd0   :  { %v441_v7 = vadd.f32 0.18741608, %v440_v43  ;;  %v4542_v43 = vadd.f32 0.18741608, %v360_v6 }
  0xd1   :  { %v552_v46 = vmul.f32 %v4485_v34, %v4485_v34  ;;  %v516_v61 = vmul.f32 %v515_v45, %v4475_v11  ;;  %v480_v52 = vmul.f32 %v479_v13, %v4454_v55 }
  0xd2   :  { %7227 = vst [vmem:[#allocation20_spill] sm:$0xff] %v4542_v43 }
  0xd3   :  { %v4495_v54 = vmin.f32 %v552_v46, 16.0  ;;  %v517_v14 = vadd.f32 0.0036580483, %v516_v61 }
  0xd5   :  { %v554_v62 = vmul.f32 2.1237322e-06, %v4495_v54  ;;  %v565_v17 = vmul.f32 3.8918573e-05, %v4495_v54  ;;  %v518_v53 = vmul.f32 %v517_v14, %v4475_v11  ;;  %v402_v14 = vmul.f32 %v401_v50, %v4430_v39 }
  0xd6   :  { %v4500_v5 = vpop.f32.mrf.mxu0  ;;  %v4550_v50 = vmul.f32 %v321_v4, %v4434_v41 }
  0xd7   :  { %v555_v8 = vadd.f32 0.00028619796, %v554_v62  ;;  %v4506_v12 = vmul.f32 0.70710677, %v4500_v5  ;;  %v566_v46 = vadd.f32 0.001143296, %v565_v17 }
  0xd8   :  { %v519_v17 = vadd.f32 0.05243302, %v518_v53 }
  0xd9   :  { %v556_v15 = vmul.f32 %v555_v8, %v4495_v54  ;;  %v592_v35 = vmul.f32 %v4506_v12, %v4506_v12  ;;  %v567_v57 = vmul.f32 %v566_v46, %v4495_v54  ;;  %v4532_v8 = vmul.f32 %v281_v48, %v4428_v38 }
  0xda   :  { %v442_v46 = vmul.f32 %v441_v7, %v4440_v44 }
  0xdb   :  { %v557_v45 = vadd.f32 0.0036580483, %v556_v15  ;;  %v4516_v49 = vmin.f32 %v592_v35, 16.0  ;;  %7226 = vst [vmem:[#allocation19_spill] sm:$0xff] %v4532_v8  ;;  %v481_v15 = vadd.f32 0.18741608, %v480_v52 }
  0xdc   :  { %v568_v18 = vadd.f32 0.014752088, %v567_v57 }
  0xdd   :  { %v558_v59 = vmul.f32 %v557_v45, %v4495_v54  ;;  %v594_v61 = vmul.f32 2.1237322e-06, %v4516_v49  ;;  %v605_v0 = vmul.f32 3.8918573e-05, %v4516_v49  ;;  %v4545_v45 = vmul.f32 0.5, %v4396_v25 }
  0xde   :  { %v4525_v62 = vpop.f32.mrf.mxu0  ;;  %v569_v48 = vmul.f32 %v568_v18, %v4495_v54  ;;  %v443_v18 = vadd.f32 1.1283791, %v442_v46 }
  0xdf   :  { %v595_v9 = vadd.f32 0.00028619796, %v594_v61  ;;  %v4535_v10 = vmul.f32 0.70710677, %v4525_v62  ;;  %v606_v13 = vadd.f32 0.001143296, %v605_v0  ;;  %v482_v61 = vmul.f32 %v481_v15, %v4454_v55 }
  0xe0   :  { %v559_v35 = vadd.f32 0.05243302, %v558_v59  ;;  %7228 = vst [vmem:[#allocation21_spill] sm:$0xff] %v4545_v45  ;;  %v403_v59 = vadd.f32 1.1283791, %v402_v14  ;;  %v520_v0 = vmul.f32 %v519_v17, %v4475_v11  ;;  %v4570_v17 = vmul.f32 0.5, %v4460_v60 }
  0xe1   :  { %v596_v31 = vmul.f32 %v595_v9, %v4516_v49  ;;  %v632_v32 = vmul.f32 %v4535_v10, %v4535_v10  ;;  %v607_v37 = vmul.f32 %v606_v13, %v4516_v49  ;;  %v570_v6 = vadd.f32 0.112945676, %v569_v48 }
  0xe2   :  { %v560_v25 = vmul.f32 %v559_v35, %v4495_v54  ;;  %v4574_v48 = vmul.f32 %v403_v59, %v4402_v27  ;;  %v483_v3 = vadd.f32 1.1283791, %v482_v61  ;;  %v4581_v60 = vmul.f32 %v443_v18, %v4417_v33 }
  0xe3   :  { %v597_v52 = vadd.f32 0.0036580483, %v596_v31  ;;  %v4552_v53 = vmin.f32 %v632_v32, 16.0  ;;  %v608_v57 = vadd.f32 0.014752088, %v607_v37  ;;  %v4563_v31 = vmul.f32 0.5, %v4436_v42 }
  0xe4   :  { %v571_v37 = vmul.f32 %v570_v6, %v4495_v54  ;;  %7230 = vst [vmem:[#allocation23_spill] sm:$0xff] %v4574_v48 }
  0xe5   :  { %v634_v9 = vmul.f32 2.1237322e-06, %v4552_v53  ;;  %v645_v13 = vmul.f32 3.8918573e-05, %v4552_v53  ;;  %v609_v4 = vmul.f32 %v608_v57, %v4516_v49  ;;  %7229 = vst [vmem:[#allocation22_spill] sm:$0xff] %v4563_v31  ;;  %v598_v14 = vmul.f32 %v597_v52, %v4516_v49 }
  0xe6   :  { %v4558_v7 = vpop.f32.mrf.mxu0  ;;  %v521_v57 = vadd.f32 0.18741608, %v520_v0  ;;  %v561_v52 = vadd.f32 0.18741608, %v560_v25  ;;  %7231 = vst [vmem:[#allocation24_spill] sm:$0xff] %v4581_v60  ;;  %v4591_v25 = vmul.f32 0.5, %v4500_v5 }
  0xe7   :  { %v4567_v15 = vmul.f32 0.70710677, %v4558_v7  ;;  %v635_v35 = vadd.f32 0.00028619796, %v634_v9  ;;  %v646_v32 = vadd.f32 0.001143296, %v645_v13 }
  0xe8   :  { %v610_v46 = vadd.f32 0.112945676, %v609_v4  ;;  %v4584_v9 = vmul.f32 0.5, %v4481_v19  ;;  %v599_v6 = vadd.f32 0.05243302, %v598_v14  ;;  %v522_v61 = vmul.f32 %v521_v57, %v4475_v11 }
  0xe9   :  { %v672_v42 = vmul.f32 %v4567_v15, %v4567_v15  ;;  %v636_v1 = vmul.f32 %v635_v35, %v4552_v53  ;;  %v647_v20 = vmul.f32 %v646_v32, %v4552_v53  ;;  %v572_v4 = vadd.f32 0.4994258, %v571_v37 }
  0xea   :  { %v611_v13 = vmul.f32 %v610_v46, %v4516_v49  ;;  %v4596_v19 = vmul.f32 %v483_v3, %v4445_v47  ;;  %v562_v18 = vmul.f32 %v561_v52, %v4495_v54  ;;  %v600_v32 = vmul.f32 %v599_v6, %v4516_v49 }
  0xeb   :  { %v4586_v27 = vmin.f32 %v672_v42, 16.0  ;;  %v637_v59 = vadd.f32 0.0036580483, %v636_v1  ;;  %v648_v0 = vadd.f32 0.014752088, %v647_v20  ;;  %v573_v3 = vmul.f32 %v572_v4, %v4495_v54 }
  0xec   :  { %v525_v5 = vmul.f32 3.8918573e-05, %v4475_v11  ;;  %v612_v56 = vadd.f32 0.4994258, %v611_v13  ;;  %v4606_v47 = vadd.f32 1.1283791, %v522_v61 }
  0xed   :  { %v674_v35 = vmul.f32 2.1237322e-06, %v4586_v27  ;;  %v685_v33 = vmul.f32 3.8918573e-05, %v4586_v27  ;;  %v638_v1 = vmul.f32 %v637_v59, %v4552_v53  ;;  %v649_v14 = vmul.f32 %v648_v0, %v4552_v53 }
  0xee   :  { %v151_v20 = vpop.f32.mrf.mxu0  ;;  %v563_v21 = vadd.f32 1.1283791, %v562_v18  ;;  %v4612_v6 = vmul.f32 0.5, %v4525_v62  ;;  %v613_v61 = vmul.f32 %v612_v56, %v4516_v49 }
  0xef   :  { %v675_v37 = vadd.f32 0.00028619796, %v674_v35  ;;  %v4602_v57 = vmul.f32 0.70710677, %v151_v20  ;;  %v639_v42 = vadd.f32 0.05243302, %v638_v1 }
  0xf0   :  { %v686_v46 = vadd.f32 0.001143296, %v685_v33  ;;  %v650_v0 = vadd.f32 0.112945676, %v649_v14  ;;  %v601_v33 = vadd.f32 0.18741608, %v600_v32  ;;  %v4626_v32 = vmul.f32 %v563_v21, %v4485_v34 }
  0xf1   :  { %v676_v52 = vmul.f32 %v675_v37, %v4586_v27  ;;  %v712_v59 = vmul.f32 %v4602_v57, %v4602_v57  ;;  %v640_v35 = vmul.f32 %v639_v42, %v4552_v53  ;;  %v4620_v37 = vadd.f32 1.0, %v573_v3 }
  0xf2   :  { %v687_v1 = vmul.f32 %v686_v46, %v4586_v27  ;;  %v651_v54 = vmul.f32 %v650_v0, %v4552_v53  ;;  %v526_v14 = vadd.f32 0.001143296, %v525_v5  ;;  %v602_v3 = vmul.f32 %v601_v33, %v4516_v49 }
  0xf3   :  { %v677_v13 = vadd.f32 0.0036580483, %v676_v52  ;;  %v4616_v28 = vmin.f32 %v712_v59, 16.0  ;;  %v641_v46 = vadd.f32 0.18741608, %v640_v35  ;;  %v4629_v52 = vmul.f32 0.5, %v4558_v7 }
  0xf4   :  { %v688_v4 = vadd.f32 0.014752088, %v687_v1  ;;  %v652_v22 = vadd.f32 0.4994258, %v651_v54  ;;  %v4636_v54 = vadd.f32 1.0, %v613_v61  ;;  %4099 = vrcp.f32 %v4620_v37 }
  0xf5   :  { %v678_v18 = vmul.f32 %v677_v13, %v4586_v27  ;;  %v714_v62 = vmul.f32 2.1237322e-06, %v4616_v28  ;;  %v725_v42 = vmul.f32 3.8918573e-05, %v4616_v28  ;;  %v527_v35 = vmul.f32 %v526_v14, %v4475_v11 }
  0xf6   :  { %v154_v59 = vpop.f32.mrf.mxu0  ;;  %v689_v56 = vmul.f32 %v688_v4, %v4586_v27  ;;  %v653_v1 = vmul.f32 %v652_v22, %v4552_v53  ;;  %v642_v49 = vmul.f32 %v641_v46, %v4552_v53  ;;  %v4644_v33 = vmul.f32 0.5, %v151_v20 }
  0xf7   :  { %v679_v5 = vadd.f32 0.05243302, %v678_v18  ;;  %v715_v0 = vadd.f32 0.00028619796, %v714_v62  ;;  %v4634_v13 = vmul.f32 0.70710677, %v154_v59  ;;  %vm620_vm11 = vweird.f32 %v4636_v54 }
  0xf8   :  { %v726_v23 = vadd.f32 0.001143296, %v725_v42  ;;  %v690_v34 = vadd.f32 0.112945676, %v689_v56  ;;  %v4640_v7 = vadd.f32 1.0, %v653_v1  ;;  %v4673_v58 = vmul.f32 0.5, %v154_v59 }
  0xf9   :  { %v716_v21 = vmul.f32 %v715_v0, %v4616_v28  ;;  %v752_v22 = vmul.f32 %v4634_v13, %v4634_v13  ;;  %v680_v61 = vmul.f32 %v679_v5, %v4586_v27  ;;  %v603_v42 = vadd.f32 1.1283791, %v602_v3 }
  0xfa   :  { %v727_v4 = vmul.f32 %v726_v23, %v4616_v28  ;;  %v691_v62 = vmul.f32 %v690_v34, %v4586_v27  ;;  %4101 = vrcp.f32 %v4640_v7  ;;  %v4657_v0 = vadd.f32 0.014752088, %v527_v35  ;;  %v4659_v23 = vpop.eup %4099 }
  0xfb   :  { %v717_v18 = vadd.f32 0.0036580483, %v716_v21  ;;  %v4652_v56 = vmin.f32 %v752_v22, 16.0  ;;  %4103 = vrcp.f32 %v4636_v54  ;;  %v643_v22 = vadd.f32 1.1283791, %v642_v49 }
  0xfc   :  { %v728_v14 = vadd.f32 0.014752088, %v727_v4  ;;  %v692_v20 = vadd.f32 0.4994258, %v691_v62  ;;  %v681_v4 = vadd.f32 0.18741608, %v680_v61  ;;  %v4667_v62 = vmul.f32 %v603_v42, %v4506_v12 }
  0xfd   :  { %v718_v53 = vmul.f32 %v717_v18, %v4616_v28  ;;  %v754_v5 = vmul.f32 2.1237322e-06, %v4652_v56  ;;  %v765_v21 = vmul.f32 3.8918573e-05, %v4652_v56  ;;  %v4679_v49 = vmul.f32 %v4659_v23, %v4620_v37 }
  0xfe   :  { %v157_v1 = vpop.f32.mrf.mxu0  ;;  %v729_v3 = vmul.f32 %v728_v14, %v4616_v28  ;;  %v693_v18 = vmul.f32 %v692_v20, %v4586_v27  ;;  %v682_v20 = vmul.f32 %v681_v4, %v4586_v27  ;;  %v664_v29 = vand.u32 2147483647, %v4640_v7 }
  0xff   :  { %v719_v26 = vadd.f32 0.05243302, %v718_v53  ;;  %v755_v35 = vadd.f32 0.00028619796, %v754_v5  ;;  %v4669_v46 = vmul.f32 0.70710677, %v157_v1  ;;  %vm660_vm2 = vweird.f32 %v4640_v7 }
 0x100   :  { %v766_v24 = vadd.f32 0.001143296, %v765_v21  ;;  %v4671_v2 = vpop.eup %4101  ;;  %v730_v36 = vadd.f32 0.112945676, %v729_v3  ;;  %v4675_v14 = vadd.f32 1.0, %v693_v18  ;;  %v4694_v3 = vmul.f32 %v643_v22, %v4535_v10 }
 0x101   :  { %v4681_v61 = vpop.eup %4103  ;;  %v756_v12 = vmul.f32 %v755_v35, %v4652_v56  ;;  %v792_v42 = vmul.f32 %v4669_v46, %v4669_v46  ;;  %v656_v59 = vmul.f32 %v4671_v2, %v4640_v7  ;;  %v720_v5 = vmul.f32 %v719_v26, %v4616_v28 }
 0x102   :  { %v767_v53 = vmul.f32 %v766_v24, %v4652_v56  ;;  %v731_v21 = vmul.f32 %v730_v36, %v4616_v28  ;;  %4105 = vrcp.f32 %v4675_v14  ;;  %v4701_v27 = vmul.f32 %v4681_v61, %v4636_v54 }
 0x103   :  { %v757_v18 = vadd.f32 0.0036580483, %v756_v12  ;;  %v4696_v35 = vmin.f32 %v792_v42, 16.0  ;;  %v657_v24 = vsub.f32 1.0, %v656_v59  ;;  %v683_v22 = vadd.f32 1.1283791, %v682_v20 }
 0x104   :  { %v768_v34 = vadd.f32 0.014752088, %v767_v53  ;;  %v732_v45 = vadd.f32 0.4994258, %v731_v21  ;;  %v721_v12 = vadd.f32 0.18741608, %v720_v5  ;;  %vm661_vm4 = vweird.f32 %v4671_v2 }
 0x105   :  { %v758_v26 = vmul.f32 %v757_v18, %v4652_v56  ;;  %v794_v36 = vmul.f32 2.1237322e-06, %v4696_v35  ;;  %v805_v4 = vmul.f32 3.8918573e-05, %v4696_v35  ;;  %v666_v53 = vand.u32 2147483648, %v4640_v7  ;;  %vm662_vm6 = vmor %vm660_vm2, %vm661_vm4 }
 0x106   :  { %v769_v10 = vmul.f32 %v768_v34, %v4652_v56  ;;  %v733_v42 = vmul.f32 %v732_v45, %v4616_v28  ;;  %v658_v31 = vmul.f32 %v4671_v2, %v657_v24  ;;  %vm4715_vm3 = vcmp.eq.f32.partialorder %v664_v29, 8.507059e+37 }
 0x107   :  { %v759_v59 = vadd.f32 0.05243302, %v758_v26  ;;  %v795_v21 = vadd.f32 0.00028619796, %v794_v36  ;;  %v806_v30 = vadd.f32 0.001143296, %v805_v4  ;;  %v722_v36 = vmul.f32 %v721_v12, %v4616_v28 }
 0x108   :  { %v4710_v8 = vpop.eup %4105  ;;  %v770_v18 = vadd.f32 0.112945676, %v769_v10  ;;  %v4712_v48 = vadd.f32 1.0, %v733_v42  ;;  %v4725_v4 = vmul.f32 0.5, %v157_v1  ;;  %v684_v29 = vmul.f32 %v683_v22, %v4567_v15 }
 0x109   :  { %v760_v45 = vmul.f32 %v759_v59, %v4652_v56  ;;  %v796_v20 = vmul.f32 %v795_v21, %v4696_v35  ;;  %v807_v5 = vmul.f32 %v806_v30, %v4696_v35  ;;  %v696_v26 = vmul.f32 %v4710_v8, %v4675_v14 }
 0x10a   :  { %v771_v10 = vmul.f32 %v770_v18, %v4652_v56  ;;  %4107 = vrcp.f32 %v4712_v48  ;;  %vm700_vm5 = vweird.f32 %v4675_v14  ;;  %v706_v1 = vand.u32 2147483648, %v4675_v14 }
 0x10b   :  { %v797_v24 = vadd.f32 0.0036580483, %v796_v20  ;;  %v808_v42 = vadd.f32 0.014752088, %v807_v5  ;;  %v761_v59 = vadd.f32 0.18741608, %v760_v45  ;;  %v659_v12 = vadd.f32 %v4671_v2, %v658_v31 }
 0x10c   :  { %v772_v21 = vadd.f32 0.4994258, %v771_v10  ;;  %v697_v30 = vsub.f32 1.0, %v696_v26  ;;  %v723_v18 = vadd.f32 1.1283791, %v722_v36  ;;  %v667_v10 = vor.u32 1.1754944e-38, %v666_v53 }
 0x10d   :  { %v798_v60 = vmul.f32 %v797_v24, %v4696_v35  ;;  %v809_v28 = vmul.f32 %v808_v42, %v4696_v35  ;;  %v704_v20 = vand.u32 2147483647, %v4675_v14  ;;  %v663_v26 = vsel %vm662_vm6, %v4671_v2, %v659_v12 }
 0x10e   :  { %v773_v15 = vmul.f32 %v772_v21, %v4652_v56  ;;  %v698_v22 = vmul.f32 %v4710_v8, %v697_v30  ;;  %v762_v42 = vmul.f32 %v761_v59, %v4652_v56  ;;  %vm701_vm7 = vweird.f32 %v4710_v8 }
 0x10f   :  { %v799_v45 = vadd.f32 0.05243302, %v798_v60  ;;  %v810_v5 = vadd.f32 0.112945676, %v809_v28  ;;  %v668_v60 = vsel %vm4715_vm3, %v667_v10, %v663_v26  ;;  %vm4753_vm8 = vcmp.eq.f32.partialorder %v704_v20, 8.507059e+37  ;;  %vm702_vm10 = vmor %vm700_vm5, %vm701_vm7 }
 0x110   :  { %v4108_v24 = vpop.eup %4107  ;;  %v4743_v43 = vadd.f32 1.0, %v773_v15  ;;  %v699_v31 = vadd.f32 %v4710_v8, %v698_v22  ;;  %v707_v56 = vor.u32 1.1754944e-38, %v706_v1  ;;  %v617_v53 = vsub.f32 1.0, %v4701_v27 }
 0x111   :  { %v800_v36 = vmul.f32 %v799_v45, %v4696_v35  ;;  %v811_v21 = vmul.f32 %v810_v5, %v4696_v35  ;;  %v736_v7 = vmul.f32 %v4108_v24, %v4712_v48  ;;  %vm621_vm9 = vweird.f32 %v4681_v61 }
 0x112   :  { %4109 = vrcp.f32 %v4743_v43  ;;  %v724_v59 = vmul.f32 %v723_v18, %v4602_v57  ;;  %v744_v34 = vand.u32 2147483647, %v4712_v48  ;;  %v746_v15 = vand.u32 2147483648, %v4712_v48  ;;  %vm4811_vm6 = vmor %vm620_vm11, %vm621_vm9 }
 0x113   :  { %v801_v30 = vadd.f32 0.18741608, %v800_v36  ;;  %v812_v28 = vadd.f32 0.4994258, %v811_v21  ;;  %v737_v12 = vsub.f32 1.0, %v736_v7  ;;  %v703_v22 = vsel %vm702_vm10, %v4710_v8, %v699_v31 }
 0x114   :  { %v669_v1 = vmul.f32 %v668_v60, %v4694_v3  ;;  %v763_v27 = vadd.f32 1.1283791, %v762_v42  ;;  %v708_v18 = vsel %vm4753_vm8, %v707_v56, %v703_v22  ;;  %v784_v14 = vand.u32 2147483647, %v4743_v43 }
 0x115   :  { %v813_v20 = vmul.f32 %v812_v28, %v4696_v35  ;;  %v738_v57 = vmul.f32 %v4108_v24, %v737_v12  ;;  %vm740_vm12 = vweird.f32 %v4712_v48  ;;  %vm741_vm13 = vweird.f32 %v4108_v24 }
 0x116   :  { %v618_v45 = vmul.f32 %v4681_v61, %v617_v53  ;;  %v802_v8 = vmul.f32 %v801_v30, %v4696_v35  ;;  %v786_v3 = vand.u32 2147483648, %v4743_v43  ;;  %vm4777_vm14 = vcmp.eq.f32.partialorder %v744_v34, 8.507059e+37  ;;  %vm742_vm3 = vmor %vm740_vm12, %vm741_vm13 }
 0x117   :  { %v4774_v5 = vadd.f32 1.0, %v813_v20  ;;  %v739_v26 = vadd.f32 %v4108_v24, %v738_v57  ;;  %v747_v31 = vor.u32 1.1754944e-38, %v746_v15  ;;  %v709_v36 = vmul.f32 %v708_v18, %v684_v29 }
 0x118   :  { %v4110_v10 = vpop.eup %4109  ;;  %v3921_v21 = vclamps-f32 %v669_v1, 1.0  ;;  %v7238_v7 = vand.u32 2147483647, %v4636_v54  ;;  %v764_v35 = vmul.f32 %v763_v27, %v4634_v13  ;;  %vm780_vm2 = vweird.f32 %v4743_v43 }
 0x119   :  { %4111 = vrcp.f32 %v4774_v5  ;;  %v577_v2 = vsub.f32 1.0, %v4679_v49  ;;  %v776_v29 = vmul.f32 %v4110_v10, %v4743_v43  ;;  %vm4795_vm4 = vcmp.eq.f32.partialorder %v784_v14, 8.507059e+37 }
 0x11a   :  { %vm4783_vm15 = vcmp.eq.f32.partialorder %v7238_v7, 8.507059e+37  ;;  %v743_v53 = vsel %vm742_vm3, %v4108_v24, %v739_v26  ;;  %v619_v30 = vadd.f32 %v4681_v61, %v618_v45  ;;  %v803_v13 = vadd.f32 1.1283791, %v802_v8 }
 0x11b   :  { %v787_v28 = vor.u32 1.1754944e-38, %v786_v3  ;;  %v748_v12 = vsel %vm4777_vm14, %v747_v31, %v743_v53  ;;  %v7243_v34 = vand.u32 2147483648, %v4636_v54  ;;  %v824_v15 = vand.u32 2147483647, %v4774_v5 }
 0x11c   :  { %v777_v49 = vsub.f32 1.0, %v776_v29  ;;  %v3922_v22 = vclamps-f32 %v709_v36, 1.0  ;;  %v4805_v1 = vadd.f32 1.0, %v3921_v21  ;;  %vm781_vm5 = vweird.f32 %v4110_v10 }
 0x11d   :  { %v627_v48 = vor.u32 1.1754944e-38, %v7243_v34  ;;  %v578_v27 = vmul.f32 %v4659_v23, %v577_v2  ;;  %vm580_vm7 = vweird.f32 %v4620_v37  ;;  %vm581_vm8 = vweird.f32 %v4659_v23  ;;  %vm782_vm12 = vmor %vm780_vm2, %vm781_vm5 }
 0x11e   :  { %vm820_vm10 = vweird.f32 %v4774_v5  ;;  %v778_v20 = vmul.f32 %v4110_v10, %v777_v49  ;;  %v749_v57 = vmul.f32 %v748_v12, %v724_v59  ;;  %v623_v18 = vsel %vm4811_vm6, %v4681_v61, %v619_v30  ;;  %vm582_vm11 = vmor %vm580_vm7, %vm581_vm8 }
 0x11f   :  { %v584_v54 = vand.u32 2147483647, %v4620_v37  ;;  %v4112_v14 = vpop.eup %4111  ;;  %v579_v45 = vadd.f32 %v4659_v23, %v578_v27  ;;  %v586_v8 = vand.u32 2147483648, %v4620_v37  ;;  %v529_v3 = vmul.f32 %v4657_v0, %v4475_v11 }
 0x120   :  { %v485_v26 = vmul.f32 3.8918573e-05, %v4454_v55  ;;  %v816_v42 = vmul.f32 %v4112_v14, %v4774_v5  ;;  %vm4829_vm9 = vcmp.eq.f32.partialorder %v824_v15, 8.507059e+37  ;;  %v826_v61 = vand.u32 2147483648, %v4774_v5 }
 0x121   :  { %v779_v31 = vadd.f32 %v4110_v10, %v778_v20  ;;  %v844_v0 = vadd.f32 1.0, %v3922_v22  ;;  %v628_v36 = vsel %vm4783_vm15, %v627_v48, %v623_v18  ;;  %v583_v21 = vsel %vm582_vm11, %v4659_v23, %v579_v45 }
 0x122   :  { %v587_v7 = vor.u32 1.1754944e-38, %v586_v8  ;;  %v817_v2 = vsub.f32 1.0, %v816_v42  ;;  %vm585_vm13 = vcmp.eq.f32.partialorder %v584_v54, 8.507059e+37  ;;  %v530_v53 = vadd.f32 0.112945676, %v529_v3 }
 0x123   :  { %v783_v29 = vsel %vm782_vm12, %v4110_v10, %v779_v31  ;;  %v3923_v37 = vclamps-f32 %v749_v57, 1.0  ;;  %v486_v34 = vadd.f32 0.001143296, %v485_v26  ;;  %vm821_vm14 = vweird.f32 %v4112_v14 }
 0x124   :  { %v788_v30 = vsel %vm4795_vm4, %v787_v28, %v783_v29  ;;  %v588_v12 = vsel %vm585_vm13, %v587_v7, %v583_v21  ;;  %v818_v15 = vmul.f32 %v4112_v14, %v817_v2  ;;  %v629_v43 = vmul.f32 %v628_v36, %v4667_v62  ;;  %vm822_vm15 = vmor %vm820_vm10, %vm821_vm14 }
 0x125   :  { %v531_v60 = vmul.f32 %v530_v53, %v4475_v11  ;;  %v827_v48 = vor.u32 1.1754944e-38, %v826_v61  ;;  %v487_v23 = vmul.f32 %v486_v34, %v4454_v55  ;;  %v445_v49 = vmul.f32 3.8918573e-05, %v4440_v44 }
 0x126   :  { %v405_v10 = vmul.f32 3.8918573e-05, %v4430_v39  ;;  %v819_v22 = vadd.f32 %v4112_v14, %v818_v15  ;;  %v789_v24 = vmul.f32 %v788_v30, %v764_v35  ;;  %v589_v56 = vmul.f32 %v588_v12, %v4626_v32  ;;  %v27_v30 = vld [vmem:[%s7151_s3] sm:$0xff] }
 0x127   :  { %v532_v28 = vadd.f32 0.4994258, %v531_v60  ;;  %v804_v27 = vmul.f32 %v803_v13, %v4669_v46  ;;  %v488_v62 = vadd.f32 0.014752088, %v487_v23  ;;  %v446_v20 = vadd.f32 0.001143296, %v445_v49 }
 0x128   :  { %v406_v57 = vadd.f32 0.001143296, %v405_v10  ;;  %v823_v18 = vsel %vm822_vm15, %v4112_v14, %v819_v22  ;;  %v845_v54 = vadd.f32 1.0, %v3923_v37  ;;  %v3920_v45 = vclamps-f32 %v629_v43, 1.0 }
 0x129   :  { %v533_v8 = vmul.f32 %v532_v28, %v4475_v11  ;;  %v828_v3 = vsel %vm4829_vm9, %v827_v48, %v823_v18  ;;  %v489_v35 = vmul.f32 %v488_v62, %v4454_v55  ;;  %v447_v32 = vmul.f32 %v446_v20, %v4440_v44 }
 0x12a   :  { %v407_v46 = vmul.f32 %v406_v57, %v4430_v39  ;;  %v829_v13 = vmul.f32 %v828_v3, %v804_v27  ;;  %v3924_v5 = vclamps-f32 %v789_v24, 1.0  ;;  %v3919_v26 = vclamps-f32 %v589_v56, 1.0 }
 0x12b   :  { %v4861_v42 = vadd.f32 1.0, %v533_v8  ;;  %v4865_v14 = vmul.f32 %v4606_v47, %v4464_v63  ;;  %v490_v61 = vadd.f32 0.112945676, %v489_v35  ;;  %v448_v11 = vadd.f32 0.014752088, %v447_v32 }
 0x12c   :  { %v408_v31 = vadd.f32 0.014752088, %v407_v46  ;;  %v3925_v59 = vclamps-f32 %v829_v13, 1.0  ;;  %v860_v36 = vmul.f32 %v844_v0, %v4629_v52  ;;  %v4870_v21 = vmul.f32 %v4805_v1, %v4612_v6 }
 0x12d   :  { %4113 = vrcp.f32 %v4861_v42  ;;  %v842_v7 = vadd.f32 1.0, %v3920_v45  ;;  %v491_v2 = vmul.f32 %v490_v61, %v4454_v55  ;;  %v449_v29 = vmul.f32 %v448_v11, %v4440_v44 }
 0x12e   :  { %v409_v63 = vmul.f32 %v408_v31, %v4430_v39  ;;  %v847_v47 = vadd.f32 1.0, %v3925_v59  ;;  %v846_v53 = vadd.f32 1.0, %v3924_v5  ;;  %v365_v52 = vmul.f32 3.8918573e-05, %v4451_v51 }
 0x12f   :  { %v861_v6 = vmul.f32 %v845_v54, %v4644_v33  ;;  %v841_v1 = vadd.f32 1.0, %v3919_v26  ;;  %v492_v0 = vadd.f32 0.4994258, %v491_v2  ;;  %v4277_v37 = vmov 0  }
 0x130   :  { %4096 = vset.pattern.permute.xlu0 %v4277_v37  ;;  %v450_v12 = vadd.f32 0.112945676, %v449_v29  ;;  %4097 = vset.pattern.permute.xlu1 %v4277_v37  ;;  %v863_v34 = vmul.f32 %v847_v47, %v4725_v4  ;;  %v410_v15 = vadd.f32 0.112945676, %v409_v63  ;;  %v366_v43 = vadd.f32 0.001143296, %v365_v52 }
 0x131   :  { %867 = vperm.xlu0 %4096, %v27_v30   ;;  %v325_v60 = vmul.f32 3.8918573e-05, %v4434_v41  ;;  %4098 = vset.pattern.permute.xlu2 %v4277_v37  ;;  %v858_v48 = vmul.f32 %v842_v7, %v4591_v25  ;;  %v493_v23 = vmul.f32 %v492_v0, %v4454_v55  ;;  %v285_v49 = vmul.f32 3.8918573e-05, %v4428_v38 }
 0x132   :  { %v451_v33 = vmul.f32 %v450_v12, %v4440_v44  ;;  %870 = vmatpush.msra.mxu1 %v863_v34  ;;  %v862_v22 = vmul.f32 %v846_v53, %v4673_v58  ;;  %v411_v4 = vmul.f32 %v410_v15, %v4430_v39  ;;  %v367_v24 = vmul.f32 %v366_v43, %v4451_v51 }
 0x133   :  { %v4114_v10 = vpop.eup %4113  ;;  %v326_v56 = vadd.f32 0.001143296, %v325_v60  ;;  %v857_v28 = vmul.f32 %v841_v1, %v4584_v9  ;;  %v4892_v25 = vadd.f32 1.0, %v493_v23  ;;  %v286_v18 = vadd.f32 0.001143296, %v285_v49 }
 0x134   :  { %v536_v27 = vmul.f32 %v4114_v10, %v4861_v42  ;;  %v452_v55 = vadd.f32 0.4994258, %v451_v33  ;;  %871 = vmatpush.msra.mxu1 %v862_v22  ;;  %v412_v62 = vadd.f32 0.4994258, %v411_v4  ;;  %v368_v20 = vadd.f32 0.014752088, %v367_v24 }
 0x135   :  { %v327_v57 = vmul.f32 %v326_v56, %v4434_v41  ;;  %v544_v58 = vand.u32 2147483647, %v4861_v42  ;;  %v546_v45 = vand.u32 2147483648, %v4861_v42  ;;  %4115 = vrcp.f32 %v4892_v25 }
 0x136   :  { %v537_v54 = vsub.f32 1.0, %v536_v27  ;;  %872 = vmatpush.msra.mxu1 %v861_v6  ;;  %v453_v9 = vmul.f32 %v452_v55, %v4440_v44  ;;  %v413_v8 = vmul.f32 %v412_v62, %v4430_v39  ;;  %v369_v3 = vmul.f32 %v368_v20, %v4451_v51  ;;  %v28_v55 = vld [vmem:[%s7151_s3 + $0x8] sm:$0xff] }
 0x137   :  { %v245_v35 = vmul.f32 3.8918573e-05, %v4432_v40  ;;  %vm541_vm2 = vweird.f32 %v4114_v10  ;;  %v328_v46 = vadd.f32 0.014752088, %v327_v57  ;;  %v287_v13 = vmul.f32 %v286_v18, %v4428_v38 }
 0x138   :  { %v538_v32 = vmul.f32 %v4114_v10, %v537_v54  ;;  %873 = vmatpush.msra.mxu1 %v860_v36  ;;  %vm540_vm3 = vweird.f32 %v4861_v42  ;;  %v504_v5 = vand.u32 2147483647, %v4892_v25  ;;  %v4905_v26 = vadd.f32 1.0, %v453_v9 }
 0x139   :  { %v4907_v61 = vadd.f32 1.0, %v413_v8  ;;  %vm545_vm4 = vcmp.eq.f32.partialorder %v544_v58, 8.507059e+37  ;;  %v547_v39 = vor.u32 1.1754944e-38, %v546_v45  ;;  %v506_v11 = vand.u32 2147483648, %v4892_v25  ;;  %vm542_vm5 = vmor %vm540_vm3, %vm541_vm2  ;;  %972 = vperm.xlu0 %4096, %v28_v55  }
 0x13a   :  { %v539_v44 = vadd.f32 %v4114_v10, %v538_v32  ;;  %874 = vmatpush.msra.mxu1 %v4870_v21  ;;  %4117 = vrcp.f32 %v4905_v26  ;;  %v370_v31 = vadd.f32 0.112945676, %v369_v3  ;;  %v329_v59 = vmul.f32 %v328_v46, %v4434_v41  ;;  %v7252_v21 = vld [vmem:[#allocation22_spill] sm:$0xff] }
 0x13b   :  { %v288_v42 = vadd.f32 0.014752088, %v287_v13  ;;  %v4116_v36 = vpop.eup %4115  ;;  %4119 = vrcp.f32 %v4907_v61  ;;  %v246_v2 = vadd.f32 0.001143296, %v245_v35  ;;  %v4915_v29 = vmul.f32 3.8918573e-05, %v4479_v16 }
 0x13c   :  { %v543_v7 = vsel %vm542_vm5, %v4114_v10, %v539_v44  ;;  %875 = vmatpush.msra.mxu1 %v858_v48  ;;  %v496_v47 = vmul.f32 %v4116_v36, %v4892_v25  ;;  %vm500_vm6 = vweird.f32 %v4892_v25  ;;  %vm4919_vm7 = vcmp.eq.f32.partialorder %v504_v5, 8.507059e+37 }
 0x13d   :  { %v548_v63 = vsel %vm545_vm4, %v547_v39, %v543_v7  ;;  %v507_v30 = vor.u32 1.1754944e-38, %v506_v11  ;;  %v464_v52 = vand.u32 2147483647, %v4905_v26  ;;  %v466_v6 = vand.u32 2147483648, %v4905_v26  ;;  %v7250_v7 = vld [vmem:[#allocation20_spill] sm:$0xff] }
 0x13e   :  { %v549_v53 = vmul.f32 %v548_v63, %v4865_v14  ;;  %876 = vmatpush.msra.mxu1 %v857_v28  ;;  %v497_v1 = vsub.f32 1.0, %v496_v47  ;;  %v371_v0 = vmul.f32 %v370_v31, %v4451_v51  ;;  %v330_v37 = vadd.f32 0.112945676, %v329_v59 }
 0x13f   :  { %v289_v12 = vmul.f32 %v288_v42, %v4428_v38  ;;  %vm501_vm8 = vweird.f32 %v4116_v36  ;;  %vm460_vm10 = vweird.f32 %v4905_v26  ;;  %v424_v15 = vand.u32 2147483647, %v4907_v61 }
 0x140   :  { %v3918_v34 = vclamps-f32 %v549_v53, 1.0  ;;  %v247_v14 = vmul.f32 %v246_v2, %v4432_v40  ;;  %v4118_v43 = vpop.eup %4117  ;;  %v498_v60 = vmul.f32 %v4116_v36, %v497_v1  ;;  %v372_v48 = vadd.f32 0.4994258, %v371_v0  ;;  %vm502_vm11 = vmor %vm500_vm6, %vm501_vm8  ;;  %v7251_v2 = vld [vmem:[#allocation24_spill] sm:$0xff]  ;;  %v7254_v0 = vld [vmem:[#allocation19_spill] sm:$0xff] }
 0x141   :  { %v331_v23 = vmul.f32 %v330_v37, %v4434_v41  ;;  %v290_v33 = vadd.f32 0.112945676, %v289_v12  ;;  %v4120_v49 = vpop.eup %4119  ;;  %v456_v22 = vmul.f32 %v4118_v43, %v4905_v26  ;;  %v426_v4 = vand.u32 2147483648, %v4907_v61  ;;  %v7255_v12 = vld [vmem:[#allocation14_spill] sm:$0xff] }
 0x142   :  { %v840_v10 = vadd.f32 1.0, %v3918_v34  ;;  %v248_v24 = vadd.f32 0.014752088, %v247_v14  ;;  %v499_v56 = vadd.f32 %v4116_v36, %v498_v60  ;;  %vm461_vm9 = vweird.f32 %v4118_v43 }
 0x143   :  { %v416_v28 = vmul.f32 %v4120_v49, %v4907_v61  ;;  %v373_v27 = vmul.f32 %v372_v48, %v4451_v51  ;;  %v457_v20 = vsub.f32 1.0, %v456_v22  ;;  %v332_v57 = vadd.f32 0.4994258, %v331_v23  ;;  %vm462_vm14 = vmor %vm460_vm10, %vm461_vm9  ;;  %v7256_v48 = vld [vmem:[#allocation13_spill] sm:$0xff] }
 0x144   :  { %v856_v62 = vmul.f32 %v840_v10, %v4570_v17  ;;  %v291_v18 = vmul.f32 %v290_v33, %v4428_v38  ;;  %v503_v54 = vsel %vm502_vm11, %v4116_v36, %v499_v56  ;;  %v249_v9 = vmul.f32 %v248_v24, %v4432_v40 }
 0x145   :  { %v417_v58 = vsub.f32 1.0, %v416_v28  ;;  %v4944_v45 = vadd.f32 1.0, %v373_v27  ;;  %v508_v8 = vsel %vm4919_vm7, %v507_v30, %v503_v54  ;;  %v458_v17 = vmul.f32 %v4118_v43, %v457_v20  ;;  %v7253_v30 = vld [vmem:[#allocation23_spill] sm:$0xff] }
 0x146   :  { %877 = vmatpush.msra.mxu1 %v856_v62  ;;  %v333_v3 = vmul.f32 %v332_v57, %v4434_v41  ;;  %v292_v25 = vadd.f32 0.4994258, %v291_v18  ;;  %v509_v35 = vmul.f32 %v508_v8, %v4596_v19  ;;  %vm421_vm12 = vweird.f32 %v4120_v49  ;;  %v7257_v57 = vld [vmem:[#allocation21_spill] sm:$0xff] }
 0x147   :  { %v418_v32 = vmul.f32 %v4120_v49, %v417_v58  ;;  %4121 = vrcp.f32 %v4944_v45  ;;  %v459_v46 = vadd.f32 %v4118_v43, %v458_v17  ;;  %v467_v13 = vor.u32 1.1754944e-38, %v466_v6 }
 0x148   :  { %vm420_vm13 = vweird.f32 %v4907_v61  ;;  %v4953_v5 = vadd.f32 1.0, %v333_v3  ;;  %v3917_v44 = vclamps-f32 %v509_v35, 1.0  ;;  %v293_v41 = vmul.f32 %v292_v25, %v4428_v38  ;;  %v7258_v35 = vld [vmem:[#allocation15_spill] sm:$0xff] }
 0x149   :  { %v419_v39 = vadd.f32 %v4120_v49, %v418_v32  ;;  %v250_v11 = vadd.f32 0.112945676, %v249_v9  ;;  %v463_v19 = vsel %vm462_vm14, %v4118_v43, %v459_v46  ;;  %vm465_vm15 = vcmp.eq.f32.partialorder %v464_v52, 8.507059e+37  ;;  %vm422_vm2 = vmor %vm420_vm13, %vm421_vm12 }
 0x14a   :  { %v427_v31 = vor.u32 1.1754944e-38, %v426_v4  ;;  %4123 = vrcp.f32 %v4953_v5  ;;  %v839_v59 = vadd.f32 1.0, %v3917_v44  ;;  %v468_v42 = vsel %vm465_vm15, %v467_v13, %v463_v19 }
 0x14b   :  { %v423_v61 = vsel %vm422_vm2, %v4120_v49, %v419_v39  ;;  %vm425_vm3 = vcmp.eq.f32.partialorder %v424_v15, 8.507059e+37  ;;  %v323_v36 = vadd.f32 1.1283791, %v4550_v50  ;;  %v362_v26 = vmul.f32 %v7250_v7, %v4451_v51 }
 0x14c   :  { %v469_v63 = vmul.f32 %v468_v42, %v7251_v2  ;;  %v428_v47 = vsel %vm425_vm3, %v427_v31, %v423_v61  ;;  %v855_v53 = vmul.f32 %v839_v59, %v7252_v21  ;;  %v4966_v6 = vadd.f32 1.0, %v293_v41  ;;  %v7260_v2 = vld [vmem:[#allocation18_spill] sm:$0xff] }
 0x14d   :  { %v4122_v38 = vpop.eup %4121  ;;  %v429_v52 = vmul.f32 %v428_v47, %v7253_v30  ;;  %v251_v1 = vmul.f32 %v250_v11, %v4432_v40  ;;  %v4970_v37 = vadd.f32 1.1283791, %v7254_v0  ;;  %v166_v50 = vmul.f32 0.5, %v7255_v12  ;;  %v7261_v21 = vld [vmem:[#allocation10_spill] sm:$0xff]  ;;  %v7262_v0 = vld [vmem:[#allocation11_spill] sm:$0xff] }
 0x14e   :  { %v3916_v34 = vclamps-f32 %v469_v63, 1.0  ;;  %v376_v51 = vmul.f32 %v4122_v38, %v4944_v45  ;;  %878 = vmatpush.msra.mxu1 %v855_v53  ;;  %v386_v14 = vand.u32 2147483648, %v4944_v45  ;;  %4125 = vrcp.f32 %v4966_v6 }
 0x14f   :  { %v3915_v15 = vclamps-f32 %v429_v52, 1.0  ;;  %v206_v43 = vadd.f32 0.001143296, %v4915_v29  ;;  %v324_v23 = vmul.f32 %v323_v36, %v7256_v48  ;;  %v363_v33 = vadd.f32 1.1283791, %v362_v26 }
 0x150   :  { %v4124_v60 = vpop.eup %4123  ;;  %v838_v49 = vadd.f32 1.0, %v3916_v34  ;;  %v377_v10 = vsub.f32 1.0, %v376_v51  ;;  %vm380_vm4 = vweird.f32 %v4944_v45  ;;  %v252_v24 = vadd.f32 0.4994258, %v251_v1 }
 0x151   :  { %v837_v22 = vadd.f32 1.0, %v3915_v15  ;;  %v336_v4 = vmul.f32 %v4124_v60, %v4953_v5  ;;  %vm381_vm5 = vweird.f32 %v4122_v38  ;;  %v384_v27 = vand.u32 2147483647, %v4944_v45 }
 0x152   :  { %v854_v56 = vmul.f32 %v838_v49, %v166_v50  ;;  %v378_v28 = vmul.f32 %v4122_v38, %v377_v10  ;;  %v387_v55 = vor.u32 1.1754944e-38, %v386_v14  ;;  %v253_v29 = vmul.f32 %v252_v24, %v4432_v40  ;;  %vm382_vm6 = vmor %vm380_vm4, %vm381_vm5 }
 0x153   :  { %v337_v62 = vsub.f32 1.0, %v336_v4  ;;  %v207_v20 = vmul.f32 %v206_v43, %v4479_v16  ;;  %v853_v18 = vmul.f32 %v837_v22, %v7257_v57  ;;  %v344_v58 = vand.u32 2147483647, %v4953_v5  ;;  %v7263_v43 = vld [vmem:[#allocation9_spill] sm:$0xff]  ;;  %v29_v22 = vld [vmem:[%s7151_s3 + $0x10] sm:$0xff] }
 0x154   :  { %879 = vmatpush.msra.mxu1 %v854_v56  ;;  %v379_v54 = vadd.f32 %v4122_v38, %v378_v28  ;;  %v346_v9 = vand.u32 2147483648, %v4953_v5  ;;  %v4126_v8 = vpop.eup %4125  ;;  %vm341_vm7 = vweird.f32 %v4124_v60  ;;  %v4988_v3 = vadd.f32 1.0, %v253_v29  ;;  %978 = vperm.xlu1 %4097, %v29_v22   ;;  %v7264_v29 = vld [vmem:[#allocation8_spill] sm:$0xff] }
 0x155   :  { %v338_v17 = vmul.f32 %v4124_v60, %v337_v62  ;;  %v208_v25 = vadd.f32 0.014752088, %v207_v20  ;;  %v364_v32 = vmul.f32 %v363_v33, %v7258_v35  ;;  %vm385_vm8 = vcmp.eq.f32.partialorder %v384_v27, 8.507059e+37 }
 0x156   :  { %880 = vmatpush.msra.mxu1 %v853_v18  ;;  %v383_v46 = vsel %vm382_vm6, %v4122_v38, %v379_v54  ;;  %v296_v13 = vmul.f32 %v4126_v8, %v4966_v6  ;;  %vm340_vm10 = vweird.f32 %v4953_v5  ;;  %4127 = vrcp.f32 %v4988_v3  ;;  %v7259_v5 = vld [vmem:[#allocation17_spill] sm:$0xff] }
 0x157   :  { %v388_v44 = vsel %vm385_vm8, %v387_v55, %v383_v46  ;;  %v339_v39 = vadd.f32 %v4124_v60, %v338_v17  ;;  %vm342_vm9 = vmor %vm340_vm10, %vm341_vm7  ;;  %vm345_vm11 = vcmp.eq.f32.partialorder %v344_v58, 8.507059e+37  ;;  %v347_v41 = vor.u32 1.1754944e-38, %v346_v9  ;;  %v7265_v17 = vld [vmem:[#allocation12_spill] sm:$0xff] }
 0x158   :  { %v389_v45 = vmul.f32 %v388_v44, %v364_v32  ;;  %v297_v11 = vsub.f32 1.0, %v296_v13  ;;  %v304_v31 = vand.u32 2147483647, %v4966_v6  ;;  %v306_v59 = vand.u32 2147483648, %v4966_v6 }
 0x159   :  { %v343_v19 = vsel %vm342_vm9, %v4124_v60, %v339_v39  ;;  %v209_v42 = vmul.f32 %v208_v25, %v4479_v16  ;;  %vm301_vm12 = vweird.f32 %v4126_v8  ;;  %v198_v26 = vmul.f32 %v7259_v5, %v4479_v16 }
 0x15a   :  { %v3914_v61 = vclamps-f32 %v389_v45, 1.0  ;;  %v348_v36 = vsel %vm345_vm11, %v347_v41, %v343_v19  ;;  %v298_v7 = vmul.f32 %v4126_v8, %v297_v11  ;;  %v242_v63 = vmul.f32 %v7260_v2, %v4432_v40  ;;  %v7266_v41 = vld [vmem:[#allocation7_spill] sm:$0xff] }
 0x15b   :  { %v349_v47 = vmul.f32 %v348_v36, %v324_v23  ;;  %v210_v38 = vadd.f32 0.112945676, %v209_v42  ;;  %v164_v53 = vmul.f32 0.5, %v7261_v21  ;;  %vm300_vm13 = vweird.f32 %v4966_v6  ;;  %v3981_v6 = vld [vmem:[%s7151_s3 + $0x30] sm:$0xff] }
 0x15c   :  { %v836_v30 = vadd.f32 1.0, %v3914_v61  ;;  %v299_v52 = vadd.f32 %v4126_v8, %v298_v7  ;;  %v4128_v1 = vpop.eup %4127  ;;  %v284_v12 = vmul.f32 %v4970_v37, %v7262_v0  ;;  %vm302_vm14 = vmor %vm300_vm13, %vm301_vm12  ;;  %v307_v34 = vor.u32 1.1754944e-38, %v306_v59  ;;  %2774 = vperm.xlu0 %4096, %v3981_v6  }
 0x15d   :  { %v3913_v50 = vclamps-f32 %v349_v47, 1.0  ;;  %v211_v51 = vmul.f32 %v210_v38, %v4479_v16  ;;  %vm305_vm15 = vcmp.eq.f32.partialorder %v304_v31, 8.507059e+37  ;;  %v256_v40 = vmul.f32 %v4128_v1, %v4988_v3 }
 0x15e   :  { %v852_v15 = vmul.f32 %v836_v30, %v164_v53  ;;  %v303_v14 = vsel %vm302_vm14, %v4126_v8, %v299_v52  ;;  %v163_v60 = vmul.f32 0.5, %v7263_v43  ;;  %v199_v37 = vadd.f32 0.05243302, %v198_v26  ;;  %v4035_v8 = vld [vmem:[%s7151_s3 + $0x48] sm:$0xff] }
 0x15f   :  { %v835_v48 = vadd.f32 1.0, %v3913_v50  ;;  %v308_v23 = vsel %vm305_vm15, %v307_v34, %v303_v14  ;;  %v212_v33 = vadd.f32 0.4994258, %v211_v51  ;;  %v257_v10 = vsub.f32 1.0, %v256_v40  ;;  %v7268_v30 = vld [vmem:[#allocation6_spill] sm:$0xff]  ;;  %v3927_v51 = vld [vmem:[%s7151_s3 + $0x18] sm:$0xff] }
 0x160   :  { %881 = vmatpush.msra.mxu1 %v852_v15  ;;  %v309_v49 = vmul.f32 %v308_v23, %v284_v12  ;;  %v243_v4 = vadd.f32 1.1283791, %v242_v63  ;;  %v266_v56 = vand.u32 2147483648, %v4988_v3  ;;  %vm261_vm2 = vweird.f32 %v4128_v1  ;;  %v7267_v63 = vld [vmem:[#allocation16_spill] sm:$0xff]  ;;  %1824 = vperm.xlu1 %4097, %v3927_v51   ;;  %v4036_v14 = vld [vmem:[%s7151_s3 + $0x50] sm:$0xff] }
 0x161   :  { %v851_v24 = vmul.f32 %v835_v48, %v163_v60  ;;  %v213_v28 = vmul.f32 %v212_v33, %v4479_v16  ;;  %v258_v55 = vmul.f32 %v4128_v1, %v257_v10  ;;  %v264_v62 = vand.u32 2147483647, %v4988_v3  ;;  %v864_v12 = vld [vmem:[%s7150_s2] sm:$0xff]  ;;  %v3982_v15 = vld [vmem:[%s7151_s3 + $0x38] sm:$0xff] }
 0x162   :  { %v3912_v27 = vclamps-f32 %v309_v49, 1.0  ;;  %v162_v20 = vmul.f32 0.5, %v7264_v29  ;;  %v200_v18 = vmul.f32 %v199_v37, %v4479_v16  ;;  %vm260_vm3 = vweird.f32 %v4988_v3 }
 0x163   :  { %882 = vmatpush.msra.mxu1 %v851_v24  ;;  %v214_v57 = vadd.f32 1.0, %v213_v28  ;;  %v259_v58 = vadd.f32 %v4128_v1, %v258_v55  ;;  %vm262_vm4 = vmor %vm260_vm3, %vm261_vm2  ;;  %v267_v9 = vor.u32 1.1754944e-38, %v266_v56  ;;  %v244_v25 = vmul.f32 %v243_v4, %v7265_v17 }
 0x164   :  { %v834_v54 = vadd.f32 1.0, %v3912_v27  ;;  %vm265_vm5 = vcmp.eq.f32.partialorder %v264_v62, 8.507059e+37  ;;  %v201_v13 = vadd.f32 0.18741608, %v200_v18  ;;  %3724 = vperm.xlu0 %4096, %v4035_v8   ;;  %v161_v11 = vmul.f32 0.5, %v7266_v41 }
 0x165   :  { %4129 = vrcp.f32 %v214_v57  ;;  %v263_v32 = vsel %vm262_vm4, %v4128_v1, %v259_v58  ;;  %v226_v61 = vand.u32 2147483648, %v214_v57  ;;  %v224_v5 = vand.u32 2147483647, %v214_v57 }
 0x166   :  { %v850_v35 = vmul.f32 %v834_v54, %v162_v20  ;;  %v268_v46 = vsel %vm265_vm5, %v267_v9, %v263_v32  ;;  %v202_v3 = vmul.f32 %v201_v13, %v4479_v16  ;;  %vm220_vm7 = vweird.f32 %v214_v57 }
 0x167   :  { %v269_v44 = vmul.f32 %v268_v46, %v244_v25  ;;  %v227_v2 = vor.u32 1.1754944e-38, %v226_v61  ;;  %vm225_vm10 = vcmp.eq.f32.partialorder %v224_v5, 8.507059e+37  ;;  %v160_v52 = vmul.f32 0.5, %v7268_v30 }
 0x168   :  { %883 = vmatpush.msra.mxu1 %v850_v35  ;;  %v203_v36 = vadd.f32 1.1283791, %v202_v3  ;;  %v7269_v50 = vmov 1.0   ;;  %2872 = vperm.xlu1 %4097, %v3982_v15  }
 0x169   :  { %v3911_v39 = vclamps-f32 %v269_v44, 1.0  ;;  %v4278_v44 = vmov 8.0  }
 0x16a   :  { %v204_v47 = vmul.f32 %v203_v36, %v7267_v63 }
 0x16b   :  { %v4130_v45 = vpop.eup %4129  ;;  %v833_v19 = vadd.f32 1.0, %v3911_v39 }
 0x16c   :  { %v216_v31 = vmul.f32 %v4130_v45, %v214_v57  ;;  %vm221_vm6 = vweird.f32 %v4130_v45 }
 0x16d   :  { %v849_v59 = vmul.f32 %v833_v19, %v161_v11  ;;  %vm222_vm8 = vmor %vm220_vm7, %vm221_vm6 }
 0x16e   :  { %v217_v42 = vsub.f32 1.0, %v216_v31 }
 0x16f   :  { %884 = vmatpush.msra.mxu1 %v849_v59 }
 0x170   :  { %v218_v7 = vmul.f32 %v4130_v45, %v217_v42  ;;  %3822 = vperm.xlu1 %4097, %v4036_v14  }
 0x172   :  { %v219_v26 = vadd.f32 %v4130_v45, %v218_v7 }
 0x174   :  { %v223_v38 = vsel %vm222_vm8, %v4130_v45, %v219_v26  ;;  %v4249_v26 = vld [vmem:[%s7148_s0] sm:$0xff] }
 0x175   :  { %v228_v16 = vsel %vm225_vm10, %v227_v2, %v223_v38 }
 0x176   :  { %v229_v21 = vmul.f32 %v228_v16, %v204_v47 }
 0x178   :  { %v3910_v53 = vclamps-f32 %v229_v21, 1.0 }
 0x17a   :  { %v832_v1 = vadd.f32 1.0, %v3910_v53 }
 0x17c   :  { %v848_v0 = vmul.f32 %v832_v1, %v160_v52 }
 0x17e   :  { %885 = vmatpush.msra.mxu1 %v848_v0 }
 0x17f   :  { %886 = vmatmul.f32.vlgmr.msra.gmra.mxu1 %v864_v12 }
 0x180   :  { %4000 = vmatpush.msk.msrb.mxu1 %vm24_vm0, %v7269_v50 }
 0x1a3   :  { %v868_v40 = vpop.permute.xlu0 %867 }
 0x1fc   :  { %v887_v43 = vpop.f32.mrf.mxu1 }
 0x1fd   :  { %v888_v60 = vadd.f32 %v887_v43, %v868_v40 }
 0x1ff   :  { %v891_v48 = vmul.f32 0.70710677, %v888_v60  ;;  %v890_v61 = vmul.f32 0.5, %v888_v60 }
 0x201   :  { %v892_v23 = vmul.f32 %v891_v48, %v891_v48 }
 0x203   :  { %v893_v33 = vmin.f32 %v892_v23, 16.0 }
 0x205   :  { %v894_v6 = vmul.f32 2.1237322e-06, %v893_v33  ;;  %v905_v37 = vmul.f32 3.8918573e-05, %v893_v33 }
 0x207   :  { %v895_v49 = vadd.f32 0.00028619796, %v894_v6  ;;  %v906_v10 = vadd.f32 0.001143296, %v905_v37 }
 0x209   :  { %v896_v22 = vmul.f32 %v895_v49, %v893_v33  ;;  %v907_v4 = vmul.f32 %v906_v10, %v893_v33 }
 0x20b   :  { %v897_v24 = vadd.f32 0.0036580483, %v896_v22  ;;  %v908_v56 = vadd.f32 0.014752088, %v907_v4 }
 0x20d   :  { %v909_v28 = vmul.f32 %v908_v56, %v893_v33  ;;  %v898_v27 = vmul.f32 %v897_v24, %v893_v33 }
 0x20f   :  { %v910_v55 = vadd.f32 0.112945676, %v909_v28  ;;  %v899_v29 = vadd.f32 0.05243302, %v898_v27  ;;  %v973_v28 = vpop.permute.xlu0 %972 }
 0x211   :  { %v911_v62 = vmul.f32 %v910_v55, %v893_v33  ;;  %v900_v18 = vmul.f32 %v899_v29, %v893_v33  ;;  %v979_v55 = vpop.permute.xlu1 %978  ;;  %v3930_v29 = vld [vmem:[%s7149_s1 + $0x80] sm:$0xff] }
 0x213   :  { %v912_v20 = vadd.f32 0.4994258, %v911_v62  ;;  %v901_v58 = vadd.f32 0.18741608, %v900_v18  ;;  %v3933_v18 = vld [vmem:[%s7149_s1 + $0x98] sm:$0xff] }
 0x215   :  { %v913_v57 = vmul.f32 %v912_v20, %v893_v33  ;;  %v902_v8 = vmul.f32 %v901_v58, %v893_v33  ;;  %v3931_v20 = vld [vmem:[%s7149_s1 + $0x88] sm:$0xff] }
 0x216   :  { %v3935_v58 = vld [vmem:[%s7149_s1 + $0xa8] sm:$0xff] }
 0x217   :  { %v914_v54 = vadd.f32 1.0, %v913_v57  ;;  %v903_v35 = vadd.f32 1.1283791, %v902_v8  ;;  %v3932_v57 = vld [vmem:[%s7149_s1 + $0x90] sm:$0xff]  ;;  %v3937_v8 = vld [vmem:[%s7149_s1 + $0xb8] sm:$0xff] }
 0x219   :  { %4131 = vrcp.f32 %v914_v54  ;;  %v926_v32 = vand.u32 2147483648, %v914_v54  ;;  %v924_v13 = vand.u32 2147483647, %v914_v54  ;;  %vm920_vm11 = vweird.f32 %v914_v54 }
 0x21a   :  { %4133 = vrcp.f32 %v4278_v44  ;;  %v904_v3 = vmul.f32 %v903_v35, %v891_v48  ;;  %v3940_v35 = vld [vmem:[%s7149_s1 + $0xd0] sm:$0xff] }
 0x21b   :  { %v927_v45 = vor.u32 1.1754944e-38, %v926_v32  ;;  %vm925_vm13 = vcmp.eq.f32.partialorder %v924_v13, 8.507059e+37  ;;  %v3941_v32 = vld [vmem:[%s7149_s1 + $0xd8] sm:$0xff]  ;;  %v3943_v13 = vld [vmem:[%s7149_s1 + $0xe8] sm:$0xff]  ;;  %v3944_v44 = vld [vmem:[%s7149_s1 + $0xf0] sm:$0xff] }
 0x21f   :  { %v4132_v9 = vpop.eup %4131 }
 0x220   :  { %v916_v17 = vmul.f32 %v4132_v9, %v914_v54  ;;  %vm921_vm9 = vweird.f32 %v4132_v9  ;;  %v4134_v19 = vpop.eup %4133  ;;  %v3934_v54 = vld [vmem:[%s7149_s1 + $0xa0] sm:$0xff] }
 0x221   :  { %vm922_vm12 = vmor %vm920_vm11, %vm921_vm9  ;;  %v942_v42 = vmul.f32 8.0, %v4134_v19  ;;  %vm946_vm14 = vweird.f32 %v4134_v19 }
 0x222   :  { %v917_v25 = vsub.f32 1.0, %v916_v17  ;;  %v3938_v17 = vld [vmem:[%s7149_s1 + $0xc0] sm:$0xff] }
 0x223   :  { %v943_v5 = vsub.f32 1.0, %v942_v42 }
 0x224   :  { %v918_v46 = vmul.f32 %v4132_v9, %v917_v25  ;;  %v3939_v25 = vld [vmem:[%s7149_s1 + $0xc8] sm:$0xff] }
 0x225   :  { %v944_v47 = vmul.f32 %v4134_v19, %v943_v5 }
 0x226   :  { %v919_v39 = vadd.f32 %v4132_v9, %v918_v46  ;;  %v3942_v46 = vld [vmem:[%s7149_s1 + $0xe0] sm:$0xff] }
 0x227   :  { %v945_v21 = vadd.f32 %v4134_v19, %v944_v47 }
 0x228   :  { %v923_v41 = vsel %vm922_vm12, %v4132_v9, %v919_v39  ;;  %v3936_v9 = vld [vmem:[%s7149_s1 + $0xb0] sm:$0xff]  ;;  %v3945_v39 = vld [vmem:[%s7149_s1 + $0xf8] sm:$0xff] }
 0x229   :  { %v928_v11 = vsel %vm925_vm13, %v927_v45, %v923_v41  ;;  %v5046_v52 = vsel %vm946_vm14, %v4134_v19, %v945_v21 }
 0x22a   :  { %v929_v31 = vmul.f32 %v928_v11, %v904_v3  ;;  %7271 = vst [vmem:[#allocation20_spill] sm:$0xff] %v5046_v52 }
 0x22c   :  { %v3926_v59 = vclamps-f32 %v929_v31, 1.0 }
 0x22e   :  { %v932_v36 = vadd.f32 1.0, %v3926_v59 }
 0x230   :  { %v933_v7 = vmul.f32 %v932_v36, %v890_v61 }
 0x232   :  { %v934_v2 = vadd.f32 %v4249_v26, %v933_v7 }
 0x234   :  { %v935_v63 = vrot.slane %v934_v2, 4 }
 0x236   :  { %v936_v38 = vadd.f32 %v935_v63, %v934_v2 }
 0x238   :  { %v937_v16 = vrot.slane %v936_v38, 2 }
 0x23a   :  { %v938_v53 = vadd.f32 %v937_v16, %v936_v38 }
 0x23c   :  { %v939_v30 = vrot.slane %v938_v53, 1 }
 0x23e   :  { %v940_v1 = vadd.f32 %v939_v30, %v938_v53 }
 0x240   :  { %v948_v0 = vmul.f32 %v5046_v52, %v940_v1 }
 0x242   :  { %v949_v12 = vsub.f32 %v934_v2, %v948_v0 }
 0x244   :  { %v950_v51 = vmul.f32 %v949_v12, %v949_v12 }
 0x246   :  { %v951_v15 = vrot.slane %v950_v51, 4 }
 0x248   :  { %v952_v14 = vadd.f32 %v951_v15, %v950_v51 }
 0x24a   :  { %v953_v40 = vrot.slane %v952_v14, 2 }
 0x24c   :  { %v954_v43 = vadd.f32 %v953_v40, %v952_v14 }
 0x24e   :  { %v955_v60 = vrot.slane %v954_v43, 1 }
 0x250   :  { %v956_v48 = vadd.f32 %v955_v60, %v954_v43 }
 0x252   :  { %v957_v23 = vmul.f32 %v956_v48, %v5046_v52 }
 0x254   :  { %v958_v33 = vadd.f32 1e-05, %v957_v23 }
 0x256   :  { %4135 = vrsqrt.f32 %v958_v33  ;;  %vm965_vm2 = vweird.f32 %v958_v33 }
 0x25c   :  { %v4136_v6 = vpop.eup %4135 }
 0x25d   :  { %v960_v37 = vmul.f32 %v4136_v6, %v958_v33  ;;  %vm966_vm15 = vweird.f32 %v4136_v6 }
 0x25e   :  { %vm967_vm3 = vmor %vm965_vm2, %vm966_vm15 }
 0x25f   :  { %v961_v49 = vmul.f32 %v4136_v6, %v960_v37 }
 0x261   :  { %v962_v10 = vmul.f32 0.5, %v961_v49 }
 0x263   :  { %v963_v22 = vsub.f32 1.5, %v962_v10 }
 0x265   :  { %v964_v4 = vmul.f32 %v4136_v6, %v963_v22 }
 0x267   :  { %v968_v24 = vsel %vm967_vm3, %v4136_v6, %v964_v4 }
 0x268   :  { %v969_v56 = vmul.f32 %v968_v24, %v949_v12 }
 0x26a   :  { %v975_v27 = vmul.f32 %v973_v28, %v969_v56 }
 0x26c   :  { %v5050_v62 = vadd.f32 %v979_v55, %v975_v27 }
 0x26e   :  { %7272 = vst [vmem:[#allocation24_spill] sm:$0xff] %v5050_v62  ;;  %1066 = vmatpush.msra.mxu2 %v5050_v62 }
 0x26f   :  { %3947 = vmatmul.msk.f32.vlgmr.msra.gmra.mxu2 %vm46_vm1, %v3930_v29 }
 0x277   :  { %3948 = vmatmul.msk.f32.gmra.mxu2 %vm46_vm1, %v3931_v20 }
 0x27f   :  { %3949 = vmatmul.msk.f32.gmra.mxu2 %vm46_vm1, %v3932_v57 }
 0x287   :  { %3950 = vmatmul.msk.f32.gmra.mxu2 %vm46_vm1, %v3933_v18 }
 0x28f   :  { %3951 = vmatmul.msk.f32.gmra.mxu2 %vm46_vm1, %v3934_v54 }
 0x297   :  { %3952 = vmatmul.msk.f32.gmra.mxu2 %vm46_vm1, %v3935_v58 }
 0x29f   :  { %3953 = vmatmul.msk.f32.gmra.mxu2 %vm46_vm1, %v3936_v9 }
 0x2a7   :  { %3954 = vmatmul.msk.f32.gmra.mxu2 %vm46_vm1, %v3937_v8 }
 0x2af   :  { %3955 = vmatmul.msk.f32.gmra.mxu2 %vm46_vm1, %v3938_v17 }
 0x2b7   :  { %3956 = vmatmul.msk.f32.gmra.mxu2 %vm46_vm1, %v3939_v25 }
 0x2bf   :  { %3957 = vmatmul.msk.f32.gmra.mxu2 %vm46_vm1, %v3940_v35 }
 0x2c7   :  { %3958 = vmatmul.msk.f32.gmra.mxu2 %vm46_vm1, %v3941_v32 }
 0x2cf   :  { %3959 = vmatmul.msk.f32.gmra.mxu2 %vm46_vm1, %v3942_v46 }
 0x2d7   :  { %3960 = vmatmul.msk.f32.gmra.mxu2 %vm46_vm1, %v3943_v13 }
 0x2df   :  { %3961 = vmatmul.msk.f32.gmra.mxu2 %vm46_vm1, %v3944_v44 }
 0x2e7   :  { %3962 = vmatmul.msk.f32.gmra.mxu2 %vm46_vm1, %v3945_v39 }
 0x2f2   :  { %v5117_v45 = vpop.f32.mrf.mxu2 }
 0x2f3   :  { %7273 = vst [vmem:[#allocation22_spill] sm:$0xff] %v5117_v45  ;;  %v5142_v26 = vmul.f32 0.70710677, %v5117_v45 }
 0x2f5   :  { %7281 = vst [vmem:[#allocation18_spill] sm:$0xff] %v5142_v26  ;;  %v1148_v63 = vmul.f32 %v5142_v26, %v5142_v26 }
 0x2f7   :  { %v5162_v30 = vmin.f32 %v1148_v63, 16.0 }
 0x2f9   :  { %v1150_v60 = vmul.f32 2.1237322e-06, %v5162_v30 }
 0x2fa   :  { %v5119_v3 = vpop.f32.mrf.mxu2 }
 0x2fb   :  { %7274 = vst [vmem:[#allocation23_spill] sm:$0xff] %v5119_v3  ;;  %v5145_v2 = vmul.f32 0.70710677, %v5119_v3  ;;  %v1151_v56 = vadd.f32 0.00028619796, %v1150_v60 }
 0x2fd   :  { %7282 = vst [vmem:[#allocation10_spill] sm:$0xff] %v5145_v2  ;;  %v1188_v47 = vmul.f32 %v5145_v2, %v5145_v2  ;;  %v1152_v9 = vmul.f32 %v1151_v56, %v5162_v30 }
 0x2ff   :  { %v5164_v1 = vmin.f32 %v1188_v47, 16.0 }
 0x301   :  { %v1190_v48 = vmul.f32 2.1237322e-06, %v5164_v1 }
 0x302   :  { %v5121_v41 = vpop.f32.mrf.mxu2 }
 0x303   :  { %7275 = vst [vmem:[#allocation19_spill] sm:$0xff] %v5121_v41  ;;  %v5174_v15 = vmul.f32 0.70710677, %v5121_v41  ;;  %v1191_v28 = vadd.f32 0.00028619796, %v1190_v48 }
 0x305   :  { %7283 = vst [vmem:[#allocation11_spill] sm:$0xff] %v5174_v15  ;;  %v1228_v49 = vmul.f32 %v5174_v15, %v5174_v15  ;;  %v1192_v8 = vmul.f32 %v1191_v28, %v5164_v1 }
 0x307   :  { %v5209_v20 = vmin.f32 %v1228_v49, 16.0 }
 0x309   :  { %v1230_v46 = vmul.f32 2.1237322e-06, %v5209_v20 }
 0x30a   :  { %v5123_v11 = vpop.f32.mrf.mxu2 }
 0x30b   :  { %7276 = vst [vmem:[#allocation14_spill] sm:$0xff] %v5123_v11  ;;  %v5177_v14 = vmul.f32 0.70710677, %v5123_v11 }
 0x30d   :  { %7284 = vst [vmem:[#allocation9_spill] sm:$0xff] %v5177_v14  ;;  %v1268_v10 = vmul.f32 %v5177_v14, %v5177_v14 }
 0x30f   :  { %v5211_v57 = vmin.f32 %v1268_v10, 16.0 }
 0x311   :  { %v1270_v13 = vmul.f32 2.1237322e-06, %v5211_v57 }
 0x312   :  { %v5125_v19 = vpop.f32.mrf.mxu2 }
 0x313   :  { %7277 = vst [vmem:[#allocation13_spill] sm:$0xff] %v5125_v19  ;;  %v5154_v16 = vmul.f32 0.70710677, %v5125_v19  ;;  %v1271_v49 = vadd.f32 0.00028619796, %v1270_v13 }
 0x315   :  { %v1308_v0 = vmul.f32 %v5154_v16, %v5154_v16 }
 0x317   :  { %v5188_v33 = vmin.f32 %v1308_v0, 16.0  ;;  %v1153_v0 = vadd.f32 0.0036580483, %v1152_v9 }
 0x319   :  { %v1310_v27 = vmul.f32 2.1237322e-06, %v5188_v33 }
 0x31a   :  { %v5127_v31 = vpop.f32.mrf.mxu2 }
 0x31b   :  { %7278 = vst [vmem:[#allocation21_spill] sm:$0xff] %v5127_v31  ;;  %v5157_v21 = vmul.f32 0.70710677, %v5127_v31  ;;  %v1311_v25 = vadd.f32 0.00028619796, %v1310_v27 }
 0x31d   :  { %v1348_v12 = vmul.f32 %v5157_v21, %v5157_v21 }
 0x31f   :  { %v5190_v6 = vmin.f32 %v1348_v12, 16.0  ;;  %v1193_v12 = vadd.f32 0.0036580483, %v1192_v8 }
 0x321   :  { %v1350_v55 = vmul.f32 2.1237322e-06, %v5190_v6 }
 0x322   :  { %v5129_v59 = vpop.f32.mrf.mxu2 }
 0x323   :  { %7279 = vst [vmem:[#allocation15_spill] sm:$0xff] %v5129_v59  ;;  %v5160_v53 = vmul.f32 0.70710677, %v5129_v59  ;;  %v1351_v35 = vadd.f32 0.00028619796, %v1350_v55  ;;  %v1154_v55 = vmul.f32 %v1153_v0, %v5162_v30 }
 0x325   :  { %v1388_v40 = vmul.f32 %v5160_v53, %v5160_v53  ;;  %v1352_v60 = vmul.f32 %v1351_v35, %v5190_v6 }
 0x327   :  { %v5198_v22 = vmin.f32 %v1388_v40, 16.0  ;;  %v1312_v40 = vmul.f32 %v1311_v25, %v5188_v33  ;;  %v1353_v8 = vadd.f32 0.0036580483, %v1352_v60  ;;  %v5258_v60 = vadd.f32 0.05243302, %v1154_v55 }
 0x329   :  { %v1390_v18 = vmul.f32 2.1237322e-06, %v5198_v22  ;;  %v1313_v9 = vadd.f32 0.0036580483, %v1312_v40  ;;  %7285 = vst [vmem:[#allocation8_spill] sm:$0xff] %v5258_v60  ;;  %v1354_v52 = vmul.f32 %v1353_v8, %v5190_v6 }
 0x32a   :  { %v5131_v42 = vpop.f32.mrf.mxu2 }
 0x32b   :  { %v5171_v51 = vmul.f32 0.70710677, %v5131_v42  ;;  %v1391_v44 = vadd.f32 0.00028619796, %v1390_v18  ;;  %v1194_v18 = vmul.f32 %v1193_v12, %v5164_v1 }
 0x32d   :  { %v1428_v37 = vmul.f32 %v5171_v51, %v5171_v51 }
 0x32f   :  { %v5207_v29 = vmin.f32 %v1428_v37, 16.0  ;;  %v1231_v37 = vadd.f32 0.00028619796, %v1230_v46  ;;  %v1272_v46 = vmul.f32 %v1271_v49, %v5211_v57  ;;  %v1314_v49 = vmul.f32 %v1313_v9, %v5188_v33 }
 0x331   :  { %v1430_v32 = vmul.f32 2.1237322e-06, %v5207_v29 }
 0x332   :  { %v5133_v61 = vpop.f32.mrf.mxu2 }
 0x333   :  { %7280 = vst [vmem:[#allocation17_spill] sm:$0xff] %v5133_v61  ;;  %v5182_v43 = vmul.f32 0.70710677, %v5133_v61  ;;  %v1431_v48 = vadd.f32 0.00028619796, %v1430_v32  ;;  %v1232_v32 = vmul.f32 %v1231_v37, %v5209_v20 }
 0x335   :  { %v1468_v4 = vmul.f32 %v5182_v43, %v5182_v43  ;;  %v1432_v25 = vmul.f32 %v1431_v48, %v5207_v29  ;;  %v5260_v48 = vadd.f32 0.05243302, %v1194_v18  ;;  %v1233_v34 = vadd.f32 0.0036580483, %v1232_v32 }
 0x336   :  { %v1315_v32 = vadd.f32 0.05243302, %v1314_v49 }
 0x337   :  { %v5214_v54 = vmin.f32 %v1468_v4, 16.0  ;;  %v1392_v4 = vmul.f32 %v1391_v44, %v5198_v22  ;;  %7286 = vst [vmem:[#allocation12_spill] sm:$0xff] %v5260_v48  ;;  %v1433_v62 = vadd.f32 0.0036580483, %v1432_v25 }
 0x339   :  { %v1470_v39 = vmul.f32 2.1237322e-06, %v5214_v54 }
 0x33a   :  { %v5135_v36 = vpop.f32.mrf.mxu2 }
 0x33b   :  { %v5203_v24 = vmul.f32 0.70710677, %v5135_v36  ;;  %v1471_v56 = vadd.f32 0.00028619796, %v1470_v39  ;;  %v1393_v39 = vadd.f32 0.0036580483, %v1392_v4 }
 0x33d   :  { %v1508_v58 = vmul.f32 %v5203_v24, %v5203_v24  ;;  %v1472_v0 = vmul.f32 %v1471_v56, %v5214_v54  ;;  %v1273_v56 = vadd.f32 0.0036580483, %v1272_v46  ;;  %v1394_v55 = vmul.f32 %v1393_v39, %v5198_v22 }
 0x33e   :  { %v1355_v46 = vadd.f32 0.05243302, %v1354_v52 }
 0x33f   :  { %v5226_v63 = vmin.f32 %v1508_v58, 16.0  ;;  %v1473_v18 = vadd.f32 0.0036580483, %v1472_v0  ;;  %v1274_v11 = vmul.f32 %v1273_v56, %v5211_v57 }
 0x341   :  { %v1510_v28 = vmul.f32 2.1237322e-06, %v5226_v63  ;;  %v1474_v41 = vmul.f32 %v1473_v18, %v5214_v54 }
 0x342   :  { %v5137_v7 = vpop.f32.mrf.mxu2 }
 0x343   :  { %v5229_v47 = vmul.f32 0.70710677, %v5137_v7  ;;  %v1511_v12 = vadd.f32 0.00028619796, %v1510_v28  ;;  %v1475_v31 = vadd.f32 0.05243302, %v1474_v41 }
 0x345   :  { %v1548_v27 = vmul.f32 %v5229_v47, %v5229_v47  ;;  %v1512_v50 = vmul.f32 %v1511_v12, %v5226_v63  ;;  %v1395_v12 = vadd.f32 0.05243302, %v1394_v55 }
 0x347   :  { %v5256_v40 = vmin.f32 %v1548_v27, 16.0  ;;  %v1513_v15 = vadd.f32 0.0036580483, %v1512_v50  ;;  %v1356_v50 = vmul.f32 %v1355_v46, %v5190_v6  ;;  %v1396_v19 = vmul.f32 %v1395_v12, %v5198_v22 }
 0x349   :  { %v1550_v45 = vmul.f32 2.1237322e-06, %v5256_v40  ;;  %v1397_v48 = vadd.f32 0.18741608, %v1396_v19 }
 0x34a   :  { %v5139_v5 = vpop.f32.mrf.mxu2 }
 0x34b   :  { %v5234_v10 = vmul.f32 0.70710677, %v5139_v5  ;;  %v1551_v2 = vadd.f32 0.00028619796, %v1550_v45 }
 0x34d   :  { %v1588_v13 = vmul.f32 %v5234_v10, %v5234_v10 }
 0x34f   :  { %v5268_v28 = vmin.f32 %v1588_v13, 16.0  ;;  %v1434_v13 = vmul.f32 %v1433_v62, %v5207_v29 }
 0x351   :  { %v1590_v39 = vmul.f32 2.1237322e-06, %v5268_v28 }
 0x352   :  { %v5151_v38 = vpop.f32.mrf.mxu2 }
 0x353   :  { %v5286_v26 = vmul.f32 0.70710677, %v5151_v38  ;;  %v1591_v45 = vadd.f32 0.00028619796, %v1590_v39 }
 0x355   :  { %v1592_v41 = vmul.f32 %v1591_v45, %v5268_v28 }
 0x357   :  { %v1593_v19 = vadd.f32 0.0036580483, %v1592_v41 }
 0x35a   :  { %v5186_v23 = vpop.f32.mrf.mxu2 }
 0x35b   :  { %v5276_v9 = vmul.f32 0.70710677, %v5186_v23 }
 0x35d   :  { %v1668_v49 = vmul.f32 %v5276_v9, %v5276_v9 }
 0x362   :  { %v5220_v17 = vpop.f32.mrf.mxu2 }
 0x363   :  { %v5246_v35 = vmul.f32 0.70710677, %v5220_v17 }
 0x365   :  { %v1708_v4 = vmul.f32 %v5246_v35, %v5246_v35 }
 0x36a   :  { %v5242_v58 = vpop.f32.mrf.mxu2 }
 0x36b   :  { %v5253_v44 = vmul.f32 0.70710677, %v5242_v58 }
 0x36d   :  { %v1748_v37 = vmul.f32 %v5253_v44, %v5253_v44 }
 0x36f   :  { %v5270_v27 = vmin.f32 %v1748_v37, 16.0  ;;  %v5281_v37 = vmin.f32 %v1708_v4, 16.0  ;;  %v1234_v4 = vmul.f32 %v1233_v34, %v5209_v20  ;;  %v1628_v34 = vmul.f32 %v5286_v26, %v5286_v26 }
 0x371   :  { %v1750_v8 = vmul.f32 2.1237322e-06, %v5270_v27  ;;  %v1761_v25 = vmul.f32 3.8918573e-05, %v5270_v27  ;;  %v1710_v55 = vmul.f32 2.1237322e-06, %v5281_v37 }
 0x372   :  { %v5305_v46 = vadd.f32 0.05243302, %v1234_v4  ;;  %v1721_v45 = vmul.f32 3.8918573e-05, %v5281_v37 }
 0x373   :  { %v1751_v0 = vadd.f32 0.00028619796, %v1750_v8  ;;  %v1762_v3 = vadd.f32 0.001143296, %v1761_v25  ;;  %v1316_v8 = vmul.f32 %v1315_v32, %v5188_v33  ;;  %v1435_v25 = vadd.f32 0.05243302, %v1434_v13 }
 0x374   :  { %v5302_v32 = vmin.f32 %v1668_v49, 16.0  ;;  %7287 = vst [vmem:[#allocation7_spill] sm:$0xff] %v5305_v46  ;;  %v1711_v56 = vadd.f32 0.00028619796, %v1710_v55  ;;  %v1476_v49 = vmul.f32 %v1475_v31, %v5214_v54 }
 0x375   :  { %v1752_v52 = vmul.f32 %v1751_v0, %v5270_v27  ;;  %v1763_v62 = vmul.f32 %v1762_v3, %v5270_v27  ;;  %v1514_v0 = vmul.f32 %v1513_v15, %v5226_v63  ;;  %v1552_v3 = vmul.f32 %v1551_v2, %v5256_v40 }
 0x376   :  { %v1317_v39 = vadd.f32 0.18741608, %v1316_v8  ;;  %v5310_v2 = vadd.f32 0.05243302, %v1274_v11  ;;  %v1670_v4 = vmul.f32 2.1237322e-06, %v5302_v32 }
 0x377   :  { %v1753_v18 = vadd.f32 0.0036580483, %v1752_v52  ;;  %v1764_v14 = vadd.f32 0.014752088, %v1763_v62  ;;  %v1436_v52 = vmul.f32 %v1435_v25, %v5207_v29  ;;  %v1357_v62 = vadd.f32 0.18741608, %v1356_v50 }
 0x378   :  { %7288 = vst [vmem:[#allocation16_spill] sm:$0xff] %v5310_v2  ;;  %v1515_v59 = vadd.f32 0.05243302, %v1514_v0  ;;  %v1553_v60 = vadd.f32 0.0036580483, %v1552_v3  ;;  %v1318_v25 = vmul.f32 %v1317_v39, %v5188_v33  ;;  %v1712_v50 = vmul.f32 %v1711_v56, %v5281_v37 }
 0x379   :  { %v1765_v13 = vmul.f32 %v1764_v14, %v5270_v27  ;;  %v1754_v15 = vmul.f32 %v1753_v18, %v5270_v27  ;;  %v5313_v14 = vmin.f32 %v1628_v34, 16.0  ;;  %v1437_v55 = vadd.f32 0.18741608, %v1436_v52 }
 0x37a   :  { %v1358_v11 = vmul.f32 %v1357_v62, %v5190_v6  ;;  %v1398_v0 = vmul.f32 %v1397_v48, %v5198_v22  ;;  %v1477_v3 = vadd.f32 0.18741608, %v1476_v49  ;;  %v1516_v34 = vmul.f32 %v1515_v59, %v5226_v63 }
 0x37b   :  { %v1766_v12 = vadd.f32 0.112945676, %v1765_v13  ;;  %v1755_v18 = vadd.f32 0.05243302, %v1754_v15  ;;  %v1722_v13 = vadd.f32 0.001143296, %v1721_v45  ;;  %v1438_v2 = vmul.f32 %v1437_v55, %v5207_v29 }
 0x37c   :  { %v1630_v39 = vmul.f32 2.1237322e-06, %v5313_v14  ;;  %v1671_v52 = vadd.f32 0.00028619796, %v1670_v4  ;;  %v1319_v46 = vadd.f32 1.1283791, %v1318_v25  ;;  %v1594_v48 = vmul.f32 %v1593_v19, %v5268_v28 }
 0x37d   :  { %v1767_v8 = vmul.f32 %v1766_v12, %v5270_v27  ;;  %v1554_v12 = vmul.f32 %v1553_v60, %v5256_v40  ;;  %v1713_v62 = vadd.f32 0.0036580483, %v1712_v50  ;;  %v1723_v41 = vmul.f32 %v1722_v13, %v5281_v37 }
 0x37e   :  { %v1359_v15 = vadd.f32 1.1283791, %v1358_v11  ;;  %v1756_v49 = vmul.f32 %v1755_v18, %v5270_v27  ;;  %v1478_v60 = vmul.f32 %v1477_v3, %v5214_v54  ;;  %v1517_v45 = vadd.f32 0.18741608, %v1516_v34 }
 0x37f   :  { %v1768_v31 = vadd.f32 0.4994258, %v1767_v8  ;;  %v1399_v8 = vadd.f32 1.1283791, %v1398_v0  ;;  %v1724_v4 = vadd.f32 0.014752088, %v1723_v41  ;;  %v1672_v25 = vmul.f32 %v1671_v52, %v5302_v32 }
 0x380   :  { %v1555_v61 = vadd.f32 0.05243302, %v1554_v12  ;;  %v5336_v55 = vmul.f32 0.5, %v5131_v42  ;;  %v1439_v50 = vadd.f32 1.1283791, %v1438_v2  ;;  %v1714_v11 = vmul.f32 %v1713_v62, %v5281_v37 }
 0x381   :  { %v1769_v56 = vmul.f32 %v1768_v31, %v5270_v27  ;;  %v1631_v31 = vadd.f32 0.00028619796, %v1630_v39  ;;  %v1725_v19 = vmul.f32 %v1724_v4, %v5281_v37  ;;  %v5341_v18 = vmul.f32 %v1319_v46, %v5154_v16 }
 0x382   :  { %v5344_v0 = vmul.f32 %v1359_v15, %v5157_v21  ;;  %v1595_v3 = vadd.f32 0.05243302, %v1594_v48  ;;  %v1757_v34 = vadd.f32 0.18741608, %v1756_v49  ;;  %v1479_v13 = vadd.f32 1.1283791, %v1478_v60 }
 0x383   :  { %v5330_v59 = vadd.f32 1.0, %v1769_v56  ;;  %v5347_v12 = vmul.f32 0.5, %v5135_v36  ;;  %v1518_v42 = vmul.f32 %v1517_v45, %v5226_v63  ;;  %v1726_v39 = vadd.f32 0.112945676, %v1725_v19 }
 0x384   :  { %v5351_v2 = vmul.f32 %v1399_v8, %v5160_v53  ;;  %v1556_v52 = vmul.f32 %v1555_v61, %v5256_v40  ;;  %v1632_v16 = vmul.f32 %v1631_v31, %v5313_v14  ;;  %v1673_v46 = vadd.f32 0.0036580483, %v1672_v25 }
 0x385   :  { %4137 = vrcp.f32 %v5330_v59  ;;  %v5356_v21 = vmul.f32 %v1439_v50, %v5171_v51  ;;  %v5359_v56 = vmul.f32 0.5, %v5137_v7  ;;  %v1715_v62 = vadd.f32 0.05243302, %v1714_v11 }
 0x386   :  { %v1727_v36 = vmul.f32 %v1726_v39, %v5281_v37  ;;  %v5363_v15 = vmul.f32 0.5, %v5139_v5  ;;  %v1596_v53 = vmul.f32 %v1595_v3, %v5268_v28  ;;  %v1758_v61 = vmul.f32 %v1757_v34, %v5270_v27 }
 0x387   :  { %v1681_v48 = vmul.f32 3.8918573e-05, %v5302_v32  ;;  %v5369_v49 = vmul.f32 %v1479_v13, %v5182_v43  ;;  %v1519_v51 = vadd.f32 1.1283791, %v1518_v42  ;;  %v1557_v60 = vadd.f32 0.18741608, %v1556_v52 }
 0x388   :  { %v1728_v8 = vadd.f32 0.4994258, %v1727_v36  ;;  %v1633_v45 = vadd.f32 0.0036580483, %v1632_v16  ;;  %v1674_v4 = vmul.f32 %v1673_v46, %v5302_v32  ;;  %v5374_v5 = vmul.f32 0.5, %v5151_v38 }
 0x389   :  { %v1682_v31 = vadd.f32 0.001143296, %v1681_v48  ;;  %v1716_v25 = vmul.f32 %v1715_v62, %v5281_v37  ;;  %v1597_v11 = vadd.f32 0.18741608, %v1596_v53  ;;  %v1759_v43 = vadd.f32 1.1283791, %v1758_v61 }
 0x38a   :  { %v1729_v50 = vmul.f32 %v1728_v8, %v5281_v37  ;;  %v1782_v19 = vand.u32 2147483648, %v5330_v59  ;;  %v1780_v13 = vand.u32 2147483647, %v5330_v59  ;;  %v1558_v38 = vmul.f32 %v1557_v60, %v5256_v40 }
 0x38b   :  { %v4138_v41 = vpop.eup %4137  ;;  %v1683_v3 = vmul.f32 %v1682_v31, %v5302_v32  ;;  %v1634_v39 = vmul.f32 %v1633_v45, %v5313_v14  ;;  %v1675_v52 = vadd.f32 0.05243302, %v1674_v4  ;;  %v1717_v46 = vadd.f32 0.18741608, %v1716_v25 }
 0x38c   :  { %v1772_v7 = vmul.f32 %v4138_v41, %v5330_v59  ;;  %vm1777_vm4 = vweird.f32 %v4138_v41  ;;  %v5381_v42 = vadd.f32 1.0, %v1729_v50  ;;  %vm1776_vm5 = vweird.f32 %v5330_v59 }
 0x38d   :  { %v1684_v16 = vadd.f32 0.014752088, %v1683_v3  ;;  %v1598_v36 = vmul.f32 %v1597_v11, %v5268_v28  ;;  %vm1778_vm6 = vmor %vm1776_vm5, %vm1777_vm4  ;;  %v1783_v53 = vor.u32 1.1754944e-38, %v1782_v19  ;;  %v1321_v48 = vmul.f32 3.8918573e-05, %v5188_v33 }
 0x38e   :  { %v1773_v27 = vsub.f32 1.0, %v1772_v7  ;;  %4139 = vrcp.f32 %v5381_v42  ;;  %v5391_v7 = vmul.f32 %v1519_v51, %v5203_v24  ;;  %v1760_v8 = vmul.f32 %v1759_v43, %v5253_v44 }
 0x38f   :  { %v1685_v61 = vmul.f32 %v1684_v16, %v5302_v32  ;;  %vm1781_vm7 = vcmp.eq.f32.partialorder %v1780_v13, 8.507059e+37  ;;  %v1676_v45 = vmul.f32 %v1675_v52, %v5302_v32  ;;  %v1322_v31 = vadd.f32 0.001143296, %v1321_v48 }
 0x390   :  { %v1774_v34 = vmul.f32 %v4138_v41, %v1773_v27  ;;  %v1559_v25 = vadd.f32 1.1283791, %v1558_v38  ;;  %v1718_v27 = vmul.f32 %v1717_v46, %v5281_v37  ;;  %v1361_v11 = vmul.f32 3.8918573e-05, %v5190_v6 }
 0x391   :  { %v1686_v4 = vadd.f32 0.112945676, %v1685_v61  ;;  %v1599_v19 = vadd.f32 1.1283791, %v1598_v36  ;;  %v1635_v3 = vadd.f32 0.05243302, %v1634_v39  ;;  %v1323_v51 = vmul.f32 %v1322_v31, %v5188_v33 }
 0x392   :  { %v1775_v62 = vadd.f32 %v4138_v41, %v1774_v34  ;;  %v1641_v34 = vmul.f32 3.8918573e-05, %v5313_v14  ;;  %v1362_v13 = vadd.f32 0.001143296, %v1361_v11  ;;  %v1677_v52 = vadd.f32 0.18741608, %v1676_v45 }
 0x393   :  { %v1687_v24 = vmul.f32 %v1686_v4, %v5302_v32  ;;  %v1324_v16 = vadd.f32 0.014752088, %v1323_v51  ;;  %v1719_v46 = vadd.f32 1.1283791, %v1718_v27  ;;  %v1740_v61 = vand.u32 2147483647, %v5381_v42 }
 0x394   :  { %v1779_v60 = vsel %vm1778_vm6, %v4138_v41, %v1775_v62  ;;  %v4140_v44 = vpop.eup %4139  ;;  %v1131_v41 = vmul.f32 0.5, %v5242_v58  ;;  %v1642_v36 = vadd.f32 0.001143296, %v1641_v34  ;;  %v1363_v39 = vmul.f32 %v1362_v13, %v5190_v6 }
 0x395   :  { %v1784_v59 = vsel %vm1781_vm7, %v1783_v53, %v1779_v60  ;;  %v1732_v38 = vmul.f32 %v4140_v44, %v5381_v42  ;;  %v1688_v37 = vadd.f32 0.4994258, %v1687_v24  ;;  %v1325_v58 = vmul.f32 %v1324_v16, %v5188_v33 }
 0x396   :  { %v1785_v50 = vmul.f32 %v1784_v59, %v1760_v8  ;;  %v1742_v60 = vand.u32 2147483648, %v5381_v42  ;;  %v1643_v45 = vmul.f32 %v1642_v36, %v5313_v14  ;;  %v1364_v59 = vadd.f32 0.014752088, %v1363_v39 }
 0x397   :  { %v1733_v53 = vsub.f32 1.0, %v1732_v38  ;;  %v1689_v48 = vmul.f32 %v1688_v37, %v5302_v32  ;;  %vm1737_vm8 = vweird.f32 %v4140_v44  ;;  %v1326_v27 = vadd.f32 0.112945676, %v1325_v58 }
 0x398   :  { %v3978_v43 = vclamps-f32 %v1785_v50, 1.0  ;;  %v1636_v50 = vmul.f32 %v1635_v3, %v5313_v14  ;;  %v1644_v11 = vadd.f32 0.014752088, %v1643_v45  ;;  %v1401_v24 = vmul.f32 3.8918573e-05, %v5198_v22 }
 0x399   :  { %v1734_v4 = vmul.f32 %v4140_v44, %v1733_v53  ;;  %v5408_v31 = vadd.f32 1.0, %v1689_v48  ;;  %v1365_v51 = vmul.f32 %v1364_v59, %v5190_v6  ;;  %vm1736_vm10 = vweird.f32 %v5381_v42 }
 0x39a   :  { %v1803_v62 = vadd.f32 1.0, %v3978_v43  ;;  %vm1738_vm9 = vmor %vm1736_vm10, %vm1737_vm8  ;;  %v1743_v34 = vor.u32 1.1754944e-38, %v1742_v60  ;;  %v1645_v13 = vmul.f32 %v1644_v11, %v5313_v14  ;;  %v1402_v38 = vadd.f32 0.001143296, %v1401_v24 }
 0x39b   :  { %v1735_v43 = vadd.f32 %v4140_v44, %v1734_v4  ;;  %4141 = vrcp.f32 %v5408_v31  ;;  %v1366_v37 = vadd.f32 0.112945676, %v1365_v51  ;;  %v1720_v3 = vmul.f32 %v1719_v46, %v5246_v35 }
 0x39c   :  { %v1819_v8 = vmul.f32 %v1803_v62, %v1131_v41  ;;  %v1678_v41 = vmul.f32 %v1677_v52, %v5302_v32  ;;  %vm1741_vm11 = vcmp.eq.f32.partialorder %v1740_v61, 8.507059e+37  ;;  %v1327_v62 = vmul.f32 %v1326_v27, %v5188_v33 }
 0x39d   :  { %v1739_v16 = vsel %vm1738_vm9, %v4140_v44, %v1735_v43  ;;  %v5420_v36 = vmul.f32 0.5, %v5186_v23  ;;  %v1646_v52 = vadd.f32 0.112945676, %v1645_v13  ;;  %v1403_v42 = vmul.f32 %v1402_v38, %v5198_v22 }
 0x39e   :  { %1827 = vmatpush.msrb.mxu2 %v1819_v8  ;;  %v1744_v32 = vsel %vm1741_vm11, %v1743_v34, %v1739_v16  ;;  %v5424_v39 = vmul.f32 %v1559_v25, %v5229_v47  ;;  %v1637_v53 = vadd.f32 0.18741608, %v1636_v50  ;;  %v1130_v48 = vmul.f32 0.5, %v5220_v17 }
 0x39f   :  { %v1745_v58 = vmul.f32 %v1744_v32, %v1720_v3  ;;  %v1679_v8 = vadd.f32 1.1283791, %v1678_v41  ;;  %v1647_v35 = vmul.f32 %v1646_v52, %v5313_v14  ;;  %v1404_v44 = vadd.f32 0.014752088, %v1403_v42 }
 0x3a0   :  { %v1367_v46 = vmul.f32 %v1366_v37, %v5190_v6  ;;  %v5430_v23 = vmul.f32 %v1599_v19, %v5234_v10  ;;  %v1601_v45 = vmul.f32 3.8918573e-05, %v5268_v28  ;;  %v1328_v59 = vadd.f32 0.4994258, %v1327_v62 }
 0x3a1   :  { %v4142_v61 = vpop.eup %4141  ;;  %v3977_v60 = vclamps-f32 %v1745_v58, 1.0  ;;  %v1700_v25 = vand.u32 2147483647, %v5408_v31  ;;  %v1648_v17 = vadd.f32 0.4994258, %v1647_v35  ;;  %v1702_v50 = vand.u32 2147483648, %v5408_v31 }
 0x3a2   :  { %v1692_v47 = vmul.f32 %v4142_v61, %v5408_v31  ;;  %v1441_v4 = vmul.f32 3.8918573e-05, %v5207_v29  ;;  %v1602_v11 = vadd.f32 0.001143296, %v1601_v45  ;;  %v1405_v24 = vmul.f32 %v1404_v44, %v5198_v22 }
 0x3a3   :  { %v1802_v27 = vadd.f32 1.0, %v3977_v60  ;;  %v1649_v10 = vmul.f32 %v1648_v17, %v5313_v14  ;;  %v1368_v41 = vadd.f32 0.4994258, %v1367_v46  ;;  %v1329_v38 = vmul.f32 %v1328_v59, %v5188_v33 }
 0x3a4   :  { %v1693_v51 = vsub.f32 1.0, %v1692_v47  ;;  %v1442_v19 = vadd.f32 0.001143296, %v1441_v4  ;;  %v1603_v34 = vmul.f32 %v1602_v11, %v5268_v28  ;;  %v1406_v13 = vadd.f32 0.112945676, %v1405_v24 }
 0x3a5   :  { %v1818_v43 = vmul.f32 %v1802_v27, %v1130_v48  ;;  %vm1697_vm12 = vweird.f32 %v4142_v61  ;;  %v5441_v3 = vadd.f32 1.0, %v1649_v10  ;;  %v1638_v62 = vmul.f32 %v1637_v53, %v5313_v14 }
 0x3a6   :  { %v1694_v37 = vmul.f32 %v4142_v61, %v1693_v51  ;;  %v1443_v16 = vmul.f32 %v1442_v19, %v5207_v29  ;;  %vm1696_vm13 = vweird.f32 %v5408_v31  ;;  %v1604_v32 = vadd.f32 0.014752088, %v1603_v34 }
 0x3a7   :  { %1828 = vmatpush.msrb.mxu2 %v1818_v43  ;;  %v1407_v52 = vmul.f32 %v1406_v13, %v5198_v22  ;;  %v1703_v48 = vor.u32 1.1754944e-38, %v1702_v50  ;;  %4143 = vrcp.f32 %v5441_v3  ;;  %v1369_v33 = vmul.f32 %v1368_v41, %v5190_v6  ;;  %vm1698_vm14 = vmor %vm1696_vm13, %vm1697_vm12 }
 0x3a8   :  { %v1695_v42 = vadd.f32 %v4142_v61, %v1694_v37  ;;  %v1605_v58 = vmul.f32 %v1604_v32, %v5268_v28  ;;  %v1444_v35 = vadd.f32 0.014752088, %v1443_v16  ;;  %v5450_v46 = vadd.f32 1.0, %v1329_v38 }
 0x3a9   :  { %v1408_v44 = vadd.f32 0.4994258, %v1407_v52  ;;  %v1680_v14 = vmul.f32 %v1679_v8, %v5276_v9  ;;  %vm1701_vm15 = vcmp.eq.f32.partialorder %v1700_v25, 8.507059e+37  ;;  %v1481_v31 = vmul.f32 3.8918573e-05, %v5214_v54 }
 0x3aa   :  { %v1699_v53 = vsel %vm1698_vm14, %v4142_v61, %v1695_v42  ;;  %v1639_v60 = vadd.f32 1.1283791, %v1638_v62  ;;  %v1606_v59 = vadd.f32 0.112945676, %v1605_v58  ;;  %v1445_v47 = vmul.f32 %v1444_v35, %v5207_v29 }
 0x3ab   :  { %v1704_v45 = vsel %vm1701_vm15, %v1703_v48, %v1699_v53  ;;  %v1482_v6 = vadd.f32 0.001143296, %v1481_v31  ;;  %v1409_v4 = vmul.f32 %v1408_v44, %v5198_v22  ;;  %v1281_v27 = vmul.f32 3.8918573e-05, %v5211_v57 }
 0x3ac   :  { %v1705_v17 = vmul.f32 %v1704_v45, %v1680_v14  ;;  %v1607_v50 = vmul.f32 %v1606_v59, %v5268_v28  ;;  %v1446_v11 = vadd.f32 0.112945676, %v1445_v47  ;;  %v5458_v24 = vadd.f32 1.0, %v1369_v33 }
 0x3ad   :  { %4145 = vrcp.f32 %v5450_v46  ;;  %v4144_v9 = vpop.eup %4143  ;;  %v1561_v61 = vmul.f32 3.8918573e-05, %v5256_v40  ;;  %v1483_v25 = vmul.f32 %v1482_v6, %v5214_v54  ;;  %v5463_v51 = vadd.f32 1.0, %v1409_v4 }
 0x3ae   :  { %v3976_v8 = vclamps-f32 %v1705_v17, 1.0  ;;  %v1652_v10 = vmul.f32 %v4144_v9, %v5441_v3  ;;  %v1660_v22 = vand.u32 2147483647, %v5441_v3  ;;  %v1608_v19 = vadd.f32 0.4994258, %v1607_v50 }
 0x3af   :  { %v1447_v41 = vmul.f32 %v1446_v11, %v5207_v29  ;;  %v1562_v34 = vadd.f32 0.001143296, %v1561_v61  ;;  %v1484_v13 = vadd.f32 0.014752088, %v1483_v25  ;;  %4147 = vrcp.f32 %v5463_v51 }
 0x3b0   :  { %v1801_v43 = vadd.f32 1.0, %v3976_v8  ;;  %v1653_v38 = vsub.f32 1.0, %v1652_v10  ;;  %v1662_v37 = vand.u32 2147483648, %v5441_v3  ;;  %v1609_v16 = vmul.f32 %v1608_v19, %v5268_v28 }
 0x3b1   :  { %v1448_v62 = vadd.f32 0.4994258, %v1447_v41  ;;  %v1563_v52 = vmul.f32 %v1562_v34, %v5256_v40  ;;  %v1521_v42 = vmul.f32 3.8918573e-05, %v5226_v63  ;;  %v1485_v48 = vmul.f32 %v1484_v13, %v5214_v54 }
 0x3b2   :  { %v1817_v32 = vmul.f32 %v1801_v43, %v5420_v36  ;;  %v1654_v58 = vmul.f32 %v4144_v9, %v1653_v38  ;;  %vm1657_vm2 = vweird.f32 %v4144_v9  ;;  %v5477_v35 = vadd.f32 1.0, %v1609_v16 }
 0x3b3   :  { %v5475_v33 = vpop.eup %4145  ;;  %v1449_v44 = vmul.f32 %v1448_v62, %v5207_v29  ;;  %v1564_v14 = vadd.f32 0.014752088, %v1563_v52  ;;  %v1522_v28 = vadd.f32 0.001143296, %v1521_v42  ;;  %v1486_v53 = vadd.f32 0.112945676, %v1485_v48 }
 0x3b4   :  { %1829 = vmatpush.msrb.mxu2 %v1817_v32  ;;  %4149 = vrcp.f32 %v5458_v24  ;;  %v1655_v36 = vadd.f32 %v4144_v9, %v1654_v58  ;;  %vm1656_vm3 = vweird.f32 %v5441_v3  ;;  %v1282_v31 = vadd.f32 0.001143296, %v1281_v27 }
 0x3b5   :  { %4151 = vrcp.f32 %v5477_v35  ;;  %v5483_v45 = vpop.eup %4147  ;;  %vm1658_vm4 = vmor %vm1656_vm3, %vm1657_vm2  ;;  %v1663_v59 = vor.u32 1.1754944e-38, %v1662_v37  ;;  %v1565_v47 = vmul.f32 %v1564_v14, %v5256_v40  ;;  %v1523_v29 = vmul.f32 %v1522_v28, %v5226_v63 }
 0x3b6   :  { %v1487_v17 = vmul.f32 %v1486_v53, %v5214_v54  ;;  %v1640_v6 = vmul.f32 %v1639_v60, %v5286_v26  ;;  %v1659_v4 = vsel %vm1658_vm4, %v4144_v9, %v1655_v36  ;;  %vm1661_vm5 = vcmp.eq.f32.partialorder %v1660_v22, 8.507059e+37 }
 0x3b7   :  { %v5489_v50 = vadd.f32 1.0, %v1449_v44  ;;  %v1664_v3 = vsel %vm1661_vm5, %v1663_v59, %v1659_v4  ;;  %v1566_v11 = vadd.f32 0.112945676, %v1565_v47  ;;  %v1524_v8 = vadd.f32 0.014752088, %v1523_v29 }
 0x3b8   :  { %v1412_v27 = vmul.f32 %v5483_v45, %v5463_v51  ;;  %v1665_v61 = vmul.f32 %v1664_v3, %v1640_v6  ;;  %v1488_v25 = vadd.f32 0.4994258, %v1487_v17  ;;  %v5495_v10 = vmul.f32 %v1282_v31, %v5211_v57 }
 0x3b9   :  { %4153 = vrcp.f32 %v5489_v50  ;;  %v1567_v26 = vmul.f32 %v1566_v11, %v5256_v40  ;;  %v1525_v60 = vmul.f32 %v1524_v8, %v5226_v63  ;;  %v1380_v9 = vand.u32 2147483647, %v5458_v24 }
 0x3ba   :  { %v5497_v19 = vpop.eup %4149  ;;  %v1382_v22 = vand.u32 2147483648, %v5458_v24  ;;  %v3975_v43 = vclamps-f32 %v1665_v61, 1.0  ;;  %v1489_v34 = vmul.f32 %v1488_v25, %v5214_v54  ;;  %v1420_v13 = vand.u32 2147483647, %v5463_v51 }
 0x3bb   :  { %v4152_v41 = vpop.eup %4151  ;;  %v5507_v38 = vmul.f32 %v5475_v33, %v5450_v46  ;;  %v1568_v16 = vadd.f32 0.4994258, %v1567_v26  ;;  %v1526_v62 = vadd.f32 0.112945676, %v1525_v60  ;;  %v1413_v32 = vsub.f32 1.0, %v1412_v27 }
 0x3bc   :  { %v1612_v37 = vmul.f32 %v4152_v41, %v5477_v35  ;;  %v1800_v52 = vadd.f32 1.0, %v3975_v43  ;;  %v1620_v42 = vand.u32 2147483647, %v5477_v35  ;;  %v5511_v48 = vadd.f32 1.0, %v1489_v34 }
 0x3bd   :  { %v5515_v58 = vmul.f32 %v5497_v19, %v5458_v24  ;;  %v1622_v44 = vand.u32 2147483648, %v5477_v35  ;;  %v1569_v14 = vmul.f32 %v1568_v16, %v5256_v40  ;;  %v1527_v28 = vmul.f32 %v1526_v62, %v5226_v63 }
 0x3be   :  { %v1613_v54 = vsub.f32 1.0, %v1612_v37  ;;  %v1816_v36 = vmul.f32 %v1800_v52, %v5374_v5  ;;  %vm1617_vm6 = vweird.f32 %v4152_v41  ;;  %4155 = vrcp.f32 %v5511_v48 }
 0x3bf   :  { %v5520_v53 = vpop.eup %4153  ;;  %v1462_v31 = vand.u32 2147483648, %v5489_v50  ;;  %vm1416_vm7 = vweird.f32 %v5463_v51  ;;  %v5526_v47 = vadd.f32 1.0, %v1569_v14  ;;  %v1528_v29 = vadd.f32 0.4994258, %v1527_v28 }
 0x3c0   :  { %v1614_v59 = vmul.f32 %v4152_v41, %v1613_v54  ;;  %v1414_v17 = vmul.f32 %v5483_v45, %v1413_v32  ;;  %1830 = vmatpush.msrb.mxu2 %v1816_v36  ;;  %vm1616_vm8 = vweird.f32 %v5477_v35  ;;  %vm5530_vm10 = vcmp.eq.f32.partialorder %v1620_v42, 8.507059e+37 }
 0x3c1   :  { %v1452_v5 = vmul.f32 %v5520_v53, %v5489_v50  ;;  %v1460_v6 = vand.u32 2147483647, %v5489_v50  ;;  %v1623_v3 = vor.u32 1.1754944e-38, %v1622_v44  ;;  %4157 = vrcp.f32 %v5526_v47  ;;  %vm1618_vm9 = vmor %vm1616_vm8, %vm1617_vm6 }
 0x3c2   :  { %v1615_v4 = vadd.f32 %v4152_v41, %v1614_v59  ;;  %v1500_v11 = vand.u32 2147483647, %v5511_v48  ;;  %v1529_v8 = vmul.f32 %v1528_v29, %v5226_v63  ;;  %vm1456_vm11 = vweird.f32 %v5489_v50 }
 0x3c3   :  { %v1453_v35 = vsub.f32 1.0, %v1452_v5  ;;  %vm1417_vm12 = vweird.f32 %v5483_v45  ;;  %v1502_v61 = vand.u32 2147483648, %v5511_v48  ;;  %v1463_v25 = vor.u32 1.1754944e-38, %v1462_v31 }
 0x3c4   :  { %v1619_v27 = vsel %vm1618_vm9, %v4152_v41, %v1615_v4  ;;  %v1415_v26 = vadd.f32 %v5483_v45, %v1414_v17  ;;  %v4156_v60 = vpop.eup %4155  ;;  %v1580_v34 = vand.u32 2147483647, %v5526_v47  ;;  %v5548_v37 = vadd.f32 1.0, %v1529_v8  ;;  %vm5571_vm4 = vmor %vm1416_vm7, %vm1417_vm12 }
 0x3c5   :  { %v1624_v43 = vsel %vm5530_vm10, %v1623_v3, %v1619_v27  ;;  %v1454_v63 = vmul.f32 %v5520_v53, %v1453_v35  ;;  %vm5551_vm13 = vcmp.eq.f32.partialorder %v1460_v6, 8.507059e+37  ;;  %v1492_v62 = vmul.f32 %v4156_v60, %v5511_v48 }
 0x3c6   :  { %v1625_v41 = vmul.f32 %v1624_v43, %v5430_v23  ;;  %vm1496_vm14 = vweird.f32 %v5511_v48  ;;  %vm5558_vm15 = vcmp.eq.f32.partialorder %v1500_v11, 8.507059e+37  ;;  %vm1576_vm2 = vweird.f32 %v5526_v47 }
 0x3c7   :  { %v1582_v52 = vand.u32 2147483648, %v5526_v47  ;;  %4159 = vrcp.f32 %v5548_v37  ;;  %vm1457_vm3 = vweird.f32 %v5520_v53  ;;  %v4158_v42 = vpop.eup %4157  ;;  %v1493_v44 = vsub.f32 1.0, %v1492_v62 }
 0x3c8   :  { %v3974_v54 = vclamps-f32 %v1625_v41, 1.0  ;;  %v1455_v23 = vadd.f32 %v5520_v53, %v1454_v63  ;;  %v1422_v28 = vand.u32 2147483648, %v5463_v51  ;;  %v1572_v36 = vmul.f32 %v4158_v42, %v5526_v47  ;;  %vm5589_vm8 = vmor %vm1456_vm11, %vm1457_vm3 }
 0x3c9   :  { %vm5577_vm5 = vcmp.eq.f32.partialorder %v1580_v34, 8.507059e+37  ;;  %v1503_v59 = vor.u32 1.1754944e-38, %v1502_v61  ;;  %v1419_v29 = vsel %vm5571_vm4, %v5483_v45, %v1415_v26  ;;  %vm1376_vm6 = vweird.f32 %v5458_v24 }
 0x3ca   :  { %v1799_v17 = vadd.f32 1.0, %v3974_v54  ;;  %v1494_v40 = vmul.f32 %v4156_v60, %v1493_v44  ;;  %vm1497_vm7 = vweird.f32 %v4156_v60  ;;  %vm5595_vm10 = vcmp.eq.f32.partialorder %v1420_v13, 8.507059e+37 }
 0x3cb   :  { %v1573_v45 = vsub.f32 1.0, %v1572_v36  ;;  %v1583_v4 = vor.u32 1.1754944e-38, %v1582_v52  ;;  %v1459_v3 = vsel %vm5589_vm8, %v5520_v53, %v1455_v23  ;;  %v1373_v11 = vsub.f32 1.0, %v5515_v58  ;;  %vm1498_vm11 = vmor %vm1496_vm14, %vm1497_vm7 }
 0x3cc   :  { %v1815_v50 = vmul.f32 %v1799_v17, %v5363_v15  ;;  %v1540_v8 = vand.u32 2147483647, %v5548_v37  ;;  %v1495_v35 = vadd.f32 %v4156_v60, %v1494_v40  ;;  %v1423_v27 = vor.u32 1.1754944e-38, %v1422_v28 }
 0x3cd   :  { %v4160_v61 = vpop.eup %4159  ;;  %v1574_v51 = vmul.f32 %v4158_v42, %v1573_v45  ;;  %vm1577_vm9 = vweird.f32 %v4158_v42  ;;  %v1542_v13 = vand.u32 2147483648, %v5548_v37  ;;  %v1374_v26 = vmul.f32 %v5497_v19, %v1373_v11 }
 0x3ce   :  { %vm5612_vm12 = vcmp.eq.f32.partialorder %v1380_v9, 8.507059e+37  ;;  %1831 = vmatpush.msrb.mxu2 %v1815_v50  ;;  %v1532_v15 = vmul.f32 %v4160_v61, %v5548_v37  ;;  %v1499_v53 = vsel %vm1498_vm11, %v4156_v60, %v1495_v35  ;;  %v1464_v43 = vsel %vm5551_vm13, %v1463_v25, %v1459_v3  ;;  %vm1578_vm3 = vmor %vm1576_vm2, %vm1577_vm9 }
 0x3cf   :  { %v1424_v34 = vsel %vm5595_vm10, %v1423_v27, %v1419_v29  ;;  %v1575_v48 = vadd.f32 %v4158_v42, %v1574_v51  ;;  %v1504_v63 = vsel %vm5558_vm15, %v1503_v59, %v1499_v53  ;;  %v1375_v41 = vadd.f32 %v5497_v19, %v1374_v26  ;;  %v7309_v26 = vld [vmem:[#allocation17_spill] sm:$0xff] }
 0x3d0   :  { %vm1377_vm14 = vweird.f32 %v5497_v19  ;;  %v1533_v9 = vsub.f32 1.0, %v1532_v15  ;;  %vm1536_vm4 = vweird.f32 %v5548_v37  ;;  %vm5628_vm7 = vcmp.eq.f32.partialorder %v1540_v8, 8.507059e+37 }
 0x3d1   :  { %v1333_v25 = vsub.f32 1.0, %v5507_v38  ;;  %v1579_v16 = vsel %vm1578_vm3, %v4158_v42, %v1575_v48  ;;  %v1543_v62 = vor.u32 1.1754944e-38, %v1542_v13  ;;  %v1465_v32 = vmul.f32 %v1464_v43, %v5356_v21  ;;  %vm5640_vm15 = vmor %vm1376_vm6, %vm1377_vm14 }
 0x3d2   :  { %v1425_v52 = vmul.f32 %v1424_v34, %v5351_v2  ;;  %v1584_v54 = vsel %vm5577_vm5, %v1583_v4, %v1579_v16  ;;  %v1534_v47 = vmul.f32 %v4160_v61, %v1533_v9  ;;  %vm1537_vm13 = vweird.f32 %v4160_v61 }
 0x3d3   :  { %v1505_v44 = vmul.f32 %v1504_v63, %v5369_v49  ;;  %v1585_v38 = vmul.f32 %v1584_v54, %v5424_v39  ;;  %v1379_v21 = vsel %vm5640_vm15, %v5497_v19, %v1375_v41  ;;  %v1334_v2 = vmul.f32 %v5475_v33, %v1333_v25  ;;  %vm1538_vm6 = vmor %vm1536_vm4, %vm1537_vm13  ;;  %v7310_v41 = vld [vmem:[#allocation8_spill] sm:$0xff] }
 0x3d4   :  { %vm1337_vm2 = vweird.f32 %v5475_v33  ;;  %v1535_v42 = vadd.f32 %v4160_v61, %v1534_v47  ;;  %v1383_v49 = vor.u32 1.1754944e-38, %v1382_v22  ;;  %vm1336_vm5 = vweird.f32 %v5450_v46  ;;  %v7311_v54 = vld [vmem:[#allocation16_spill] sm:$0xff] }
 0x3d5   :  { %v1340_v14 = vand.u32 2147483647, %v5450_v46  ;;  %v3973_v28 = vclamps-f32 %v1585_v38, 1.0  ;;  %v1335_v39 = vadd.f32 %v5475_v33, %v1334_v2  ;;  %v1342_v19 = vand.u32 2147483648, %v5450_v46  ;;  %vm1338_vm8 = vmor %vm1336_vm5, %vm1337_vm2  ;;  %v7312_v38 = vld [vmem:[#allocation15_spill] sm:$0xff] }
 0x3d6   :  { %v1284_v36 = vadd.f32 0.014752088, %v5495_v10  ;;  %v1539_v31 = vsel %vm1538_vm6, %v4160_v61, %v1535_v42  ;;  %v3971_v59 = vclamps-f32 %v1505_v44, 1.0  ;;  %v3969_v29 = vclamps-f32 %v1425_v52, 1.0 }
 0x3d7   :  { %v1384_v24 = vsel %vm5612_vm12, %v1383_v49, %v1379_v21  ;;  %v1798_v22 = vadd.f32 1.0, %v3973_v28  ;;  %v1544_v17 = vsel %vm5628_vm7, %v1543_v62, %v1539_v31  ;;  %v1339_v37 = vsel %vm1338_vm8, %v5475_v33, %v1335_v39  ;;  %v7314_v31 = vld [vmem:[#allocation21_spill] sm:$0xff] }
 0x3d8   :  { %v1343_v40 = vor.u32 1.1754944e-38, %v1342_v19  ;;  %v1545_v5 = vmul.f32 %v1544_v17, %v5391_v7  ;;  %vm1341_vm10 = vcmp.eq.f32.partialorder %v1340_v14, 8.507059e+37  ;;  %v1285_v46 = vmul.f32 %v1284_v36, %v5211_v57  ;;  %v7313_v14 = vld [vmem:[#allocation12_spill] sm:$0xff] }
 0x3d9   :  { %v1241_v10 = vmul.f32 3.8918573e-05, %v5209_v20  ;;  %v1814_v6 = vmul.f32 %v1798_v22, %v5359_v56  ;;  %v1201_v4 = vmul.f32 3.8918573e-05, %v5164_v1  ;;  %v1161_v3 = vmul.f32 3.8918573e-05, %v5162_v30 }
 0x3da   :  { %v1344_v45 = vsel %vm1341_vm10, %v1343_v40, %v1339_v37  ;;  %v3972_v11 = vclamps-f32 %v1545_v5, 1.0  ;;  %v3970_v50 = vclamps-f32 %v1465_v32, 1.0  ;;  %v1385_v8 = vmul.f32 %v1384_v24, %v5344_v0  ;;  %v7315_v22 = vld [vmem:[#allocation7_spill] sm:$0xff] }
 0x3db   :  { %v1286_v33 = vadd.f32 0.112945676, %v1285_v46  ;;  %1832 = vmatpush.msrb.mxu2 %v1814_v6  ;;  %v1242_v35 = vadd.f32 0.001143296, %v1241_v10  ;;  %v1202_v7 = vadd.f32 0.001143296, %v1201_v4  ;;  %v1345_v13 = vmul.f32 %v1344_v45, %v5341_v18 }
 0x3dc   :  { %v1162_v27 = vadd.f32 0.001143296, %v1161_v3  ;;  %v1797_v61 = vadd.f32 1.0, %v3972_v11  ;;  %v1796_v51 = vadd.f32 1.0, %v3971_v59  ;;  %v1124_v58 = vmul.f32 0.5, %v7309_v26  ;;  %v7316_v46 = vld [vmem:[#allocation13_spill] sm:$0xff] }
 0x3dd   :  { %v1287_v56 = vmul.f32 %v1286_v33, %v5211_v57  ;;  %v1243_v15 = vmul.f32 %v1242_v35, %v5209_v20  ;;  %v1203_v53 = vmul.f32 %v1202_v7, %v5164_v1  ;;  %v1795_v34 = vadd.f32 1.0, %v3970_v50 }
 0x3de   :  { %v1163_v43 = vmul.f32 %v1162_v27, %v5162_v30  ;;  %v1813_v0 = vmul.f32 %v1797_v61, %v5347_v12  ;;  %v3968_v48 = vclamps-f32 %v1385_v8, 1.0  ;;  %v1156_v9 = vmul.f32 %v7310_v41, %v5162_v30 }
 0x3df   :  { %v1288_v63 = vadd.f32 0.4994258, %v1287_v56  ;;  %v1244_v60 = vadd.f32 0.014752088, %v1243_v15  ;;  %v1204_v18 = vadd.f32 0.014752088, %v1203_v53  ;;  %v1812_v16 = vmul.f32 %v1796_v51, %v1124_v58 }
 0x3e0   :  { %v1164_v25 = vadd.f32 0.014752088, %v1163_v43  ;;  %1833 = vmatpush.msrb.mxu2 %v1813_v0  ;;  %v1794_v62 = vadd.f32 1.0, %v3969_v29  ;;  %v3967_v32 = vclamps-f32 %v1345_v13, 1.0  ;;  %v1276_v47 = vmul.f32 %v7311_v54, %v5211_v57  ;;  %v3928_v58 = vld [vmem:[%s7151_s3 + $0x20] sm:$0xff] }
 0x3e1   :  { %v1289_v52 = vmul.f32 %v1288_v63, %v5211_v57  ;;  %v1245_v12 = vmul.f32 %v1244_v60, %v5209_v20  ;;  %v1205_v44 = vmul.f32 %v1204_v18, %v5164_v1  ;;  %v1122_v21 = vmul.f32 0.5, %v7312_v38  ;;  %1922 = vperm.xlu2 %4098, %v3928_v58  }
 0x3e2   :  { %v1165_v23 = vmul.f32 %v1164_v25, %v5162_v30  ;;  %1834 = vmatpush.msrb.mxu2 %v1812_v16  ;;  %v1811_v2 = vmul.f32 %v1795_v34, %v5336_v55  ;;  %v1793_v42 = vadd.f32 1.0, %v3968_v48  ;;  %v1196_v28 = vmul.f32 %v7313_v14, %v5164_v1  ;;  %v7317_v16 = vld [vmem:[#allocation14_spill] sm:$0xff] }
 0x3e3   :  { %v5688_v49 = vadd.f32 1.0, %v1289_v52  ;;  %v1246_v39 = vadd.f32 0.112945676, %v1245_v12  ;;  %v1206_v19 = vadd.f32 0.112945676, %v1205_v44  ;;  %v1121_v59 = vmul.f32 0.5, %v7314_v31 }
 0x3e4   :  { %v1166_v36 = vadd.f32 0.112945676, %v1165_v23  ;;  %1835 = vmatpush.msrb.mxu2 %v1811_v2  ;;  %v1810_v29 = vmul.f32 %v1794_v62, %v1122_v21  ;;  %v1792_v24 = vadd.f32 1.0, %v3967_v32  ;;  %v1236_v17 = vmul.f32 %v7315_v22, %v5209_v20  ;;  %v7318_v32 = vld [vmem:[#allocation9_spill] sm:$0xff]  ;;  %v7319_v12 = vld [vmem:[#allocation18_spill] sm:$0xff] }
 0x3e5   :  { %4161 = vrcp.f32 %v5688_v49  ;;  %v1247_v55 = vmul.f32 %v1246_v39, %v5209_v20  ;;  %v1207_v37 = vmul.f32 %v1206_v19, %v5164_v1  ;;  %v1277_v5 = vadd.f32 0.18741608, %v1276_v47  ;;  %v7320_v23 = vld [vmem:[#allocation10_spill] sm:$0xff] }
 0x3e6   :  { %v1167_v40 = vmul.f32 %v1166_v36, %v5162_v30  ;;  %v1120_v10 = vmul.f32 0.5, %v7316_v46  ;;  %1836 = vmatpush.msrb.mxu2 %v1810_v29  ;;  %v1809_v6 = vmul.f32 %v1793_v42, %v1121_v59  ;;  %v1157_v11 = vadd.f32 0.18741608, %v1156_v9 }
 0x3e7   :  { %v1248_v45 = vadd.f32 0.4994258, %v1247_v55  ;;  %v1208_v4 = vadd.f32 0.4994258, %v1207_v37  ;;  %v1197_v50 = vadd.f32 0.18741608, %v1196_v28  ;;  %v1278_v51 = vmul.f32 %v1277_v5, %v5211_v57 }
 0x3e8   :  { %v1168_v3 = vadd.f32 0.4994258, %v1167_v40  ;;  %1837 = vmatpush.msrb.mxu2 %v1809_v6  ;;  %v1808_v8 = vmul.f32 %v1792_v24, %v1120_v10  ;;  %v1237_v33 = vadd.f32 0.18741608, %v1236_v17  ;;  %v1158_v15 = vmul.f32 %v1157_v11, %v5162_v30 }
 0x3e9   :  { %v1249_v35 = vmul.f32 %v1248_v45, %v5209_v20  ;;  %v1209_v7 = vmul.f32 %v1208_v4, %v5164_v1  ;;  %v1198_v53 = vmul.f32 %v1197_v50, %v5164_v1  ;;  %v1279_v34 = vadd.f32 1.1283791, %v1278_v51 }
 0x3ea   :  { %v1169_v27 = vmul.f32 %v1168_v3, %v5162_v30  ;;  %1838 = vmatpush.msrb.mxu2 %v1808_v8  ;;  %v1238_v57 = vmul.f32 %v1237_v33, %v5209_v20  ;;  %v1302_v48 = vand.u32 2147483648, %v5688_v49  ;;  %v1300_v41 = vand.u32 2147483647, %v5688_v49  ;;  %v3929_v20 = vld [vmem:[%s7151_s3 + $0x28] sm:$0xff] }
 0x3eb   :  { %v4162_v61 = vpop.eup %4161  ;;  %v5705_v56 = vadd.f32 1.0, %v1249_v35  ;;  %v5707_v26 = vadd.f32 1.0, %v1209_v7  ;;  %v1159_v30 = vadd.f32 1.1283791, %v1158_v15  ;;  %v1199_v1 = vadd.f32 1.1283791, %v1198_v53  ;;  %1928 = vperm.xlu2 %4098, %v3929_v20  }
 0x3ec   :  { %v1292_v13 = vmul.f32 %v4162_v61, %v5688_v49  ;;  %v5714_v43 = vadd.f32 1.0, %v1169_v27  ;;  %vm1297_vm9 = vweird.f32 %v4162_v61  ;;  %v1239_v9 = vadd.f32 1.1283791, %v1238_v57  ;;  %v7322_v57 = vld [vmem:[#allocation19_spill] sm:$0xff] }
 0x3ed   :  { %4163 = vrcp.f32 %v5705_v56  ;;  %vm1296_vm11 = vweird.f32 %v5688_v49  ;;  %v1303_v18 = vor.u32 1.1754944e-38, %v1302_v48  ;;  %v1119_v62 = vmul.f32 0.5, %v7317_v16  ;;  %v7321_v49 = vld [vmem:[#allocation11_spill] sm:$0xff] }
 0x3ee   :  { %v1293_v0 = vsub.f32 1.0, %v1292_v13  ;;  %4165 = vrcp.f32 %v5707_v26  ;;  %vm1298_vm12 = vmor %vm1296_vm11, %vm1297_vm9  ;;  %v1280_v52 = vmul.f32 %v1279_v34, %v7318_v32  ;;  %vm1301_vm14 = vcmp.eq.f32.partialorder %v1300_v41, 8.507059e+37  ;;  %v1825_v32 = vpop.permute.xlu1 %1824 }
 0x3ef   :  { %4167 = vrcp.f32 %v5714_v43  ;;  %v1160_v44 = vmul.f32 %v1159_v30, %v7319_v12  ;;  %v1200_v38 = vmul.f32 %v1199_v1, %v7320_v23  ;;  %v1240_v14 = vmul.f32 %v1239_v9, %v7321_v49  ;;  %v7324_v9 = vld [vmem:[#allocation22_spill] sm:$0xff] }
 0x3f0   :  { %v1294_v63 = vmul.f32 %v4162_v61, %v1293_v0  ;;  %vm1256_vm3 = vweird.f32 %v5705_v56  ;;  %v1260_v36 = vand.u32 2147483647, %v5705_v56  ;;  %v1262_v31 = vand.u32 2147483648, %v5705_v56 }
 0x3f1   :  { %vm1216_vm4 = vweird.f32 %v5707_v26  ;;  %v1220_v22 = vand.u32 2147483647, %v5707_v26  ;;  %v1222_v55 = vand.u32 2147483648, %v5707_v26  ;;  %v1182_v46 = vand.u32 2147483648, %v5714_v43 }
 0x3f2   :  { %v1295_v60 = vadd.f32 %v4162_v61, %v1294_v63  ;;  %v1180_v45 = vand.u32 2147483647, %v5714_v43  ;;  %vm1261_vm5 = vcmp.eq.f32.partialorder %v1260_v36, 8.507059e+37  ;;  %v1263_v3 = vor.u32 1.1754944e-38, %v1262_v31  ;;  %v7323_v63 = vld [vmem:[#allocation23_spill] sm:$0xff] }
 0x3f3   :  { %v4164_v25 = vpop.eup %4163  ;;  %v1223_v8 = vor.u32 1.1754944e-38, %v1222_v55  ;;  %vm1176_vm8 = vweird.f32 %v5714_v43  ;;  %vm1221_vm10 = vcmp.eq.f32.partialorder %v1220_v22, 8.507059e+37  ;;  %v1183_v27 = vor.u32 1.1754944e-38, %v1182_v46  ;;  %v3983_v22 = vld [vmem:[%s7151_s3 + $0x40] sm:$0xff] }
 0x3f4   :  { %v1299_v54 = vsel %vm1298_vm12, %v4162_v61, %v1295_v60  ;;  %v4166_v47 = vpop.eup %4165  ;;  %v1252_v2 = vmul.f32 %v4164_v25, %v5705_v56  ;;  %vm1257_vm7 = vweird.f32 %v4164_v25  ;;  %vm1181_vm11 = vcmp.eq.f32.partialorder %v1180_v45, 8.507059e+37  ;;  %2878 = vperm.xlu2 %4098, %v3983_v22   ;;  %v3991_v22 = vld [vmem:[%s7149_s1 + $0x138] sm:$0xff] }
 0x3f5   :  { %v1304_v21 = vsel %vm1301_vm14, %v1303_v18, %v1299_v54  ;;  %v4168_v42 = vpop.eup %4167  ;;  %v1212_v39 = vmul.f32 %v4166_v47, %v5707_v26  ;;  %vm1217_vm13 = vweird.f32 %v4166_v47  ;;  %vm1258_vm2 = vmor %vm1256_vm3, %vm1257_vm7  ;;  %v1118_v0 = vmul.f32 0.5, %v7322_v57 }
 0x3f6   :  { %v1305_v28 = vmul.f32 %v1304_v21, %v1280_v52  ;;  %v1253_v19 = vsub.f32 1.0, %v1252_v2  ;;  %v1172_v59 = vmul.f32 %v4168_v42, %v5714_v43  ;;  %vm1177_vm15 = vweird.f32 %v4168_v42  ;;  %vm1218_vm6 = vmor %vm1216_vm4, %vm1217_vm13 }
 0x3f7   :  { %v1213_v24 = vsub.f32 1.0, %v1212_v39  ;;  %vm1178_vm9 = vmor %vm1176_vm8, %vm1177_vm15  ;;  %v1117_v41 = vmul.f32 0.5, %v7323_v63  ;;  %v1116_v60 = vmul.f32 0.5, %v7324_v9  ;;  %v7325_v16 = vmov 1.0  }
 0x3f8   :  { %v3966_v29 = vclamps-f32 %v1305_v28, 1.0  ;;  %v1254_v17 = vmul.f32 %v4164_v25, %v1253_v19  ;;  %v1173_v37 = vsub.f32 1.0, %v1172_v59 }
 0x3f9   :  { %v1214_v5 = vmul.f32 %v4166_v47, %v1213_v24 }
 0x3fa   :  { %v1791_v40 = vadd.f32 1.0, %v3966_v29  ;;  %v1255_v10 = vadd.f32 %v4164_v25, %v1254_v17  ;;  %v1174_v6 = vmul.f32 %v4168_v42, %v1173_v37 }
 0x3fb   :  { %v1215_v11 = vadd.f32 %v4166_v47, %v1214_v5 }
 0x3fc   :  { %v1807_v4 = vmul.f32 %v1791_v40, %v1119_v62  ;;  %v1259_v50 = vsel %vm1258_vm2, %v4164_v25, %v1255_v10  ;;  %v1175_v33 = vadd.f32 %v4168_v42, %v1174_v6  ;;  %v3979_v25 = vld [vmem:[%s7150_s2 + $0x8] sm:$0xff]  ;;  %v4037_v40 = vld [vmem:[%s7151_s3 + $0x58] sm:$0xff] }
 0x3fd   :  { %v1264_v35 = vsel %vm1261_vm5, %v1263_v3, %v1259_v50  ;;  %v1219_v7 = vsel %vm1218_vm6, %v4166_v47, %v1215_v11  ;;  %3828 = vperm.xlu2 %4098, %v4037_v40   ;;  %v3995_v40 = vld [vmem:[%s7149_s1 + $0x158] sm:$0xff] }
 0x3fe   :  { %1839 = vmatpush.msrb.mxu2 %v1807_v4  ;;  %v1265_v61 = vmul.f32 %v1264_v35, %v1240_v14  ;;  %v1224_v51 = vsel %vm1221_vm10, %v1223_v8, %v1219_v7  ;;  %v1179_v13 = vsel %vm1178_vm9, %v4168_v42, %v1175_v33 }
 0x3ff   :  { %v1225_v56 = vmul.f32 %v1224_v51, %v1200_v38  ;;  %v1184_v58 = vsel %vm1181_vm11, %v1183_v27, %v1179_v13 }
 0x400   :  { %v3965_v15 = vclamps-f32 %v1265_v61, 1.0  ;;  %v1185_v26 = vmul.f32 %v1184_v58, %v1160_v44  ;;  %v7327_v58 = vld [vmem:[#allocation24_spill] sm:$0xff] }
 0x401   :  { %v3964_v53 = vclamps-f32 %v1225_v56, 1.0 }
 0x402   :  { %v1790_v34 = vadd.f32 1.0, %v3965_v15  ;;  %v3963_v43 = vclamps-f32 %v1185_v26, 1.0 }
 0x403   :  { %v1789_v48 = vadd.f32 1.0, %v3964_v53 }
 0x404   :  { %v1806_v30 = vmul.f32 %v1790_v34, %v1118_v0  ;;  %v1788_v1 = vadd.f32 1.0, %v3963_v43 }
 0x405   :  { %v1805_v20 = vmul.f32 %v1789_v48, %v1117_v41  ;;  %v7328_v48 = vld [vmem:[#allocation20_spill] sm:$0xff] }
 0x406   :  { %1840 = vmatpush.msrb.mxu2 %v1806_v30  ;;  %v1804_v18 = vmul.f32 %v1788_v1, %v1116_v60 }
 0x408   :  { %1841 = vmatpush.msrb.mxu2 %v1805_v20 }
 0x40a   :  { %1842 = vmatpush.msrb.mxu2 %v1804_v18 }
 0x40b   :  { %1843 = vmatmul.f32.vlgmr.msrb.gmra.mxu2 %v3979_v25 }
 0x40c   :  { %4089 = vmatpush.msk.msra.mxu2 %vm24_vm0, %v7325_v16 }
 0x48e   :  { %v1844_v52 = vpop.f32.mrf.mxu2 }
 0x48f   :  { %v1845_v54 = vadd.f32 %v1844_v52, %v1825_v32 }
 0x491   :  { %v1848_v47 = vmul.f32 0.70710677, %v1845_v54  ;;  %v1847_v51 = vmul.f32 0.5, %v1845_v54 }
 0x493   :  { %v1849_v12 = vmul.f32 %v1848_v47, %v1848_v47 }
 0x495   :  { %v1850_v44 = vmin.f32 %v1849_v12, 16.0 }
 0x497   :  { %v1851_v23 = vmul.f32 2.1237322e-06, %v1850_v44  ;;  %v1862_v38 = vmul.f32 3.8918573e-05, %v1850_v44 }
 0x499   :  { %v1852_v21 = vadd.f32 0.00028619796, %v1851_v23  ;;  %v1863_v2 = vadd.f32 0.001143296, %v1862_v38 }
 0x49b   :  { %v1853_v42 = vmul.f32 %v1852_v21, %v1850_v44  ;;  %v1864_v49 = vmul.f32 %v1863_v2, %v1850_v44 }
 0x49d   :  { %v1865_v14 = vadd.f32 0.014752088, %v1864_v49  ;;  %v1854_v28 = vadd.f32 0.0036580483, %v1853_v42 }
 0x49f   :  { %v1866_v39 = vmul.f32 %v1865_v14, %v1850_v44  ;;  %v1855_v36 = vmul.f32 %v1854_v28, %v1850_v44 }
 0x4a1   :  { %v1867_v19 = vadd.f32 0.112945676, %v1866_v39  ;;  %v1856_v29 = vadd.f32 0.05243302, %v1855_v36  ;;  %v3984_v39 = vld [vmem:[%s7149_s1 + $0x100] sm:$0xff]  ;;  %v3986_v36 = vld [vmem:[%s7149_s1 + $0x110] sm:$0xff] }
 0x4a3   :  { %v1868_v31 = vmul.f32 %v1867_v19, %v1850_v44  ;;  %v1857_v55 = vmul.f32 %v1856_v29, %v1850_v44  ;;  %v3985_v19 = vld [vmem:[%s7149_s1 + $0x108] sm:$0xff] }
 0x4a4   :  { %v3989_v29 = vld [vmem:[%s7149_s1 + $0x128] sm:$0xff] }
 0x4a5   :  { %v1869_v59 = vadd.f32 0.4994258, %v1868_v31  ;;  %v1858_v37 = vadd.f32 0.18741608, %v1857_v55  ;;  %v3987_v31 = vld [vmem:[%s7149_s1 + $0x118] sm:$0xff]  ;;  %v3993_v55 = vld [vmem:[%s7149_s1 + $0x148] sm:$0xff] }
 0x4a7   :  { %v1870_v24 = vmul.f32 %v1869_v59, %v1850_v44  ;;  %v1859_v46 = vmul.f32 %v1858_v37, %v1850_v44  ;;  %v1923_v44 = vpop.permute.xlu2 %1922  ;;  %v3988_v59 = vld [vmem:[%s7149_s1 + $0x120] sm:$0xff]  ;;  %v3994_v37 = vld [vmem:[%s7149_s1 + $0x150] sm:$0xff] }
 0x4a9   :  { %v1871_v17 = vadd.f32 1.0, %v1870_v24  ;;  %v1860_v4 = vadd.f32 1.1283791, %v1859_v46  ;;  %v3990_v24 = vld [vmem:[%s7149_s1 + $0x130] sm:$0xff]  ;;  %v3997_v46 = vld [vmem:[%s7149_s1 + $0x168] sm:$0xff] }
 0x4ab   :  { %4169 = vrcp.f32 %v1871_v17  ;;  %v1883_v45 = vand.u32 2147483648, %v1871_v17  ;;  %v1881_v11 = vand.u32 2147483647, %v1871_v17  ;;  %vm1877_vm14 = vweird.f32 %v1871_v17 }
 0x4ac   :  { %v1861_v33 = vmul.f32 %v1860_v4, %v1848_v47 }
 0x4ad   :  { %v1884_v8 = vor.u32 1.1754944e-38, %v1883_v45  ;;  %vm1882_vm4 = vcmp.eq.f32.partialorder %v1881_v11, 8.507059e+37 }
 0x4af   :  { %v1929_v14 = vpop.permute.xlu2 %1928 }
 0x4b1   :  { %v4170_v5 = vpop.eup %4169 }
 0x4b2   :  { %v1873_v10 = vmul.f32 %v4170_v5, %v1871_v17  ;;  %vm1878_vm12 = vweird.f32 %v4170_v5  ;;  %v3992_v17 = vld [vmem:[%s7149_s1 + $0x140] sm:$0xff] }
 0x4b3   :  { %vm1879_vm3 = vmor %vm1877_vm14, %vm1878_vm12 }
 0x4b4   :  { %v1874_v6 = vsub.f32 1.0, %v1873_v10  ;;  %v3998_v10 = vld [vmem:[%s7149_s1 + $0x170] sm:$0xff] }
 0x4b6   :  { %v1875_v3 = vmul.f32 %v4170_v5, %v1874_v6  ;;  %v3999_v6 = vld [vmem:[%s7149_s1 + $0x178] sm:$0xff] }
 0x4b8   :  { %v1876_v50 = vadd.f32 %v4170_v5, %v1875_v3 }
 0x4ba   :  { %v1880_v35 = vsel %vm1879_vm3, %v4170_v5, %v1876_v50  ;;  %v3996_v5 = vld [vmem:[%s7149_s1 + $0x160] sm:$0xff] }
 0x4bb   :  { %v1885_v7 = vsel %vm1882_vm4, %v1884_v8, %v1880_v35 }
 0x4bc   :  { %v1886_v27 = vmul.f32 %v1885_v7, %v1861_v33 }
 0x4be   :  { %v3980_v61 = vclamps-f32 %v1886_v27, 1.0 }
 0x4c0   :  { %v1889_v13 = vadd.f32 1.0, %v3980_v61 }
 0x4c2   :  { %v1890_v56 = vmul.f32 %v1889_v13, %v1847_v51 }
 0x4c4   :  { %v1891_v15 = vadd.f32 %v1890_v56, %v7327_v58 }
 0x4c6   :  { %v1892_v26 = vrot.slane %v1891_v15, 4 }
 0x4c8   :  { %v1893_v53 = vadd.f32 %v1892_v26, %v1891_v15 }
 0x4ca   :  { %v1894_v57 = vrot.slane %v1893_v53, 2 }
 0x4cc   :  { %v1895_v0 = vadd.f32 %v1894_v57, %v1893_v53 }
 0x4ce   :  { %v1896_v34 = vrot.slane %v1895_v0, 1 }
 0x4d0   :  { %v1897_v43 = vadd.f32 %v1896_v34, %v1895_v0 }
 0x4d2   :  { %v1898_v63 = vmul.f32 %v1897_v43, %v7328_v48 }
 0x4d4   :  { %v1899_v41 = vsub.f32 %v1891_v15, %v1898_v63 }
 0x4d6   :  { %v1900_v30 = vmul.f32 %v1899_v41, %v1899_v41 }
 0x4d8   :  { %v1901_v1 = vrot.slane %v1900_v30, 4 }
 0x4da   :  { %v1902_v9 = vadd.f32 %v1901_v1, %v1900_v30 }
 0x4dc   :  { %v1903_v60 = vrot.slane %v1902_v9, 2 }
 0x4de   :  { %v1904_v20 = vadd.f32 %v1903_v60, %v1902_v9 }
 0x4e0   :  { %v1905_v18 = vrot.slane %v1904_v20, 1 }
 0x4e2   :  { %v1906_v25 = vadd.f32 %v1905_v18, %v1904_v20 }
 0x4e4   :  { %v1907_v32 = vmul.f32 %v1906_v25, %v7328_v48 }
 0x4e6   :  { %v1908_v52 = vadd.f32 1e-05, %v1907_v32 }
 0x4e8   :  { %4171 = vrsqrt.f32 %v1908_v52  ;;  %vm1915_vm13 = vweird.f32 %v1908_v52 }
 0x4ee   :  { %v4172_v54 = vpop.eup %4171 }
 0x4ef   :  { %v1910_v47 = vmul.f32 %v4172_v54, %v1908_v52  ;;  %vm1916_vm7 = vweird.f32 %v4172_v54 }
 0x4f0   :  { %vm1917_vm15 = vmor %vm1915_vm13, %vm1916_vm7 }
 0x4f1   :  { %v1911_v12 = vmul.f32 %v4172_v54, %v1910_v47 }
 0x4f3   :  { %v1912_v23 = vmul.f32 0.5, %v1911_v12 }
 0x4f5   :  { %v1913_v38 = vsub.f32 1.5, %v1912_v23 }
 0x4f7   :  { %v1914_v21 = vmul.f32 %v4172_v54, %v1913_v38 }
 0x4f9   :  { %v1918_v2 = vsel %vm1917_vm15, %v4172_v54, %v1914_v21 }
 0x4fa   :  { %v1919_v42 = vmul.f32 %v1918_v2, %v1899_v41 }
 0x4fc   :  { %v1925_v49 = vmul.f32 %v1923_v44, %v1919_v42 }
 0x4fe   :  { %v5766_v28 = vadd.f32 %v1929_v14, %v1925_v49 }
 0x500   :  { %7329 = vst [vmem:[#allocation6_spill] sm:$0xff] %v5766_v28  ;;  %2016 = vmatpush.msrb.mxu1 %v5766_v28 }
 0x501   :  { %4001 = vmatmul.msk.f32.vlgmr.msrb.gmra.mxu1 %vm46_vm1, %v3984_v39 }
 0x509   :  { %4002 = vmatmul.msk.f32.gmra.mxu1 %vm46_vm1, %v3985_v19 }
 0x511   :  { %4003 = vmatmul.msk.f32.gmra.mxu1 %vm46_vm1, %v3986_v36 }
 0x519   :  { %4004 = vmatmul.msk.f32.gmra.mxu1 %vm46_vm1, %v3987_v31 }
 0x521   :  { %4005 = vmatmul.msk.f32.gmra.mxu1 %vm46_vm1, %v3988_v59 }
 0x529   :  { %4006 = vmatmul.msk.f32.gmra.mxu1 %vm46_vm1, %v3989_v29 }
 0x531   :  { %4007 = vmatmul.msk.f32.gmra.mxu1 %vm46_vm1, %v3990_v24 }
 0x539   :  { %4008 = vmatmul.msk.f32.gmra.mxu1 %vm46_vm1, %v3991_v22 }
 0x541   :  { %4009 = vmatmul.msk.f32.gmra.mxu1 %vm46_vm1, %v3992_v17 }
 0x549   :  { %4010 = vmatmul.msk.f32.gmra.mxu1 %vm46_vm1, %v3993_v55 }
 0x551   :  { %4011 = vmatmul.msk.f32.gmra.mxu1 %vm46_vm1, %v3994_v37 }
 0x559   :  { %4012 = vmatmul.msk.f32.gmra.mxu1 %vm46_vm1, %v3995_v40 }
 0x561   :  { %4013 = vmatmul.msk.f32.gmra.mxu1 %vm46_vm1, %v3996_v5 }
 0x569   :  { %4014 = vmatmul.msk.f32.gmra.mxu1 %vm46_vm1, %v3997_v46 }
 0x571   :  { %4015 = vmatmul.msk.f32.gmra.mxu1 %vm46_vm1, %v3998_v10 }
 0x579   :  { %4016 = vmatmul.msk.f32.gmra.mxu1 %vm46_vm1, %v3999_v6 }
 0x57e   :  { %v5833_v45 = vpop.f32.mrf.mxu1 }
 0x57f   :  { %7330 = vst [vmem:[#allocation17_spill] sm:$0xff] %v5833_v45  ;;  %v5858_v13 = vmul.f32 0.70710677, %v5833_v45 }
 0x581   :  { %7338 = vst [vmem:[#allocation14_spill] sm:$0xff] %v5858_v13  ;;  %v2098_v58 = vmul.f32 %v5858_v13, %v5858_v13 }
 0x583   :  { %v5878_v34 = vmin.f32 %v2098_v58, 16.0 }
 0x585   :  { %v2100_v18 = vmul.f32 2.1237322e-06, %v5878_v34 }
 0x586   :  { %v5835_v4 = vpop.f32.mrf.mxu1 }
 0x587   :  { %7331 = vst [vmem:[#allocation8_spill] sm:$0xff] %v5835_v4  ;;  %v5861_v56 = vmul.f32 0.70710677, %v5835_v4  ;;  %v2101_v2 = vadd.f32 0.00028619796, %v2100_v18 }
 0x589   :  { %7339 = vst [vmem:[#allocation9_spill] sm:$0xff] %v5861_v56  ;;  %v2138_v15 = vmul.f32 %v5861_v56, %v5861_v56  ;;  %v2102_v24 = vmul.f32 %v2101_v2, %v5878_v34 }
 0x58b   :  { %v5880_v43 = vmin.f32 %v2138_v15, 16.0 }
 0x58d   :  { %v2140_v25 = vmul.f32 2.1237322e-06, %v5880_v43 }
 0x58e   :  { %v5837_v3 = vpop.f32.mrf.mxu1 }
 0x58f   :  { %7332 = vst [vmem:[#allocation16_spill] sm:$0xff] %v5837_v3  ;;  %v5890_v1 = vmul.f32 0.70710677, %v5837_v3  ;;  %v2141_v42 = vadd.f32 0.00028619796, %v2140_v25 }
 0x591   :  { %7340 = vst [vmem:[#allocation18_spill] sm:$0xff] %v5890_v1  ;;  %v2178_v12 = vmul.f32 %v5890_v1, %v5890_v1  ;;  %v2142_v22 = vmul.f32 %v2141_v42, %v5880_v43 }
 0x593   :  { %v5925_v19 = vmin.f32 %v2178_v12, 16.0 }
 0x595   :  { %v2180_v5 = vmul.f32 2.1237322e-06, %v5925_v19 }
 0x596   :  { %v5839_v11 = vpop.f32.mrf.mxu1 }
 0x597   :  { %7333 = vst [vmem:[#allocation15_spill] sm:$0xff] %v5839_v11  ;;  %v5893_v9 = vmul.f32 0.70710677, %v5839_v11 }
 0x599   :  { %7341 = vst [vmem:[#allocation10_spill] sm:$0xff] %v5893_v9  ;;  %v2218_v44 = vmul.f32 %v5893_v9, %v5893_v9 }
 0x59b   :  { %v5927_v36 = vmin.f32 %v2218_v44, 16.0 }
 0x59d   :  { %v2220_v46 = vmul.f32 2.1237322e-06, %v5927_v36 }
 0x59e   :  { %v5841_v50 = vpop.f32.mrf.mxu1 }
 0x59f   :  { %7334 = vst [vmem:[#allocation12_spill] sm:$0xff] %v5841_v50  ;;  %v5870_v53 = vmul.f32 0.70710677, %v5841_v50  ;;  %v2221_v12 = vadd.f32 0.00028619796, %v2220_v46 }
 0x5a1   :  { %v2258_v63 = vmul.f32 %v5870_v53, %v5870_v53 }
 0x5a3   :  { %v5904_v52 = vmin.f32 %v2258_v63, 16.0  ;;  %v2103_v63 = vadd.f32 0.0036580483, %v2102_v24 }
 0x5a5   :  { %v2260_v49 = vmul.f32 2.1237322e-06, %v5904_v52 }
 0x5a6   :  { %v5843_v8 = vpop.f32.mrf.mxu1 }
 0x5a7   :  { %7335 = vst [vmem:[#allocation21_spill] sm:$0xff] %v5843_v8  ;;  %v5873_v57 = vmul.f32 0.70710677, %v5843_v8  ;;  %v2261_v55 = vadd.f32 0.00028619796, %v2260_v49 }
 0x5a9   :  { %v2298_v41 = vmul.f32 %v5873_v57, %v5873_v57 }
 0x5ab   :  { %v5906_v54 = vmin.f32 %v2298_v41, 16.0  ;;  %v2143_v41 = vadd.f32 0.0036580483, %v2142_v22 }
 0x5ad   :  { %v2300_v14 = vmul.f32 2.1237322e-06, %v5906_v54 }
 0x5ae   :  { %v5845_v33 = vpop.f32.mrf.mxu1 }
 0x5af   :  { %7336 = vst [vmem:[#allocation7_spill] sm:$0xff] %v5845_v33  ;;  %v5876_v0 = vmul.f32 0.70710677, %v5845_v33  ;;  %v2301_v37 = vadd.f32 0.00028619796, %v2300_v14  ;;  %v2104_v14 = vmul.f32 %v2103_v63, %v5878_v34 }
 0x5b1   :  { %v2338_v60 = vmul.f32 %v5876_v0, %v5876_v0  ;;  %v2302_v18 = vmul.f32 %v2301_v37, %v5906_v54 }
 0x5b3   :  { %v5914_v23 = vmin.f32 %v2338_v60, 16.0  ;;  %v2262_v60 = vmul.f32 %v2261_v55, %v5904_v52  ;;  %v2303_v22 = vadd.f32 0.0036580483, %v2302_v18  ;;  %v5974_v18 = vadd.f32 0.05243302, %v2104_v14 }
 0x5b5   :  { %v2340_v31 = vmul.f32 2.1237322e-06, %v5914_v23  ;;  %v2263_v24 = vadd.f32 0.0036580483, %v2262_v60  ;;  %7342 = vst [vmem:[#allocation11_spill] sm:$0xff] %v5974_v18  ;;  %v2304_v48 = vmul.f32 %v2303_v22, %v5906_v54 }
 0x5b6   :  { %v5847_v35 = vpop.f32.mrf.mxu1 }
 0x5b7   :  { %v5887_v30 = vmul.f32 0.70710677, %v5847_v35  ;;  %v2341_v10 = vadd.f32 0.00028619796, %v2340_v31  ;;  %v2144_v31 = vmul.f32 %v2143_v41, %v5880_v43 }
 0x5b9   :  { %v2378_v47 = vmul.f32 %v5887_v30, %v5887_v30 }
 0x5bb   :  { %v5923_v39 = vmin.f32 %v2378_v47, 16.0  ;;  %v2181_v47 = vadd.f32 0.00028619796, %v2180_v5  ;;  %v2222_v5 = vmul.f32 %v2221_v12, %v5927_v36  ;;  %v2264_v12 = vmul.f32 %v2263_v24, %v5904_v52 }
 0x5bd   :  { %v2380_v40 = vmul.f32 2.1237322e-06, %v5923_v39 }
 0x5be   :  { %v5849_v7 = vpop.f32.mrf.mxu1 }
 0x5bf   :  { %7337 = vst [vmem:[#allocation13_spill] sm:$0xff] %v5849_v7  ;;  %v5898_v20 = vmul.f32 0.70710677, %v5849_v7  ;;  %v2381_v25 = vadd.f32 0.00028619796, %v2380_v40  ;;  %v2182_v40 = vmul.f32 %v2181_v47, %v5925_v19 }
 0x5c1   :  { %v2418_v38 = vmul.f32 %v5898_v20, %v5898_v20  ;;  %v2382_v55 = vmul.f32 %v2381_v25, %v5923_v39  ;;  %v5976_v25 = vadd.f32 0.05243302, %v2144_v31  ;;  %v2183_v62 = vadd.f32 0.0036580483, %v2182_v40 }
 0x5c2   :  { %v2265_v40 = vadd.f32 0.05243302, %v2264_v12 }
 0x5c3   :  { %v5930_v59 = vmin.f32 %v2418_v38, 16.0  ;;  %v2342_v38 = vmul.f32 %v2341_v10, %v5914_v23  ;;  %7343 = vst [vmem:[#allocation19_spill] sm:$0xff] %v5976_v25  ;;  %v2383_v28 = vadd.f32 0.0036580483, %v2382_v55 }
 0x5c5   :  { %v2420_v6 = vmul.f32 2.1237322e-06, %v5930_v59 }
 0x5c6   :  { %v5851_v27 = vpop.f32.mrf.mxu1 }
 0x5c7   :  { %v5919_v21 = vmul.f32 0.70710677, %v5851_v27  ;;  %v2421_v2 = vadd.f32 0.00028619796, %v2420_v6  ;;  %v2343_v6 = vadd.f32 0.0036580483, %v2342_v38 }
 0x5c9   :  { %v2458_v29 = vmul.f32 %v5919_v21, %v5919_v21  ;;  %v2422_v63 = vmul.f32 %v2421_v2, %v5930_v59  ;;  %v2223_v2 = vadd.f32 0.0036580483, %v2222_v5  ;;  %v2344_v14 = vmul.f32 %v2343_v6, %v5914_v23 }
 0x5ca   :  { %v2305_v5 = vadd.f32 0.05243302, %v2304_v48 }
 0x5cb   :  { %v5942_v58 = vmin.f32 %v2458_v29, 16.0  ;;  %v2423_v31 = vadd.f32 0.0036580483, %v2422_v63  ;;  %v2224_v11 = vmul.f32 %v2223_v2, %v5927_v36 }
 0x5cd   :  { %v2460_v42 = vmul.f32 2.1237322e-06, %v5942_v58  ;;  %v2424_v3 = vmul.f32 %v2423_v31, %v5930_v59 }
 0x5ce   :  { %v5853_v61 = vpop.f32.mrf.mxu1 }
 0x5cf   :  { %v5945_v15 = vmul.f32 0.70710677, %v5853_v61  ;;  %v2461_v41 = vadd.f32 0.00028619796, %v2460_v42  ;;  %v2425_v8 = vadd.f32 0.05243302, %v2424_v3 }
 0x5d1   :  { %v2498_v49 = vmul.f32 %v5945_v15, %v5945_v15  ;;  %v2462_v16 = vmul.f32 %v2461_v41, %v5942_v58  ;;  %v2345_v41 = vadd.f32 0.05243302, %v2344_v14 }
 0x5d3   :  { %v5972_v60 = vmin.f32 %v2498_v49, 16.0  ;;  %v2463_v1 = vadd.f32 0.0036580483, %v2462_v16  ;;  %v2306_v16 = vmul.f32 %v2305_v5, %v5906_v54  ;;  %v2346_v50 = vmul.f32 %v2345_v41, %v5914_v23 }
 0x5d5   :  { %v2500_v45 = vmul.f32 2.1237322e-06, %v5972_v60  ;;  %v2347_v25 = vadd.f32 0.18741608, %v2346_v50 }
 0x5d6   :  { %v5855_v51 = vpop.f32.mrf.mxu1 }
 0x5d7   :  { %v5950_v44 = vmul.f32 0.70710677, %v5855_v51  ;;  %v2501_v56 = vadd.f32 0.00028619796, %v2500_v45 }
 0x5d9   :  { %v2538_v46 = vmul.f32 %v5950_v44, %v5950_v44 }
 0x5db   :  { %v5984_v42 = vmin.f32 %v2538_v46, 16.0  ;;  %v2384_v46 = vmul.f32 %v2383_v28, %v5923_v39 }
 0x5dd   :  { %v2540_v6 = vmul.f32 2.1237322e-06, %v5984_v42 }
 0x5de   :  { %v5867_v26 = vpop.f32.mrf.mxu1 }
 0x5df   :  { %v6002_v13 = vmul.f32 0.70710677, %v5867_v26  ;;  %v2541_v45 = vadd.f32 0.00028619796, %v2540_v6 }
 0x5e1   :  { %v2542_v3 = vmul.f32 %v2541_v45, %v5984_v42 }
 0x5e3   :  { %v2543_v50 = vadd.f32 0.0036580483, %v2542_v3 }
 0x5e6   :  { %v5902_v32 = vpop.f32.mrf.mxu1 }
 0x5e7   :  { %v5992_v24 = vmul.f32 0.70710677, %v5902_v32 }
 0x5e9   :  { %v2618_v12 = vmul.f32 %v5992_v24, %v5992_v24 }
 0x5ee   :  { %v5936_v17 = vpop.f32.mrf.mxu1 }
 0x5ef   :  { %v5962_v37 = vmul.f32 0.70710677, %v5936_v17 }
 0x5f1   :  { %v2658_v38 = vmul.f32 %v5962_v37, %v5962_v37 }
 0x5f6   :  { %v5958_v29 = vpop.f32.mrf.mxu1 }
 0x5f7   :  { %v5969_v10 = vmul.f32 0.70710677, %v5958_v29 }
 0x5f9   :  { %v2698_v47 = vmul.f32 %v5969_v10, %v5969_v10 }
 0x5fb   :  { %v5986_v49 = vmin.f32 %v2698_v47, 16.0  ;;  %v5997_v47 = vmin.f32 %v2658_v38, 16.0  ;;  %v2184_v38 = vmul.f32 %v2183_v62, %v5925_v19  ;;  %v2578_v62 = vmul.f32 %v6002_v13, %v6002_v13 }
 0x5fd   :  { %v2700_v22 = vmul.f32 2.1237322e-06, %v5986_v49  ;;  %v2711_v55 = vmul.f32 3.8918573e-05, %v5986_v49  ;;  %v2660_v14 = vmul.f32 2.1237322e-06, %v5997_v47 }
 0x5fe   :  { %v6021_v5 = vadd.f32 0.05243302, %v2184_v38  ;;  %v2671_v45 = vmul.f32 3.8918573e-05, %v5997_v47 }
 0x5ff   :  { %v2701_v63 = vadd.f32 0.00028619796, %v2700_v22  ;;  %v2712_v4 = vadd.f32 0.001143296, %v2711_v55  ;;  %v2266_v22 = vmul.f32 %v2265_v40, %v5904_v52  ;;  %v2385_v55 = vadd.f32 0.05243302, %v2384_v46 }
 0x600   :  { %v6018_v40 = vmin.f32 %v2618_v12, 16.0  ;;  %7344 = vst [vmem:[#allocation23_spill] sm:$0xff] %v6021_v5  ;;  %v2661_v2 = vadd.f32 0.00028619796, %v2660_v14  ;;  %v2426_v12 = vmul.f32 %v2425_v8, %v5930_v59 }
 0x601   :  { %v2702_v48 = vmul.f32 %v2701_v63, %v5986_v49  ;;  %v2713_v28 = vmul.f32 %v2712_v4, %v5986_v49  ;;  %v2464_v63 = vmul.f32 %v2463_v1, %v5942_v58  ;;  %v2502_v4 = vmul.f32 %v2501_v56, %v5972_v60 }
 0x602   :  { %v2267_v6 = vadd.f32 0.18741608, %v2266_v22  ;;  %v6026_v56 = vadd.f32 0.05243302, %v2224_v11  ;;  %v2620_v38 = vmul.f32 2.1237322e-06, %v6018_v40 }
 0x603   :  { %v2703_v31 = vadd.f32 0.0036580483, %v2702_v48  ;;  %v2714_v9 = vadd.f32 0.014752088, %v2713_v28  ;;  %v2386_v48 = vmul.f32 %v2385_v55, %v5923_v39  ;;  %v2307_v28 = vadd.f32 0.18741608, %v2306_v16 }
 0x604   :  { %7345 = vst [vmem:[#allocation22_spill] sm:$0xff] %v6026_v56  ;;  %v2465_v33 = vadd.f32 0.05243302, %v2464_v63  ;;  %v2503_v18 = vadd.f32 0.0036580483, %v2502_v4  ;;  %v2268_v55 = vmul.f32 %v2267_v6, %v5904_v52  ;;  %v2662_v16 = vmul.f32 %v2661_v2, %v5997_v47 }
 0x605   :  { %v2715_v46 = vmul.f32 %v2714_v9, %v5986_v49  ;;  %v2704_v1 = vmul.f32 %v2703_v31, %v5986_v49  ;;  %v6029_v9 = vmin.f32 %v2578_v62, 16.0  ;;  %v2387_v14 = vadd.f32 0.18741608, %v2386_v48 }
 0x606   :  { %v2308_v11 = vmul.f32 %v2307_v28, %v5906_v54  ;;  %v2348_v63 = vmul.f32 %v2347_v25, %v5914_v23  ;;  %v2427_v4 = vadd.f32 0.18741608, %v2426_v12  ;;  %v2466_v62 = vmul.f32 %v2465_v33, %v5942_v58 }
 0x607   :  { %v2716_v41 = vadd.f32 0.112945676, %v2715_v46  ;;  %v2705_v31 = vadd.f32 0.05243302, %v2704_v1  ;;  %v2672_v46 = vadd.f32 0.001143296, %v2671_v45  ;;  %v2388_v56 = vmul.f32 %v2387_v14, %v5923_v39 }
 0x608   :  { %v2580_v6 = vmul.f32 2.1237322e-06, %v6029_v9  ;;  %v2621_v48 = vadd.f32 0.00028619796, %v2620_v38  ;;  %v2269_v5 = vadd.f32 1.1283791, %v2268_v55  ;;  %v2544_v25 = vmul.f32 %v2543_v50, %v5984_v42 }
 0x609   :  { %v2717_v22 = vmul.f32 %v2716_v41, %v5986_v49  ;;  %v2504_v41 = vmul.f32 %v2503_v18, %v5972_v60  ;;  %v2663_v28 = vadd.f32 0.0036580483, %v2662_v16  ;;  %v2673_v3 = vmul.f32 %v2672_v46, %v5997_v47 }
 0x60a   :  { %v2309_v1 = vadd.f32 1.1283791, %v2308_v11  ;;  %v2706_v12 = vmul.f32 %v2705_v31, %v5986_v49  ;;  %v2428_v18 = vmul.f32 %v2427_v4, %v5930_v59  ;;  %v2467_v45 = vadd.f32 0.18741608, %v2466_v62 }
 0x60b   :  { %v2718_v8 = vadd.f32 0.4994258, %v2717_v22  ;;  %v2349_v22 = vadd.f32 1.1283791, %v2348_v63  ;;  %v2674_v38 = vadd.f32 0.014752088, %v2673_v3  ;;  %v2622_v55 = vmul.f32 %v2621_v48, %v6018_v40 }
 0x60c   :  { %v2505_v7 = vadd.f32 0.05243302, %v2504_v41  ;;  %v6052_v14 = vmul.f32 0.5, %v5847_v35  ;;  %v2389_v16 = vadd.f32 1.1283791, %v2388_v56  ;;  %v2664_v11 = vmul.f32 %v2663_v28, %v5997_v47 }
 0x60d   :  { %v2719_v2 = vmul.f32 %v2718_v8, %v5986_v49  ;;  %v2581_v8 = vadd.f32 0.00028619796, %v2580_v6  ;;  %v2675_v50 = vmul.f32 %v2674_v38, %v5997_v47  ;;  %v6057_v31 = vmul.f32 %v2269_v5, %v5870_v53 }
 0x60e   :  { %v6060_v63 = vmul.f32 %v2309_v1, %v5873_v57  ;;  %v2545_v4 = vadd.f32 0.05243302, %v2544_v25  ;;  %v2707_v62 = vadd.f32 0.18741608, %v2706_v12  ;;  %v2429_v46 = vadd.f32 1.1283791, %v2428_v18 }
 0x60f   :  { %v6046_v33 = vadd.f32 1.0, %v2719_v2  ;;  %v6063_v41 = vmul.f32 0.5, %v5851_v27  ;;  %v2468_v35 = vmul.f32 %v2467_v45, %v5942_v58  ;;  %v2676_v6 = vadd.f32 0.112945676, %v2675_v50 }
 0x610   :  { %v6067_v56 = vmul.f32 %v2349_v22, %v5876_v0  ;;  %v2506_v48 = vmul.f32 %v2505_v7, %v5972_v60  ;;  %v2582_v53 = vmul.f32 %v2581_v8, %v6029_v9  ;;  %v2623_v5 = vadd.f32 0.0036580483, %v2622_v55 }
 0x611   :  { %4173 = vrcp.f32 %v6046_v33  ;;  %v6072_v57 = vmul.f32 %v2389_v16, %v5887_v30  ;;  %v6075_v2 = vmul.f32 0.5, %v5853_v61  ;;  %v2665_v28 = vadd.f32 0.05243302, %v2664_v11 }
 0x612   :  { %v2677_v27 = vmul.f32 %v2676_v6, %v5997_v47  ;;  %v6079_v1 = vmul.f32 0.5, %v5855_v51  ;;  %v2546_v0 = vmul.f32 %v2545_v4, %v5984_v42  ;;  %v2708_v7 = vmul.f32 %v2707_v62, %v5986_v49 }
 0x613   :  { %v2631_v25 = vmul.f32 3.8918573e-05, %v6018_v40  ;;  %v6085_v12 = vmul.f32 %v2429_v46, %v5898_v20  ;;  %v2469_v30 = vadd.f32 1.1283791, %v2468_v35  ;;  %v2507_v18 = vadd.f32 0.18741608, %v2506_v48 }
 0x614   :  { %v2678_v22 = vadd.f32 0.4994258, %v2677_v27  ;;  %v2583_v45 = vadd.f32 0.0036580483, %v2582_v53  ;;  %v2624_v38 = vmul.f32 %v2623_v5, %v6018_v40  ;;  %v6090_v51 = vmul.f32 0.5, %v5867_v26 }
 0x615   :  { %v2632_v8 = vadd.f32 0.001143296, %v2631_v25  ;;  %v2666_v55 = vmul.f32 %v2665_v28, %v5997_v47  ;;  %v2547_v11 = vadd.f32 0.18741608, %v2546_v0  ;;  %v2709_v20 = vadd.f32 1.1283791, %v2708_v7 }
 0x616   :  { %v2679_v16 = vmul.f32 %v2678_v22, %v5997_v47  ;;  %v2732_v50 = vand.u32 2147483648, %v6046_v33  ;;  %v2730_v46 = vand.u32 2147483647, %v6046_v33  ;;  %v2508_v26 = vmul.f32 %v2507_v18, %v5972_v60 }
 0x617   :  { %v4174_v3 = vpop.eup %4173  ;;  %v2633_v4 = vmul.f32 %v2632_v8, %v6018_v40  ;;  %v2584_v6 = vmul.f32 %v2583_v45, %v6029_v9  ;;  %v2625_v48 = vadd.f32 0.05243302, %v2624_v38  ;;  %v2667_v5 = vadd.f32 0.18741608, %v2666_v55 }
 0x618   :  { %v2722_v61 = vmul.f32 %v4174_v3, %v6046_v33  ;;  %vm2727_vm2 = vweird.f32 %v4174_v3  ;;  %v6097_v35 = vadd.f32 1.0, %v2679_v16  ;;  %vm2726_vm5 = vweird.f32 %v6046_v33 }
 0x619   :  { %v2634_v53 = vadd.f32 0.014752088, %v2633_v4  ;;  %v2548_v27 = vmul.f32 %v2547_v11, %v5984_v42  ;;  %vm2728_vm6 = vmor %vm2726_vm5, %vm2727_vm2  ;;  %v2733_v0 = vor.u32 1.1754944e-38, %v2732_v50  ;;  %v2271_v25 = vmul.f32 3.8918573e-05, %v5904_v52 }
 0x61a   :  { %v2723_v49 = vsub.f32 1.0, %v2722_v61  ;;  %4175 = vrcp.f32 %v6097_v35  ;;  %v6107_v61 = vmul.f32 %v2469_v30, %v5919_v21  ;;  %v2710_v22 = vmul.f32 %v2709_v20, %v5969_v10 }
 0x61b   :  { %v2635_v7 = vmul.f32 %v2634_v53, %v6018_v40  ;;  %vm2731_vm8 = vcmp.eq.f32.partialorder %v2730_v46, 8.507059e+37  ;;  %v2626_v45 = vmul.f32 %v2625_v48, %v6018_v40  ;;  %v2272_v8 = vadd.f32 0.001143296, %v2271_v25 }
 0x61c   :  { %v2724_v62 = vmul.f32 %v4174_v3, %v2723_v49  ;;  %v2509_v55 = vadd.f32 1.1283791, %v2508_v26  ;;  %v2668_v49 = vmul.f32 %v2667_v5, %v5997_v47  ;;  %v2311_v11 = vmul.f32 3.8918573e-05, %v5906_v54 }
 0x61d   :  { %v2636_v38 = vadd.f32 0.112945676, %v2635_v7  ;;  %v2549_v50 = vadd.f32 1.1283791, %v2548_v27  ;;  %v2585_v4 = vadd.f32 0.05243302, %v2584_v6  ;;  %v2273_v30 = vmul.f32 %v2272_v8, %v5904_v52 }
 0x61e   :  { %v2725_v28 = vadd.f32 %v4174_v3, %v2724_v62  ;;  %v2591_v62 = vmul.f32 3.8918573e-05, %v6029_v9  ;;  %v2312_v46 = vadd.f32 0.001143296, %v2311_v11  ;;  %v2627_v48 = vadd.f32 0.18741608, %v2626_v45 }
 0x61f   :  { %v2637_v21 = vmul.f32 %v2636_v38, %v6018_v40  ;;  %v2274_v53 = vadd.f32 0.014752088, %v2273_v30  ;;  %v2669_v5 = vadd.f32 1.1283791, %v2668_v49  ;;  %v2690_v7 = vand.u32 2147483647, %v6097_v35 }
 0x620   :  { %v2729_v18 = vsel %vm2728_vm6, %v4174_v3, %v2725_v28  ;;  %v4176_v10 = vpop.eup %4175  ;;  %v2081_v3 = vmul.f32 0.5, %v5958_v29  ;;  %v2592_v27 = vadd.f32 0.001143296, %v2591_v62  ;;  %v2313_v6 = vmul.f32 %v2312_v46, %v5906_v54 }
 0x621   :  { %v2734_v33 = vsel %vm2731_vm8, %v2733_v0, %v2729_v18  ;;  %v2682_v26 = vmul.f32 %v4176_v10, %v6097_v35  ;;  %v2638_v47 = vadd.f32 0.4994258, %v2637_v21  ;;  %v2275_v29 = vmul.f32 %v2274_v53, %v5904_v52 }
 0x622   :  { %v2735_v16 = vmul.f32 %v2734_v33, %v2710_v22  ;;  %v2692_v18 = vand.u32 2147483648, %v6097_v35  ;;  %v2593_v45 = vmul.f32 %v2592_v27, %v6029_v9  ;;  %v2314_v33 = vadd.f32 0.014752088, %v2313_v6 }
 0x623   :  { %v2683_v0 = vsub.f32 1.0, %v2682_v26  ;;  %v2639_v25 = vmul.f32 %v2638_v47, %v6018_v40  ;;  %vm2687_vm10 = vweird.f32 %v4176_v10  ;;  %v2276_v49 = vadd.f32 0.112945676, %v2275_v29 }
 0x624   :  { %v4032_v20 = vclamps-f32 %v2735_v16, 1.0  ;;  %v2586_v16 = vmul.f32 %v2585_v4, %v6029_v9  ;;  %v2594_v11 = vadd.f32 0.014752088, %v2593_v45  ;;  %v2351_v21 = vmul.f32 3.8918573e-05, %v5914_v23 }
 0x625   :  { %v2684_v38 = vmul.f32 %v4176_v10, %v2683_v0  ;;  %v6124_v8 = vadd.f32 1.0, %v2639_v25  ;;  %v2315_v30 = vmul.f32 %v2314_v33, %v5906_v54  ;;  %vm2686_vm9 = vweird.f32 %v6097_v35 }
 0x626   :  { %v2753_v28 = vadd.f32 1.0, %v4032_v20  ;;  %vm2688_vm11 = vmor %vm2686_vm9, %vm2687_vm10  ;;  %v2693_v62 = vor.u32 1.1754944e-38, %v2692_v18  ;;  %v2595_v46 = vmul.f32 %v2594_v11, %v6029_v9  ;;  %v2352_v26 = vadd.f32 0.001143296, %v2351_v21 }
 0x627   :  { %v2685_v20 = vadd.f32 %v4176_v10, %v2684_v38  ;;  %4177 = vrcp.f32 %v6124_v8  ;;  %v2316_v47 = vadd.f32 0.112945676, %v2315_v30  ;;  %v2670_v4 = vmul.f32 %v2669_v5, %v5962_v37 }
 0x628   :  { %v2769_v22 = vmul.f32 %v2753_v28, %v2081_v3  ;;  %v2628_v3 = vmul.f32 %v2627_v48, %v6018_v40  ;;  %vm2691_vm12 = vcmp.eq.f32.partialorder %v2690_v7, 8.507059e+37  ;;  %v2277_v28 = vmul.f32 %v2276_v49, %v5904_v52 }
 0x629   :  { %v2689_v53 = vsel %vm2688_vm11, %v4176_v10, %v2685_v20  ;;  %v6136_v27 = vmul.f32 0.5, %v5902_v32  ;;  %v2596_v48 = vadd.f32 0.112945676, %v2595_v46  ;;  %v2353_v35 = vmul.f32 %v2352_v26, %v5914_v23 }
 0x62a   :  { %2777 = vmatpush.msra.mxu3 %v2769_v22  ;;  %v2694_v40 = vsel %vm2691_vm12, %v2693_v62, %v2689_v53  ;;  %v6140_v6 = vmul.f32 %v2509_v55, %v5945_v15  ;;  %v2587_v0 = vadd.f32 0.18741608, %v2586_v16  ;;  %v2080_v25 = vmul.f32 0.5, %v5936_v17 }
 0x62b   :  { %v2695_v29 = vmul.f32 %v2694_v40, %v2670_v4  ;;  %v2629_v22 = vadd.f32 1.1283791, %v2628_v3  ;;  %v2597_v37 = vmul.f32 %v2596_v48, %v6029_v9  ;;  %v2354_v10 = vadd.f32 0.014752088, %v2353_v35 }
 0x62c   :  { %v2317_v5 = vmul.f32 %v2316_v47, %v5906_v54  ;;  %v6146_v32 = vmul.f32 %v2549_v50, %v5950_v44  ;;  %v2551_v45 = vmul.f32 3.8918573e-05, %v5984_v42  ;;  %v2278_v33 = vadd.f32 0.4994258, %v2277_v28 }
 0x62d   :  { %v4178_v7 = vpop.eup %4177  ;;  %v4031_v18 = vclamps-f32 %v2695_v29, 1.0  ;;  %v2650_v55 = vand.u32 2147483647, %v6124_v8  ;;  %v2598_v17 = vadd.f32 0.4994258, %v2597_v37  ;;  %v2652_v16 = vand.u32 2147483648, %v6124_v8 }
 0x62e   :  { %v2642_v15 = vmul.f32 %v4178_v7, %v6124_v8  ;;  %v2391_v38 = vmul.f32 3.8918573e-05, %v5923_v39  ;;  %v2552_v11 = vadd.f32 0.001143296, %v2551_v45  ;;  %v2355_v21 = vmul.f32 %v2354_v10, %v5914_v23 }
 0x62f   :  { %v2752_v49 = vadd.f32 1.0, %v4031_v18  ;;  %v2599_v44 = vmul.f32 %v2598_v17, %v6029_v9  ;;  %v2318_v3 = vadd.f32 0.4994258, %v2317_v5  ;;  %v2279_v26 = vmul.f32 %v2278_v33, %v5904_v52 }
 0x630   :  { %v2643_v30 = vsub.f32 1.0, %v2642_v15  ;;  %v2392_v50 = vadd.f32 0.001143296, %v2391_v38  ;;  %v2553_v62 = vmul.f32 %v2552_v11, %v5984_v42  ;;  %v2356_v46 = vadd.f32 0.112945676, %v2355_v21 }
 0x631   :  { %v2768_v20 = vmul.f32 %v2752_v49, %v2080_v25  ;;  %vm2647_vm14 = vweird.f32 %v4178_v7  ;;  %v6157_v4 = vadd.f32 1.0, %v2599_v44  ;;  %v2588_v28 = vmul.f32 %v2587_v0, %v6029_v9 }
 0x632   :  { %v2644_v47 = vmul.f32 %v4178_v7, %v2643_v30  ;;  %v2393_v53 = vmul.f32 %v2392_v50, %v5923_v39  ;;  %vm2646_vm3 = vweird.f32 %v6124_v8  ;;  %v2554_v40 = vadd.f32 0.014752088, %v2553_v62 }
 0x633   :  { %2778 = vmatpush.msra.mxu3 %v2768_v20  ;;  %v2357_v48 = vmul.f32 %v2356_v46, %v5914_v23  ;;  %v2653_v25 = vor.u32 1.1754944e-38, %v2652_v16  ;;  %4179 = vrcp.f32 %v6157_v4  ;;  %v2319_v52 = vmul.f32 %v2318_v3, %v5906_v54  ;;  %vm2648_vm4 = vmor %vm2646_vm3, %vm2647_vm14 }
 0x634   :  { %v2645_v35 = vadd.f32 %v4178_v7, %v2644_v47  ;;  %v2555_v29 = vmul.f32 %v2554_v40, %v5984_v42  ;;  %v2394_v37 = vadd.f32 0.014752088, %v2393_v53  ;;  %v6166_v5 = vadd.f32 1.0, %v2279_v26 }
 0x635   :  { %v2358_v10 = vadd.f32 0.4994258, %v2357_v48  ;;  %v2630_v9 = vmul.f32 %v2629_v22, %v5992_v24  ;;  %vm2651_vm7 = vcmp.eq.f32.partialorder %v2650_v55, 8.507059e+37  ;;  %v2431_v8 = vmul.f32 3.8918573e-05, %v5930_v59 }
 0x636   :  { %v2649_v0 = vsel %vm2648_vm4, %v4178_v7, %v2645_v35  ;;  %v2589_v18 = vadd.f32 1.1283791, %v2588_v28  ;;  %v2556_v33 = vadd.f32 0.112945676, %v2555_v29  ;;  %v2395_v15 = vmul.f32 %v2394_v37, %v5923_v39 }
 0x637   :  { %v2654_v45 = vsel %vm2651_vm7, %v2653_v25, %v2649_v0  ;;  %v2432_v54 = vadd.f32 0.001143296, %v2431_v8  ;;  %v2359_v38 = vmul.f32 %v2358_v10, %v5914_v23  ;;  %v2231_v49 = vmul.f32 3.8918573e-05, %v5927_v36 }
 0x638   :  { %v2655_v17 = vmul.f32 %v2654_v45, %v2630_v9  ;;  %v2557_v16 = vmul.f32 %v2556_v33, %v5984_v42  ;;  %v2396_v11 = vadd.f32 0.112945676, %v2395_v15  ;;  %v6174_v21 = vadd.f32 1.0, %v2319_v52 }
 0x639   :  { %4181 = vrcp.f32 %v6166_v5  ;;  %v4180_v24 = vpop.eup %4179  ;;  %v2511_v7 = vmul.f32 3.8918573e-05, %v5972_v60  ;;  %v2433_v55 = vmul.f32 %v2432_v54, %v5930_v59  ;;  %v6179_v30 = vadd.f32 1.0, %v2359_v38 }
 0x63a   :  { %v4030_v22 = vclamps-f32 %v2655_v17, 1.0  ;;  %v2602_v44 = vmul.f32 %v4180_v24, %v6157_v4  ;;  %v2610_v23 = vand.u32 2147483647, %v6157_v4  ;;  %v2558_v50 = vadd.f32 0.4994258, %v2557_v16 }
 0x63b   :  { %v2397_v3 = vmul.f32 %v2396_v11, %v5923_v39  ;;  %v2512_v62 = vadd.f32 0.001143296, %v2511_v7  ;;  %v2434_v46 = vadd.f32 0.014752088, %v2433_v55  ;;  %4183 = vrcp.f32 %v6179_v30 }
 0x63c   :  { %v2751_v20 = vadd.f32 1.0, %v4030_v22  ;;  %v2603_v26 = vsub.f32 1.0, %v2602_v44  ;;  %v2612_v47 = vand.u32 2147483648, %v6157_v4  ;;  %v2559_v53 = vmul.f32 %v2558_v50, %v5984_v42 }
 0x63d   :  { %v2398_v28 = vadd.f32 0.4994258, %v2397_v3  ;;  %v2513_v48 = vmul.f32 %v2512_v62, %v5972_v60  ;;  %v2471_v35 = vmul.f32 3.8918573e-05, %v5942_v58  ;;  %v2435_v25 = vmul.f32 %v2434_v46, %v5930_v59 }
 0x63e   :  { %v2767_v40 = vmul.f32 %v2751_v20, %v6136_v27  ;;  %v2604_v29 = vmul.f32 %v4180_v24, %v2603_v26  ;;  %vm2607_vm13 = vweird.f32 %v4180_v24  ;;  %v6193_v37 = vadd.f32 1.0, %v2559_v53 }
 0x63f   :  { %v6191_v52 = vpop.eup %4181  ;;  %v2399_v10 = vmul.f32 %v2398_v28, %v5923_v39  ;;  %v2514_v9 = vadd.f32 0.014752088, %v2513_v48  ;;  %v2472_v42 = vadd.f32 0.001143296, %v2471_v35  ;;  %v2436_v0 = vadd.f32 0.112945676, %v2435_v25 }
 0x640   :  { %2779 = vmatpush.msra.mxu3 %v2767_v40  ;;  %4185 = vrcp.f32 %v6174_v21  ;;  %v2605_v27 = vadd.f32 %v4180_v24, %v2604_v29  ;;  %vm2606_vm15 = vweird.f32 %v6157_v4  ;;  %v2232_v8 = vadd.f32 0.001143296, %v2231_v49 }
 0x641   :  { %4187 = vrcp.f32 %v6193_v37  ;;  %v6199_v45 = vpop.eup %4183  ;;  %vm2608_vm2 = vmor %vm2606_vm15, %vm2607_vm13  ;;  %v2613_v33 = vor.u32 1.1754944e-38, %v2612_v47  ;;  %v2515_v15 = vmul.f32 %v2514_v9, %v5972_v60  ;;  %v2473_v39 = vmul.f32 %v2472_v42, %v5942_v58 }
 0x642   :  { %v2437_v17 = vmul.f32 %v2436_v0, %v5930_v59  ;;  %v2590_v54 = vmul.f32 %v2589_v18, %v6002_v13  ;;  %v2609_v38 = vsel %vm2608_vm2, %v4180_v24, %v2605_v27  ;;  %vm2611_vm5 = vcmp.eq.f32.partialorder %v2610_v23, 8.507059e+37 }
 0x643   :  { %v6205_v16 = vadd.f32 1.0, %v2399_v10  ;;  %v2614_v4 = vsel %vm2611_vm5, %v2613_v33, %v2609_v38  ;;  %v2516_v11 = vadd.f32 0.112945676, %v2515_v15  ;;  %v2474_v22 = vadd.f32 0.014752088, %v2473_v39 }
 0x644   :  { %v2362_v49 = vmul.f32 %v6199_v45, %v6179_v30  ;;  %v2615_v7 = vmul.f32 %v2614_v4, %v2590_v54  ;;  %v2438_v55 = vadd.f32 0.4994258, %v2437_v17  ;;  %v6211_v44 = vmul.f32 %v2232_v8, %v5927_v36 }
 0x645   :  { %4189 = vrcp.f32 %v6205_v16  ;;  %v2517_v13 = vmul.f32 %v2516_v11, %v5972_v60  ;;  %v2475_v18 = vmul.f32 %v2474_v22, %v5942_v58  ;;  %v2330_v24 = vand.u32 2147483647, %v6174_v21 }
 0x646   :  { %v6213_v50 = vpop.eup %4185  ;;  %v2332_v23 = vand.u32 2147483648, %v6174_v21  ;;  %v4029_v20 = vclamps-f32 %v2615_v7, 1.0  ;;  %v2439_v62 = vmul.f32 %v2438_v55, %v5930_v59  ;;  %v2370_v46 = vand.u32 2147483647, %v6179_v30 }
 0x647   :  { %v4188_v3 = vpop.eup %4187  ;;  %v6223_v26 = vmul.f32 %v6191_v52, %v6166_v5  ;;  %v2518_v53 = vadd.f32 0.4994258, %v2517_v13  ;;  %v2476_v28 = vadd.f32 0.112945676, %v2475_v18  ;;  %v2363_v40 = vsub.f32 1.0, %v2362_v49 }
 0x648   :  { %v2562_v47 = vmul.f32 %v4188_v3, %v6193_v37  ;;  %v2750_v48 = vadd.f32 1.0, %v4029_v20  ;;  %v2570_v35 = vand.u32 2147483647, %v6193_v37  ;;  %v6227_v25 = vadd.f32 1.0, %v2439_v62 }
 0x649   :  { %v6231_v29 = vmul.f32 %v6213_v50, %v6174_v21  ;;  %v2572_v10 = vand.u32 2147483648, %v6193_v37  ;;  %v2519_v9 = vmul.f32 %v2518_v53, %v5972_v60  ;;  %v2477_v42 = vmul.f32 %v2476_v28, %v5942_v58 }
 0x64a   :  { %v2563_v59 = vsub.f32 1.0, %v2562_v47  ;;  %v2766_v27 = vmul.f32 %v2750_v48, %v6090_v51  ;;  %vm2567_vm6 = vweird.f32 %v4188_v3  ;;  %4191 = vrcp.f32 %v6227_v25 }
 0x64b   :  { %v6236_v0 = vpop.eup %4189  ;;  %v2412_v8 = vand.u32 2147483648, %v6205_v16  ;;  %vm2366_vm8 = vweird.f32 %v6179_v30  ;;  %v6242_v15 = vadd.f32 1.0, %v2519_v9  ;;  %v2478_v39 = vadd.f32 0.4994258, %v2477_v42 }
 0x64c   :  { %v2564_v33 = vmul.f32 %v4188_v3, %v2563_v59  ;;  %v2364_v17 = vmul.f32 %v6199_v45, %v2363_v40  ;;  %2780 = vmatpush.msra.mxu3 %v2766_v27  ;;  %vm2566_vm10 = vweird.f32 %v6193_v37  ;;  %vm6246_vm9 = vcmp.eq.f32.partialorder %v2570_v35, 8.507059e+37 }
 0x64d   :  { %v2402_v51 = vmul.f32 %v6236_v0, %v6205_v16  ;;  %v2410_v54 = vand.u32 2147483647, %v6205_v16  ;;  %v2573_v4 = vor.u32 1.1754944e-38, %v2572_v10  ;;  %4193 = vrcp.f32 %v6242_v15  ;;  %vm2568_vm11 = vmor %vm2566_vm10, %vm2567_vm6 }
 0x64e   :  { %v2565_v38 = vadd.f32 %v4188_v3, %v2564_v33  ;;  %v2450_v11 = vand.u32 2147483647, %v6227_v25  ;;  %v2479_v22 = vmul.f32 %v2478_v39, %v5942_v58  ;;  %vm2406_vm12 = vweird.f32 %v6205_v16 }
 0x64f   :  { %v2403_v37 = vsub.f32 1.0, %v2402_v51  ;;  %vm2367_vm14 = vweird.f32 %v6199_v45  ;;  %v2452_v7 = vand.u32 2147483648, %v6227_v25  ;;  %v2413_v55 = vor.u32 1.1754944e-38, %v2412_v8 }
 0x650   :  { %v2569_v49 = vsel %vm2568_vm11, %v4188_v3, %v2565_v38  ;;  %v2365_v13 = vadd.f32 %v6199_v45, %v2364_v17  ;;  %v4192_v18 = vpop.eup %4191  ;;  %v2530_v62 = vand.u32 2147483647, %v6242_v15  ;;  %v6264_v47 = vadd.f32 1.0, %v2479_v22  ;;  %vm6287_vm2 = vmor %vm2366_vm8, %vm2367_vm14 }
 0x651   :  { %v2574_v20 = vsel %vm6246_vm9, %v2573_v4, %v2569_v49  ;;  %v2404_v58 = vmul.f32 %v6236_v0, %v2403_v37  ;;  %vm6267_vm3 = vcmp.eq.f32.partialorder %v2410_v54, 8.507059e+37  ;;  %v2442_v28 = vmul.f32 %v4192_v18, %v6227_v25 }
 0x652   :  { %v2575_v3 = vmul.f32 %v2574_v20, %v6146_v32  ;;  %vm2446_vm4 = vweird.f32 %v6227_v25  ;;  %vm6274_vm7 = vcmp.eq.f32.partialorder %v2450_v11, 8.507059e+37  ;;  %vm2526_vm13 = vweird.f32 %v6242_v15 }
 0x653   :  { %v2532_v48 = vand.u32 2147483648, %v6242_v15  ;;  %4195 = vrcp.f32 %v6264_v47  ;;  %vm2407_vm15 = vweird.f32 %v6236_v0  ;;  %v4194_v35 = vpop.eup %4193  ;;  %v2443_v10 = vsub.f32 1.0, %v2442_v28 }
 0x654   :  { %v4028_v59 = vclamps-f32 %v2575_v3, 1.0  ;;  %v2405_v32 = vadd.f32 %v6236_v0, %v2404_v58  ;;  %v2372_v42 = vand.u32 2147483648, %v6179_v30  ;;  %v2522_v27 = vmul.f32 %v4194_v35, %v6242_v15  ;;  %vm6305_vm10 = vmor %vm2406_vm12, %vm2407_vm15 }
 0x655   :  { %vm6293_vm5 = vcmp.eq.f32.partialorder %v2530_v62, 8.507059e+37  ;;  %v2453_v33 = vor.u32 1.1754944e-38, %v2452_v7  ;;  %v2369_v39 = vsel %vm6287_vm2, %v6199_v45, %v2365_v13  ;;  %vm2326_vm6 = vweird.f32 %v6174_v21 }
 0x656   :  { %v2749_v17 = vadd.f32 1.0, %v4028_v59  ;;  %v2444_v60 = vmul.f32 %v4192_v18, %v2443_v10  ;;  %vm2447_vm8 = vweird.f32 %v4192_v18  ;;  %vm6311_vm9 = vcmp.eq.f32.partialorder %v2370_v46, 8.507059e+37 }
 0x657   :  { %v2523_v45 = vsub.f32 1.0, %v2522_v27  ;;  %v2533_v38 = vor.u32 1.1754944e-38, %v2532_v48  ;;  %v2409_v4 = vsel %vm6305_vm10, %v6236_v0, %v2405_v32  ;;  %v2323_v11 = vsub.f32 1.0, %v6231_v29  ;;  %vm2448_vm12 = vmor %vm2446_vm4, %vm2447_vm8 }
 0x658   :  { %v2765_v16 = vmul.f32 %v2749_v17, %v6079_v1  ;;  %v2490_v22 = vand.u32 2147483647, %v6264_v47  ;;  %v2445_v37 = vadd.f32 %v4192_v18, %v2444_v60  ;;  %v2373_v49 = vor.u32 1.1754944e-38, %v2372_v42 }
 0x659   :  { %v4196_v7 = vpop.eup %4195  ;;  %v2524_v30 = vmul.f32 %v4194_v35, %v2523_v45  ;;  %vm2527_vm11 = vweird.f32 %v4194_v35  ;;  %v2492_v46 = vand.u32 2147483648, %v6264_v47  ;;  %v2324_v13 = vmul.f32 %v6213_v50, %v2323_v11 }
 0x65a   :  { %vm6328_vm14 = vcmp.eq.f32.partialorder %v2330_v24, 8.507059e+37  ;;  %2781 = vmatpush.msra.mxu3 %v2765_v16  ;;  %v2482_v1 = vmul.f32 %v4196_v7, %v6264_v47  ;;  %v2449_v0 = vsel %vm2448_vm12, %v4192_v18, %v2445_v37  ;;  %v2414_v20 = vsel %vm6267_vm3, %v2413_v55, %v2409_v4  ;;  %vm2528_vm15 = vmor %vm2526_vm13, %vm2527_vm11 }
 0x65b   :  { %v2374_v62 = vsel %vm6311_vm9, %v2373_v49, %v2369_v39  ;;  %v2525_v25 = vadd.f32 %v4194_v35, %v2524_v30  ;;  %v2454_v58 = vsel %vm6274_vm7, %v2453_v33, %v2449_v0  ;;  %v2325_v3 = vadd.f32 %v6213_v50, %v2324_v13  ;;  %v7366_v13 = vld [vmem:[#allocation13_spill] sm:$0xff] }
 0x65c   :  { %vm2327_vm4 = vweird.f32 %v6213_v50  ;;  %v2483_v24 = vsub.f32 1.0, %v2482_v1  ;;  %vm2486_vm2 = vweird.f32 %v6264_v47  ;;  %vm6344_vm8 = vcmp.eq.f32.partialorder %v2490_v22, 8.507059e+37 }
 0x65d   :  { %v2283_v55 = vsub.f32 1.0, %v6223_v26  ;;  %v2529_v53 = vsel %vm2528_vm15, %v4194_v35, %v2525_v25  ;;  %v2493_v28 = vor.u32 1.1754944e-38, %v2492_v46  ;;  %v2415_v40 = vmul.f32 %v2414_v20, %v6072_v57  ;;  %vm6356_vm7 = vmor %vm2326_vm6, %vm2327_vm4 }
 0x65e   :  { %v2375_v48 = vmul.f32 %v2374_v62, %v6067_v56  ;;  %v2534_v59 = vsel %vm6293_vm5, %v2533_v38, %v2529_v53  ;;  %v2484_v15 = vmul.f32 %v4196_v7, %v2483_v24  ;;  %vm2487_vm3 = vweird.f32 %v4196_v7 }
 0x65f   :  { %v2455_v10 = vmul.f32 %v2454_v58, %v6085_v12  ;;  %v2535_v26 = vmul.f32 %v2534_v59, %v6140_v6  ;;  %v2329_v57 = vsel %vm6356_vm7, %v6213_v50, %v2325_v3  ;;  %v2284_v56 = vmul.f32 %v6191_v52, %v2283_v55  ;;  %vm2488_vm6 = vmor %vm2486_vm2, %vm2487_vm3  ;;  %v7367_v3 = vld [vmem:[#allocation11_spill] sm:$0xff]  ;;  %v7368_v59 = vld [vmem:[#allocation22_spill] sm:$0xff] }
 0x660   :  { %vm2287_vm13 = vweird.f32 %v6191_v52  ;;  %v2485_v35 = vadd.f32 %v4196_v7, %v2484_v15  ;;  %v2333_v12 = vor.u32 1.1754944e-38, %v2332_v23  ;;  %vm2286_vm5 = vweird.f32 %v6166_v5 }
 0x661   :  { %v2290_v9 = vand.u32 2147483647, %v6166_v5  ;;  %v4027_v42 = vclamps-f32 %v2535_v26, 1.0  ;;  %v2285_v6 = vadd.f32 %v6191_v52, %v2284_v56  ;;  %v2292_v50 = vand.u32 2147483648, %v6166_v5  ;;  %vm2288_vm10 = vmor %vm2286_vm5, %vm2287_vm13  ;;  %v7369_v26 = vld [vmem:[#allocation7_spill] sm:$0xff] }
 0x662   :  { %v2234_v27 = vadd.f32 0.014752088, %v6211_v44  ;;  %v2489_v8 = vsel %vm2488_vm6, %v4196_v7, %v2485_v35  ;;  %v4025_v33 = vclamps-f32 %v2455_v10, 1.0  ;;  %v4023_v39 = vclamps-f32 %v2375_v48, 1.0 }
 0x663   :  { %v2334_v21 = vsel %vm6328_vm14, %v2333_v12, %v2329_v57  ;;  %v2748_v23 = vadd.f32 1.0, %v4027_v42  ;;  %v2494_v17 = vsel %vm6344_vm8, %v2493_v28, %v2489_v8  ;;  %v2289_v47 = vsel %vm2288_vm10, %v6191_v52, %v2285_v6  ;;  %v7371_v8 = vld [vmem:[#allocation21_spill] sm:$0xff] }
 0x664   :  { %v2293_v60 = vor.u32 1.1754944e-38, %v2292_v50  ;;  %v2495_v51 = vmul.f32 %v2494_v17, %v6107_v61  ;;  %vm2291_vm9 = vcmp.eq.f32.partialorder %v2290_v9, 8.507059e+37  ;;  %v2235_v5 = vmul.f32 %v2234_v27, %v5927_v36  ;;  %v7370_v9 = vld [vmem:[#allocation19_spill] sm:$0xff] }
 0x665   :  { %v2191_v44 = vmul.f32 3.8918573e-05, %v5925_v19  ;;  %v2764_v54 = vmul.f32 %v2748_v23, %v6075_v2  ;;  %v2151_v38 = vmul.f32 3.8918573e-05, %v5880_v43  ;;  %v2111_v4 = vmul.f32 3.8918573e-05, %v5878_v34 }
 0x666   :  { %v2294_v45 = vsel %vm2291_vm9, %v2293_v60, %v2289_v47  ;;  %v4026_v11 = vclamps-f32 %v2495_v51, 1.0  ;;  %v4024_v16 = vclamps-f32 %v2415_v40, 1.0  ;;  %v2335_v22 = vmul.f32 %v2334_v21, %v6060_v63  ;;  %v7372_v23 = vld [vmem:[#allocation23_spill] sm:$0xff] }
 0x667   :  { %v2236_v52 = vadd.f32 0.112945676, %v2235_v5  ;;  %2782 = vmatpush.msra.mxu3 %v2764_v54  ;;  %v2192_v37 = vadd.f32 0.001143296, %v2191_v44  ;;  %v2152_v61 = vadd.f32 0.001143296, %v2151_v38  ;;  %v2295_v46 = vmul.f32 %v2294_v45, %v6057_v31 }
 0x668   :  { %v2112_v49 = vadd.f32 0.001143296, %v2111_v4  ;;  %v2747_v7 = vadd.f32 1.0, %v4026_v11  ;;  %v2746_v30 = vadd.f32 1.0, %v4025_v33  ;;  %v2074_v29 = vmul.f32 0.5, %v7366_v13  ;;  %v7373_v5 = vld [vmem:[#allocation12_spill] sm:$0xff] }
 0x669   :  { %v2237_v2 = vmul.f32 %v2236_v52, %v5927_v36  ;;  %v2193_v1 = vmul.f32 %v2192_v37, %v5925_v19  ;;  %v2153_v0 = vmul.f32 %v2152_v61, %v5880_v43  ;;  %v2745_v62 = vadd.f32 1.0, %v4024_v16 }
 0x66a   :  { %v2113_v20 = vmul.f32 %v2112_v49, %v5878_v34  ;;  %v2763_v63 = vmul.f32 %v2747_v7, %v6063_v41  ;;  %v4022_v25 = vclamps-f32 %v2335_v22, 1.0  ;;  %v2106_v24 = vmul.f32 %v7367_v3, %v5878_v34 }
 0x66b   :  { %v2238_v58 = vadd.f32 0.4994258, %v2237_v2  ;;  %v2194_v18 = vadd.f32 0.014752088, %v2193_v1  ;;  %v2154_v31 = vadd.f32 0.014752088, %v2153_v0  ;;  %v2762_v53 = vmul.f32 %v2746_v30, %v2074_v29 }
 0x66c   :  { %v2114_v55 = vadd.f32 0.014752088, %v2113_v20  ;;  %2783 = vmatpush.msra.mxu3 %v2763_v63  ;;  %v2744_v28 = vadd.f32 1.0, %v4023_v39  ;;  %v4021_v40 = vclamps-f32 %v2295_v46, 1.0  ;;  %v2226_v15 = vmul.f32 %v7368_v59, %v5927_v36  ;;  %v7376_v59 = vld [vmem:[#allocation14_spill] sm:$0xff] }
 0x66d   :  { %v2239_v48 = vmul.f32 %v2238_v58, %v5927_v36  ;;  %v2195_v41 = vmul.f32 %v2194_v18, %v5925_v19  ;;  %v2155_v10 = vmul.f32 %v2154_v31, %v5880_v43  ;;  %v2072_v57 = vmul.f32 0.5, %v7369_v26 }
 0x66e   :  { %v2115_v32 = vmul.f32 %v2114_v55, %v5878_v34  ;;  %2784 = vmatpush.msra.mxu3 %v2762_v53  ;;  %v2761_v56 = vmul.f32 %v2745_v62, %v6052_v14  ;;  %v2743_v35 = vadd.f32 1.0, %v4022_v25  ;;  %v2146_v42 = vmul.f32 %v7370_v9, %v5880_v43  ;;  %v7375_v53 = vld [vmem:[#allocation10_spill] sm:$0xff] }
 0x66f   :  { %v2240_v12 = vadd.f32 1.0, %v2239_v48  ;;  %v2196_v6 = vadd.f32 0.112945676, %v2195_v41  ;;  %v2156_v50 = vadd.f32 0.112945676, %v2155_v10  ;;  %v2071_v33 = vmul.f32 0.5, %v7371_v8 }
 0x670   :  { %v2116_v27 = vadd.f32 0.112945676, %v2115_v32  ;;  %2785 = vmatpush.msra.mxu3 %v2761_v56  ;;  %v2760_v39 = vmul.f32 %v2744_v28, %v2072_v57  ;;  %v2742_v21 = vadd.f32 1.0, %v4021_v40  ;;  %v2186_v17 = vmul.f32 %v7372_v23, %v5925_v19  ;;  %v7377_v41 = vld [vmem:[#allocation9_spill] sm:$0xff]  ;;  %v7378_v56 = vld [vmem:[#allocation18_spill] sm:$0xff] }
 0x671   :  { %4197 = vrcp.f32 %v2240_v12  ;;  %v2197_v47 = vmul.f32 %v2196_v6, %v5925_v19  ;;  %v2157_v14 = vmul.f32 %v2156_v50, %v5880_v43  ;;  %v2227_v51 = vadd.f32 0.18741608, %v2226_v15 }
 0x672   :  { %v2117_v60 = vmul.f32 %v2116_v27, %v5878_v34  ;;  %v2070_v44 = vmul.f32 0.5, %v7373_v5  ;;  %2786 = vmatpush.msra.mxu3 %v2760_v39  ;;  %v2759_v54 = vmul.f32 %v2743_v35, %v2071_v33  ;;  %v2107_v11 = vadd.f32 0.18741608, %v2106_v24 }
 0x673   :  { %v2198_v45 = vadd.f32 0.4994258, %v2197_v47  ;;  %v2158_v38 = vadd.f32 0.4994258, %v2157_v14  ;;  %v2147_v16 = vadd.f32 0.18741608, %v2146_v42  ;;  %v2228_v30 = vmul.f32 %v2227_v51, %v5927_v36 }
 0x674   :  { %v2118_v4 = vadd.f32 0.4994258, %v2117_v60  ;;  %2787 = vmatpush.msra.mxu3 %v2759_v54  ;;  %v2758_v22 = vmul.f32 %v2742_v21, %v2070_v44  ;;  %v2187_v52 = vadd.f32 0.18741608, %v2186_v17  ;;  %v2108_v29 = vmul.f32 %v2107_v11, %v5878_v34 }
 0x675   :  { %v2199_v37 = vmul.f32 %v2198_v45, %v5925_v19  ;;  %v2159_v61 = vmul.f32 %v2158_v38, %v5880_v43  ;;  %v2148_v1 = vmul.f32 %v2147_v16, %v5880_v43  ;;  %v2229_v62 = vadd.f32 1.1283791, %v2228_v30 }
 0x676   :  { %v2119_v49 = vmul.f32 %v2118_v4, %v5878_v34  ;;  %2788 = vmatpush.msra.mxu3 %v2758_v22  ;;  %v2188_v20 = vmul.f32 %v2187_v52, %v5925_v19  ;;  %v2252_v25 = vand.u32 2147483648, %v2240_v12  ;;  %v2250_v58 = vand.u32 2147483647, %v2240_v12  ;;  %v7374_v19 = vld [vmem:[#allocation15_spill] sm:$0xff] }
 0x677   :  { %v4198_v7 = vpop.eup %4197  ;;  %v2200_v2 = vadd.f32 1.0, %v2199_v37  ;;  %v6417_v13 = vadd.f32 1.0, %v2159_v61  ;;  %v2109_v3 = vadd.f32 1.1283791, %v2108_v29  ;;  %v2149_v24 = vadd.f32 1.1283791, %v2148_v1 }
 0x678   :  { %v2242_v46 = vmul.f32 %v4198_v7, %v2240_v12  ;;  %v6421_v0 = vadd.f32 1.0, %v2119_v49  ;;  %vm2247_vm11 = vweird.f32 %v4198_v7  ;;  %v2189_v34 = vadd.f32 1.1283791, %v2188_v20  ;;  %v7379_v1 = vld [vmem:[#allocation16_spill] sm:$0xff] }
 0x679   :  { %4199 = vrcp.f32 %v2200_v2  ;;  %vm2246_vm12 = vweird.f32 %v2240_v12  ;;  %v2253_v43 = vor.u32 1.1754944e-38, %v2252_v25  ;;  %v2069_v55 = vmul.f32 0.5, %v7374_v19  ;;  %v7380_v25 = vld [vmem:[#allocation8_spill] sm:$0xff] }
 0x67a   :  { %v2243_v63 = vsub.f32 1.0, %v2242_v46  ;;  %4201 = vrcp.f32 %v6417_v13  ;;  %vm2248_vm14 = vmor %vm2246_vm12, %vm2247_vm11  ;;  %v2230_v28 = vmul.f32 %v2229_v62, %v7375_v53  ;;  %vm2251_vm4 = vcmp.eq.f32.partialorder %v2250_v58, 8.507059e+37  ;;  %v2775_v53 = vpop.permute.xlu0 %2774 }
 0x67b   :  { %4203 = vrcp.f32 %v6421_v0  ;;  %v2110_v15 = vmul.f32 %v2109_v3, %v7376_v59  ;;  %v2150_v10 = vmul.f32 %v2149_v24, %v7377_v41  ;;  %v2190_v35 = vmul.f32 %v2189_v34, %v7378_v56  ;;  %v7381_v24 = vld [vmem:[#allocation17_spill] sm:$0xff] }
 0x67c   :  { %v2244_v36 = vmul.f32 %v4198_v7, %v2243_v63  ;;  %vm2206_vm15 = vweird.f32 %v2200_v2  ;;  %v2210_v6 = vand.u32 2147483647, %v2200_v2  ;;  %v2212_v50 = vand.u32 2147483648, %v2200_v2 }
 0x67d   :  { %vm2166_vm2 = vweird.f32 %v6417_v13  ;;  %v2170_v39 = vand.u32 2147483647, %v6417_v13  ;;  %v2172_v23 = vand.u32 2147483648, %v6417_v13  ;;  %v2132_v60 = vand.u32 2147483648, %v6421_v0 }
 0x67e   :  { %v2245_v18 = vadd.f32 %v4198_v7, %v2244_v36  ;;  %v2130_v44 = vand.u32 2147483647, %v6421_v0  ;;  %vm2211_vm5 = vcmp.eq.f32.partialorder %v2210_v6, 8.507059e+37  ;;  %v2213_v45 = vor.u32 1.1754944e-38, %v2212_v50 }
 0x67f   :  { %v4200_v31 = vpop.eup %4199  ;;  %v2173_v11 = vor.u32 1.1754944e-38, %v2172_v23  ;;  %vm2126_vm10 = vweird.f32 %v6421_v0  ;;  %vm2171_vm9 = vcmp.eq.f32.partialorder %v2170_v39, 8.507059e+37  ;;  %v2133_v37 = vor.u32 1.1754944e-38, %v2132_v60 }
 0x680   :  { %v2249_v40 = vsel %vm2248_vm14, %v4198_v7, %v2245_v18  ;;  %v4202_v48 = vpop.eup %4201  ;;  %v2202_v26 = vmul.f32 %v4200_v31, %v2200_v2  ;;  %vm2207_vm8 = vweird.f32 %v4200_v31  ;;  %vm2131_vm12 = vcmp.eq.f32.partialorder %v2130_v44, 8.507059e+37 }
 0x681   :  { %v2254_v32 = vsel %vm2251_vm4, %v2253_v43, %v2249_v40  ;;  %v4204_v57 = vpop.eup %4203  ;;  %v2162_v9 = vmul.f32 %v4202_v48, %v6417_v13  ;;  %vm2167_vm3 = vweird.f32 %v4202_v48  ;;  %vm2208_vm13 = vmor %vm2206_vm15, %vm2207_vm8  ;;  %v2068_v20 = vmul.f32 0.5, %v7379_v1 }
 0x682   :  { %v2255_v12 = vmul.f32 %v2254_v32, %v2230_v28  ;;  %v2203_v42 = vsub.f32 1.0, %v2202_v26  ;;  %v2122_v27 = vmul.f32 %v4204_v57, %v6421_v0  ;;  %vm2127_vm7 = vweird.f32 %v4204_v57  ;;  %vm2168_vm6 = vmor %vm2166_vm2, %vm2167_vm3 }
 0x683   :  { %v2163_v33 = vsub.f32 1.0, %v2162_v9  ;;  %vm2128_vm11 = vmor %vm2126_vm10, %vm2127_vm7  ;;  %v2067_v36 = vmul.f32 0.5, %v7380_v25  ;;  %v2066_v34 = vmul.f32 0.5, %v7381_v24  ;;  %v7382_v19 = vmov 1.0  }
 0x684   :  { %v4020_v8 = vclamps-f32 %v2255_v12, 1.0  ;;  %v2204_v21 = vmul.f32 %v4200_v31, %v2203_v42  ;;  %v2123_v17 = vsub.f32 1.0, %v2122_v27 }
 0x685   :  { %v2164_v14 = vmul.f32 %v4202_v48, %v2163_v33 }
 0x686   :  { %v2741_v47 = vadd.f32 1.0, %v4020_v8  ;;  %v2205_v51 = vadd.f32 %v4200_v31, %v2204_v21  ;;  %v2124_v5 = vmul.f32 %v4204_v57, %v2123_v17 }
 0x687   :  { %v2165_v38 = vadd.f32 %v4202_v48, %v2164_v14 }
 0x688   :  { %v2757_v54 = vmul.f32 %v2741_v47, %v2069_v55  ;;  %v2209_v4 = vsel %vm2208_vm13, %v4200_v31, %v2205_v51  ;;  %v2125_v16 = vadd.f32 %v4204_v57, %v2124_v5  ;;  %v4033_v31 = vld [vmem:[%s7150_s2 + $0x10] sm:$0xff] }
 0x689   :  { %v2214_v22 = vsel %vm2211_vm5, %v2213_v45, %v2209_v4  ;;  %v2169_v52 = vsel %vm2168_vm6, %v4202_v48, %v2165_v38 }
 0x68a   :  { %2789 = vmatpush.msra.mxu3 %v2757_v54  ;;  %v2215_v61 = vmul.f32 %v2214_v22, %v2190_v35  ;;  %v2174_v49 = vsel %vm2171_vm9, %v2173_v11, %v2169_v52  ;;  %v2129_v7 = vsel %vm2128_vm11, %v4204_v57, %v2125_v16 }
 0x68b   :  { %v2175_v30 = vmul.f32 %v2174_v49, %v2150_v10  ;;  %v2134_v46 = vsel %vm2131_vm12, %v2133_v37, %v2129_v7  ;;  %v7384_v7 = vld [vmem:[#allocation6_spill] sm:$0xff] }
 0x68c   :  { %v4019_v2 = vclamps-f32 %v2215_v61, 1.0  ;;  %v2135_v13 = vmul.f32 %v2134_v46, %v2110_v15 }
 0x68d   :  { %v4018_v29 = vclamps-f32 %v2175_v30, 1.0 }
 0x68e   :  { %v2740_v63 = vadd.f32 1.0, %v4019_v2  ;;  %v4017_v0 = vclamps-f32 %v2135_v13, 1.0 }
 0x68f   :  { %v2739_v62 = vadd.f32 1.0, %v4018_v29 }
 0x690   :  { %v2756_v58 = vmul.f32 %v2740_v63, %v2068_v20  ;;  %v2738_v3 = vadd.f32 1.0, %v4017_v0  ;;  %v7385_v63 = vld [vmem:[#allocation20_spill] sm:$0xff] }
 0x691   :  { %v2755_v18 = vmul.f32 %v2739_v62, %v2067_v36 }
 0x692   :  { %2790 = vmatpush.msra.mxu3 %v2756_v58  ;;  %v2754_v43 = vmul.f32 %v2738_v3, %v2066_v34 }
 0x694   :  { %2791 = vmatpush.msra.mxu3 %v2755_v18 }
 0x696   :  { %2792 = vmatpush.msra.mxu3 %v2754_v43 }
 0x697   :  { %2793 = vmatmul.f32.vlgmr.msra.gmra.mxu3 %v4033_v31 }
 0x698   :  { %4054 = vmatpush.msk.msrb.mxu3 %vm24_vm0, %v7382_v19 }
 0x71a   :  { %v2794_v28 = vpop.f32.mrf.mxu3 }
 0x71b   :  { %v2795_v40 = vadd.f32 %v2794_v28, %v2775_v53 }
 0x71d   :  { %v2798_v48 = vmul.f32 0.70710677, %v2795_v40  ;;  %v2797_v37 = vmul.f32 0.5, %v2795_v40 }
 0x71f   :  { %v2799_v59 = vmul.f32 %v2798_v48, %v2798_v48 }
 0x721   :  { %v2800_v15 = vmin.f32 %v2799_v59, 16.0 }
 0x723   :  { %v2801_v41 = vmul.f32 2.1237322e-06, %v2800_v15  ;;  %v2812_v10 = vmul.f32 3.8918573e-05, %v2800_v15 }
 0x725   :  { %v2802_v32 = vadd.f32 0.00028619796, %v2801_v41  ;;  %v2813_v26 = vadd.f32 0.001143296, %v2812_v10  ;;  %v2873_v41 = vpop.permute.xlu1 %2872 }
 0x727   :  { %v2803_v57 = vmul.f32 %v2802_v32, %v2800_v15  ;;  %v2814_v56 = vmul.f32 %v2813_v26, %v2800_v15  ;;  %v2879_v32 = vpop.permute.xlu2 %2878 }
 0x729   :  { %v2815_v35 = vadd.f32 0.014752088, %v2814_v56  ;;  %v2804_v12 = vadd.f32 0.0036580483, %v2803_v57  ;;  %v4038_v57 = vld [vmem:[%s7149_s1 + $0x180] sm:$0xff]  ;;  %v4039_v56 = vld [vmem:[%s7149_s1 + $0x188] sm:$0xff] }
 0x72b   :  { %v2816_v9 = vmul.f32 %v2815_v35, %v2800_v15  ;;  %v2805_v6 = vmul.f32 %v2804_v12, %v2800_v15  ;;  %v4040_v35 = vld [vmem:[%s7149_s1 + $0x190] sm:$0xff]  ;;  %v4041_v12 = vld [vmem:[%s7149_s1 + $0x198] sm:$0xff] }
 0x72d   :  { %v2817_v42 = vadd.f32 0.112945676, %v2816_v9  ;;  %v2806_v8 = vadd.f32 0.05243302, %v2805_v6  ;;  %v4042_v9 = vld [vmem:[%s7149_s1 + $0x1a0] sm:$0xff]  ;;  %v4044_v6 = vld [vmem:[%s7149_s1 + $0x1b0] sm:$0xff] }
 0x72f   :  { %v2818_v50 = vmul.f32 %v2817_v42, %v2800_v15  ;;  %v2807_v21 = vmul.f32 %v2806_v8, %v2800_v15  ;;  %v4043_v42 = vld [vmem:[%s7149_s1 + $0x1a8] sm:$0xff] }
 0x730   :  { %v4047_v8 = vld [vmem:[%s7149_s1 + $0x1c8] sm:$0xff] }
 0x731   :  { %v2819_v27 = vadd.f32 0.4994258, %v2818_v50  ;;  %v2808_v23 = vadd.f32 0.18741608, %v2807_v21  ;;  %v4045_v50 = vld [vmem:[%s7149_s1 + $0x1b8] sm:$0xff]  ;;  %v4050_v21 = vld [vmem:[%s7149_s1 + $0x1e0] sm:$0xff] }
 0x733   :  { %v2820_v33 = vmul.f32 %v2819_v27, %v2800_v15  ;;  %v2809_v47 = vmul.f32 %v2808_v23, %v2800_v15  ;;  %v4046_v27 = vld [vmem:[%s7149_s1 + $0x1c0] sm:$0xff]  ;;  %v4051_v23 = vld [vmem:[%s7149_s1 + $0x1e8] sm:$0xff] }
 0x735   :  { %v2821_v39 = vadd.f32 1.0, %v2820_v33  ;;  %v2810_v5 = vadd.f32 1.1283791, %v2809_v47  ;;  %v4048_v33 = vld [vmem:[%s7149_s1 + $0x1d0] sm:$0xff]  ;;  %v4053_v47 = vld [vmem:[%s7149_s1 + $0x1f8] sm:$0xff] }
 0x737   :  { %4205 = vrcp.f32 %v2821_v39  ;;  %v2833_v51 = vand.u32 2147483648, %v2821_v39  ;;  %v2831_v54 = vand.u32 2147483647, %v2821_v39  ;;  %vm2827_vm14 = vweird.f32 %v2821_v39 }
 0x738   :  { %v2811_v4 = vmul.f32 %v2810_v5, %v2798_v48 }
 0x739   :  { %v2834_v38 = vor.u32 1.1754944e-38, %v2833_v51  ;;  %vm2832_vm15 = vcmp.eq.f32.partialorder %v2831_v54, 8.507059e+37 }
 0x73d   :  { %v4206_v17 = vpop.eup %4205 }
 0x73e   :  { %v2823_v14 = vmul.f32 %v4206_v17, %v2821_v39  ;;  %vm2828_vm0 = vweird.f32 %v4206_v17  ;;  %v4049_v39 = vld [vmem:[%s7149_s1 + $0x1d8] sm:$0xff] }
 0x73f   :  { %vm2829_vm4 = vmor %vm2827_vm14, %vm2828_vm0 }
 0x740   :  { %v2824_v60 = vsub.f32 1.0, %v2823_v14 }
 0x742   :  { %v2825_v44 = vmul.f32 %v4206_v17, %v2824_v60 }
 0x744   :  { %v2826_v45 = vadd.f32 %v4206_v17, %v2825_v44 }
 0x746   :  { %v2830_v11 = vsel %vm2829_vm4, %v4206_v17, %v2826_v45  ;;  %v4052_v17 = vld [vmem:[%s7149_s1 + $0x1f0] sm:$0xff] }
 0x747   :  { %v2835_v16 = vsel %vm2832_vm15, %v2834_v38, %v2830_v11 }
 0x748   :  { %v2836_v22 = vmul.f32 %v2835_v16, %v2811_v4 }
 0x74a   :  { %v4034_v52 = vclamps-f32 %v2836_v22, 1.0 }
 0x74c   :  { %v2839_v61 = vadd.f32 1.0, %v4034_v52 }
 0x74e   :  { %v2840_v49 = vmul.f32 %v2839_v61, %v2797_v37 }
 0x750   :  { %v2841_v30 = vadd.f32 %v2840_v49, %v7384_v7 }
 0x752   :  { %v2842_v46 = vrot.slane %v2841_v30, 4 }
 0x754   :  { %v2843_v2 = vadd.f32 %v2842_v46, %v2841_v30 }
 0x756   :  { %v2844_v13 = vrot.slane %v2843_v2, 2 }
 0x758   :  { %v2845_v29 = vadd.f32 %v2844_v13, %v2843_v2 }
 0x75a   :  { %v2846_v1 = vrot.slane %v2845_v29, 1 }
 0x75c   :  { %v2847_v20 = vadd.f32 %v2846_v1, %v2845_v29 }
 0x75e   :  { %v2848_v0 = vmul.f32 %v2847_v20, %v7385_v63 }
 0x760   :  { %v2849_v62 = vsub.f32 %v2841_v30, %v2848_v0 }
 0x762   :  { %v2850_v25 = vmul.f32 %v2849_v62, %v2849_v62 }
 0x764   :  { %v2851_v36 = vrot.slane %v2850_v25, 4 }
 0x766   :  { %v2852_v58 = vadd.f32 %v2851_v36, %v2850_v25 }
 0x768   :  { %v2853_v3 = vrot.slane %v2852_v58, 2 }
 0x76a   :  { %v2854_v24 = vadd.f32 %v2853_v3, %v2852_v58 }
 0x76c   :  { %v2855_v34 = vrot.slane %v2854_v24, 1 }
 0x76e   :  { %v2856_v18 = vadd.f32 %v2855_v34, %v2854_v24 }
 0x770   :  { %v2857_v43 = vmul.f32 %v2856_v18, %v7385_v63 }
 0x772   :  { %v2858_v31 = vadd.f32 1e-05, %v2857_v43 }
 0x774   :  { %4207 = vrsqrt.f32 %v2858_v31  ;;  %vm2865_vm8 = vweird.f32 %v2858_v31 }
 0x77a   :  { %v4208_v19 = vpop.eup %4207 }
 0x77b   :  { %v2860_v55 = vmul.f32 %v4208_v19, %v2858_v31  ;;  %vm2866_vm2 = vweird.f32 %v4208_v19 }
 0x77c   :  { %vm2867_vm3 = vmor %vm2865_vm8, %vm2866_vm2 }
 0x77d   :  { %v2861_v53 = vmul.f32 %v4208_v19, %v2860_v55 }
 0x77f   :  { %v2862_v28 = vmul.f32 0.5, %v2861_v53 }
 0x781   :  { %v2863_v40 = vsub.f32 1.5, %v2862_v28 }
 0x783   :  { %v2864_v48 = vmul.f32 %v4208_v19, %v2863_v40 }
 0x785   :  { %v2868_v59 = vsel %vm2867_vm3, %v4208_v19, %v2864_v48 }
 0x786   :  { %v2869_v15 = vmul.f32 %v2868_v59, %v2849_v62 }
 0x788   :  { %v2875_v10 = vmul.f32 %v2873_v41, %v2869_v15 }
 0x78a   :  { %v6455_v26 = vadd.f32 %v2879_v32, %v2875_v10 }
 0x78c   :  { %7386 = vst [vmem:[#allocation24_spill] sm:$0xff] %v6455_v26  ;;  %2966 = vmatpush.msrb.mxu3 %v6455_v26 }
 0x78d   :  { %4055 = vmatmul.msk.f32.vlgmr.msrb.gmra.mxu3 %vm46_vm1, %v4038_v57 }
 0x795   :  { %4056 = vmatmul.msk.f32.gmra.mxu3 %vm46_vm1, %v4039_v56 }
 0x79d   :  { %4057 = vmatmul.msk.f32.gmra.mxu3 %vm46_vm1, %v4040_v35 }
 0x7a5   :  { %4058 = vmatmul.msk.f32.gmra.mxu3 %vm46_vm1, %v4041_v12 }
 0x7ad   :  { %4059 = vmatmul.msk.f32.gmra.mxu3 %vm46_vm1, %v4042_v9 }
 0x7b5   :  { %4060 = vmatmul.msk.f32.gmra.mxu3 %vm46_vm1, %v4043_v42 }
 0x7bd   :  { %4061 = vmatmul.msk.f32.gmra.mxu3 %vm46_vm1, %v4044_v6 }
 0x7c5   :  { %4062 = vmatmul.msk.f32.gmra.mxu3 %vm46_vm1, %v4045_v50 }
 0x7cd   :  { %4063 = vmatmul.msk.f32.gmra.mxu3 %vm46_vm1, %v4046_v27 }
 0x7d5   :  { %4064 = vmatmul.msk.f32.gmra.mxu3 %vm46_vm1, %v4047_v8 }
 0x7dd   :  { %4065 = vmatmul.msk.f32.gmra.mxu3 %vm46_vm1, %v4048_v33 }
 0x7e5   :  { %4066 = vmatmul.msk.f32.gmra.mxu3 %vm46_vm1, %v4049_v39 }
 0x7ed   :  { %4067 = vmatmul.msk.f32.gmra.mxu3 %vm46_vm1, %v4050_v21 }
 0x7f5   :  { %4068 = vmatmul.msk.f32.gmra.mxu3 %vm46_vm1, %v4051_v23 }
 0x7fd   :  { %4069 = vmatmul.msk.f32.gmra.mxu3 %vm46_vm1, %v4052_v17 }
 0x805   :  { %4070 = vmatmul.msk.f32.gmra.mxu3 %vm46_vm1, %v4053_v47 }
 0x810   :  { %v6522_v14 = vpop.f32.mrf.mxu3 }
 0x811   :  { %7387 = vst [vmem:[#allocation13_spill] sm:$0xff] %v6522_v14  ;;  %v6547_v52 = vmul.f32 0.70710677, %v6522_v14 }
 0x813   :  { %7395 = vst [vmem:[#allocation15_spill] sm:$0xff] %v6547_v52  ;;  %v3048_v61 = vmul.f32 %v6547_v52, %v6547_v52 }
 0x815   :  { %v6567_v13 = vmin.f32 %v3048_v61, 16.0 }
 0x817   :  { %v3050_v3 = vmul.f32 2.1237322e-06, %v6567_v13 }
 0x818   :  { %v6524_v60 = vpop.f32.mrf.mxu3 }
 0x819   :  { %7388 = vst [vmem:[#allocation11_spill] sm:$0xff] %v6524_v60  ;;  %v6550_v37 = vmul.f32 0.70710677, %v6524_v60  ;;  %v3051_v48 = vadd.f32 0.00028619796, %v3050_v3 }
 0x81b   :  { %7396 = vst [vmem:[#allocation10_spill] sm:$0xff] %v6550_v37  ;;  %v3088_v49 = vmul.f32 %v6550_v37, %v6550_v37  ;;  %v3052_v9 = vmul.f32 %v3051_v48, %v6567_v13 }
 0x81d   :  { %v6569_v29 = vmin.f32 %v3088_v49, 16.0  ;;  %v3053_v61 = vadd.f32 0.0036580483, %v3052_v9 }
 0x81f   :  { %v3090_v24 = vmul.f32 2.1237322e-06, %v6569_v29 }
 0x820   :  { %v6526_v51 = vpop.f32.mrf.mxu3 }
 0x821   :  { %7389 = vst [vmem:[#allocation22_spill] sm:$0xff] %v6526_v51  ;;  %v6579_v62 = vmul.f32 0.70710677, %v6526_v51  ;;  %v3091_v59 = vadd.f32 0.00028619796, %v3090_v24 }
 0x823   :  { %7397 = vst [vmem:[#allocation14_spill] sm:$0xff] %v6579_v62  ;;  %v3128_v19 = vmul.f32 %v6579_v62, %v6579_v62  ;;  %v3092_v42 = vmul.f32 %v3091_v59, %v6569_v29  ;;  %v3054_v59 = vmul.f32 %v3053_v61, %v6567_v13 }
 0x825   :  { %v6614_v32 = vmin.f32 %v3128_v19, 16.0  ;;  %v3093_v49 = vadd.f32 0.0036580483, %v3092_v42 }
 0x827   :  { %v3130_v33 = vmul.f32 2.1237322e-06, %v6614_v32 }
 0x828   :  { %v6528_v5 = vpop.f32.mrf.mxu3 }
 0x829   :  { %7390 = vst [vmem:[#allocation7_spill] sm:$0xff] %v6528_v5  ;;  %v6582_v25 = vmul.f32 0.70710677, %v6528_v5  ;;  %v3131_v3 = vadd.f32 0.00028619796, %v3130_v33 }
 0x82b   :  { %7398 = vst [vmem:[#allocation9_spill] sm:$0xff] %v6582_v25  ;;  %v3168_v55 = vmul.f32 %v6582_v25, %v6582_v25 }
 0x82d   :  { %v6616_v57 = vmin.f32 %v3168_v55, 16.0 }
 0x82f   :  { %v3170_v39 = vmul.f32 2.1237322e-06, %v6616_v57 }
 0x830   :  { %v6530_v44 = vpop.f32.mrf.mxu3 }
 0x831   :  { %7391 = vst [vmem:[#allocation19_spill] sm:$0xff] %v6530_v44  ;;  %v6559_v30 = vmul.f32 0.70710677, %v6530_v44  ;;  %v3171_v24 = vadd.f32 0.00028619796, %v3170_v39 }
 0x833   :  { %v3208_v1 = vmul.f32 %v6559_v30, %v6559_v30 }
 0x835   :  { %v6593_v18 = vmin.f32 %v3208_v1, 16.0 }
 0x837   :  { %v3210_v15 = vmul.f32 2.1237322e-06, %v6593_v18 }
 0x838   :  { %v6532_v54 = vpop.f32.mrf.mxu3 }
 0x839   :  { %7392 = vst [vmem:[#allocation21_spill] sm:$0xff] %v6532_v54  ;;  %v6562_v46 = vmul.f32 0.70710677, %v6532_v54  ;;  %v3211_v50 = vadd.f32 0.00028619796, %v3210_v15  ;;  %v3094_v15 = vmul.f32 %v3093_v49, %v6569_v29 }
 0x83a   :  { %v6663_v49 = vadd.f32 0.05243302, %v3054_v59 }
 0x83b   :  { %v3248_v20 = vmul.f32 %v6562_v46, %v6562_v46  ;;  %v3212_v1 = vmul.f32 %v3211_v50, %v6593_v18  ;;  %v3132_v50 = vmul.f32 %v3131_v3, %v6614_v32 }
 0x83c   :  { %7399 = vst [vmem:[#allocation18_spill] sm:$0xff] %v6663_v49 }
 0x83d   :  { %v6595_v43 = vmin.f32 %v3248_v20, 16.0  ;;  %v3133_v63 = vadd.f32 0.0036580483, %v3132_v50 }
 0x83f   :  { %v3250_v41 = vmul.f32 2.1237322e-06, %v6595_v43 }
 0x840   :  { %v6534_v45 = vpop.f32.mrf.mxu3 }
 0x841   :  { %7393 = vst [vmem:[#allocation23_spill] sm:$0xff] %v6534_v45  ;;  %v6565_v2 = vmul.f32 0.70710677, %v6534_v45  ;;  %v3251_v27 = vadd.f32 0.00028619796, %v3250_v41 }
 0x843   :  { %v3288_v36 = vmul.f32 %v6565_v2, %v6565_v2  ;;  %v3252_v20 = vmul.f32 %v3251_v27, %v6595_v43  ;;  %v3172_v27 = vmul.f32 %v3171_v24, %v6616_v57 }
 0x845   :  { %v6603_v53 = vmin.f32 %v3288_v36, 16.0 }
 0x847   :  { %v3290_v56 = vmul.f32 2.1237322e-06, %v6603_v53 }
 0x848   :  { %v6536_v38 = vpop.f32.mrf.mxu3 }
 0x849   :  { %v6576_v0 = vmul.f32 0.70710677, %v6536_v38  ;;  %v3291_v21 = vadd.f32 0.00028619796, %v3290_v56  ;;  %v3213_v56 = vadd.f32 0.0036580483, %v3212_v1 }
 0x84a   :  { %v6665_v1 = vadd.f32 0.05243302, %v3094_v15 }
 0x84b   :  { %v3328_v31 = vmul.f32 %v6576_v0, %v6576_v0  ;;  %v3292_v19 = vmul.f32 %v3291_v21, %v6603_v53 }
 0x84c   :  { %7400 = vst [vmem:[#allocation16_spill] sm:$0xff] %v6665_v1 }
 0x84d   :  { %v6612_v10 = vmin.f32 %v3328_v31, 16.0  ;;  %v3293_v39 = vadd.f32 0.0036580483, %v3292_v19 }
 0x84f   :  { %v3330_v8 = vmul.f32 2.1237322e-06, %v6612_v10  ;;  %v3294_v59 = vmul.f32 %v3293_v39, %v6603_v53 }
 0x850   :  { %v6538_v4 = vpop.f32.mrf.mxu3 }
 0x851   :  { %7394 = vst [vmem:[#allocation12_spill] sm:$0xff] %v6538_v4  ;;  %v6587_v58 = vmul.f32 0.70710677, %v6538_v4  ;;  %v3331_v36 = vadd.f32 0.00028619796, %v3330_v8 }
 0x853   :  { %v3368_v28 = vmul.f32 %v6587_v58, %v6587_v58  ;;  %v3332_v9 = vmul.f32 %v3331_v36, %v6612_v10  ;;  %v3214_v36 = vmul.f32 %v3213_v56, %v6593_v18 }
 0x855   :  { %v6619_v35 = vmin.f32 %v3368_v28, 16.0  ;;  %v3333_v24 = vadd.f32 0.0036580483, %v3332_v9  ;;  %v3215_v50 = vadd.f32 0.05243302, %v3214_v36 }
 0x857   :  { %v3370_v23 = vmul.f32 2.1237322e-06, %v6619_v35 }
 0x858   :  { %v6540_v11 = vpop.f32.mrf.mxu3 }
 0x859   :  { %v6608_v40 = vmul.f32 0.70710677, %v6540_v11  ;;  %v3371_v55 = vadd.f32 0.00028619796, %v3370_v23 }
 0x85b   :  { %v3408_v12 = vmul.f32 %v6608_v40, %v6608_v40  ;;  %v3372_v21 = vmul.f32 %v3371_v55, %v6619_v35  ;;  %v3173_v55 = vadd.f32 0.0036580483, %v3172_v27 }
 0x85d   :  { %v6631_v17 = vmin.f32 %v3408_v12, 16.0  ;;  %v3253_v12 = vadd.f32 0.0036580483, %v3252_v20  ;;  %v3373_v15 = vadd.f32 0.0036580483, %v3372_v21  ;;  %v3174_v5 = vmul.f32 %v3173_v55, %v6616_v57 }
 0x85f   :  { %v3410_v28 = vmul.f32 2.1237322e-06, %v6631_v17  ;;  %v3254_v3 = vmul.f32 %v3253_v12, %v6595_v43  ;;  %v3374_v51 = vmul.f32 %v3373_v15, %v6619_v35 }
 0x860   :  { %v6542_v16 = vpop.f32.mrf.mxu3 }
 0x861   :  { %v6634_v47 = vmul.f32 0.70710677, %v6542_v16  ;;  %v3411_v23 = vadd.f32 0.00028619796, %v3410_v28  ;;  %v3255_v27 = vadd.f32 0.05243302, %v3254_v3 }
 0x862   :  { %v3375_v54 = vadd.f32 0.05243302, %v3374_v51 }
 0x863   :  { %v3448_v48 = vmul.f32 %v6634_v47, %v6634_v47  ;;  %v3412_v26 = vmul.f32 %v3411_v23, %v6631_v17  ;;  %v3295_v23 = vadd.f32 0.05243302, %v3294_v59 }
 0x865   :  { %v6661_v61 = vmin.f32 %v3448_v48, 16.0  ;;  %v3413_v62 = vadd.f32 0.0036580483, %v3412_v26  ;;  %v3256_v26 = vmul.f32 %v3255_v27, %v6595_v43  ;;  %v3296_v44 = vmul.f32 %v3295_v23, %v6603_v53 }
 0x867   :  { %v3450_v14 = vmul.f32 2.1237322e-06, %v6661_v61  ;;  %v3297_v1 = vadd.f32 0.18741608, %v3296_v44 }
 0x868   :  { %v6544_v22 = vpop.f32.mrf.mxu3 }
 0x869   :  { %v6639_v31 = vmul.f32 0.70710677, %v6544_v22  ;;  %v3451_v37 = vadd.f32 0.00028619796, %v3450_v14 }
 0x86b   :  { %v3488_v8 = vmul.f32 %v6639_v31, %v6639_v31 }
 0x86d   :  { %v6673_v28 = vmin.f32 %v3488_v8, 16.0  ;;  %v3334_v8 = vmul.f32 %v3333_v24, %v6612_v10 }
 0x86f   :  { %v3490_v39 = vmul.f32 2.1237322e-06, %v6673_v28 }
 0x870   :  { %v6556_v7 = vpop.f32.mrf.mxu3 }
 0x871   :  { %v6691_v52 = vmul.f32 0.70710677, %v6556_v7  ;;  %v3491_v14 = vadd.f32 0.00028619796, %v3490_v39 }
 0x873   :  { %v3492_v51 = vmul.f32 %v3491_v14, %v6673_v28 }
 0x875   :  { %v3493_v44 = vadd.f32 0.0036580483, %v3492_v51 }
 0x878   :  { %v6591_v34 = vpop.f32.mrf.mxu3 }
 0x879   :  { %v6681_v56 = vmul.f32 0.70710677, %v6591_v34 }
 0x87b   :  { %v3568_v36 = vmul.f32 %v6681_v56, %v6681_v56 }
 0x880   :  { %v6625_v6 = vpop.f32.mrf.mxu3 }
 0x881   :  { %v6651_v42 = vmul.f32 0.70710677, %v6625_v6 }
 0x883   :  { %v3608_v19 = vmul.f32 %v6651_v42, %v6651_v42 }
 0x888   :  { %v6647_v41 = vpop.f32.mrf.mxu3 }
 0x889   :  { %v6658_v33 = vmul.f32 0.70710677, %v6647_v41 }
 0x88b   :  { %v3648_v20 = vmul.f32 %v6658_v33, %v6658_v33 }
 0x88d   :  { %v6675_v48 = vmin.f32 %v3648_v20, 16.0  ;;  %v6686_v20 = vmin.f32 %v3608_v19, 16.0  ;;  %v3134_v19 = vmul.f32 %v3133_v63, %v6614_v32  ;;  %v3528_v63 = vmul.f32 %v6691_v52, %v6691_v52 }
 0x88f   :  { %v3650_v12 = vmul.f32 2.1237322e-06, %v6675_v48  ;;  %v3661_v9 = vmul.f32 3.8918573e-05, %v6675_v48  ;;  %v3610_v59 = vmul.f32 2.1237322e-06, %v6686_v20 }
 0x890   :  { %v6710_v27 = vadd.f32 0.05243302, %v3134_v19  ;;  %v3621_v14 = vmul.f32 3.8918573e-05, %v6686_v20 }
 0x891   :  { %v3651_v21 = vadd.f32 0.00028619796, %v3650_v12  ;;  %v3662_v60 = vadd.f32 0.001143296, %v3661_v9  ;;  %v3216_v12 = vmul.f32 %v3215_v50, %v6593_v18  ;;  %v3335_v9 = vadd.f32 0.05243302, %v3334_v8 }
 0x892   :  { %v6707_v50 = vmin.f32 %v3568_v36, 16.0  ;;  %7401 = vst [vmem:[#allocation8_spill] sm:$0xff] %v6710_v27  ;;  %v3611_v55 = vadd.f32 0.00028619796, %v3610_v59  ;;  %v3376_v36 = vmul.f32 %v3375_v54, %v6619_v35 }
 0x893   :  { %v3652_v3 = vmul.f32 %v3651_v21, %v6675_v48  ;;  %v3663_v24 = vmul.f32 %v3662_v60, %v6675_v48  ;;  %v3414_v21 = vmul.f32 %v3413_v62, %v6631_v17  ;;  %v3452_v60 = vmul.f32 %v3451_v37, %v6661_v61 }
 0x894   :  { %v3217_v39 = vadd.f32 0.18741608, %v3216_v12  ;;  %v6715_v37 = vadd.f32 0.05243302, %v3174_v5  ;;  %v3570_v19 = vmul.f32 2.1237322e-06, %v6707_v50 }
 0x895   :  { %v3653_v15 = vadd.f32 0.0036580483, %v3652_v3  ;;  %v3664_v25 = vadd.f32 0.014752088, %v3663_v24  ;;  %v3336_v3 = vmul.f32 %v3335_v9, %v6612_v10  ;;  %v3257_v24 = vadd.f32 0.18741608, %v3256_v26 }
 0x896   :  { %7402 = vst [vmem:[#allocation17_spill] sm:$0xff] %v6715_v37  ;;  %v3415_v45 = vadd.f32 0.05243302, %v3414_v21  ;;  %v3453_v49 = vadd.f32 0.0036580483, %v3452_v60  ;;  %v3218_v9 = vmul.f32 %v3217_v39, %v6593_v18  ;;  %v3612_v26 = vmul.f32 %v3611_v55, %v6686_v20 }
 0x897   :  { %v3665_v8 = vmul.f32 %v3664_v25, %v6675_v48  ;;  %v3654_v62 = vmul.f32 %v3653_v15, %v6675_v48  ;;  %v6718_v25 = vmin.f32 %v3528_v63, 16.0  ;;  %v3337_v59 = vadd.f32 0.18741608, %v3336_v3 }
 0x898   :  { %v3258_v5 = vmul.f32 %v3257_v24, %v6595_v43  ;;  %v3298_v21 = vmul.f32 %v3297_v1, %v6603_v53  ;;  %v3377_v60 = vadd.f32 0.18741608, %v3376_v36  ;;  %v3416_v63 = vmul.f32 %v3415_v45, %v6631_v17 }
 0x899   :  { %v3666_v23 = vadd.f32 0.112945676, %v3665_v8  ;;  %v3655_v15 = vadd.f32 0.05243302, %v3654_v62  ;;  %v3622_v8 = vadd.f32 0.001143296, %v3621_v14  ;;  %v3338_v37 = vmul.f32 %v3337_v59, %v6612_v10 }
 0x89a   :  { %v3530_v39 = vmul.f32 2.1237322e-06, %v6718_v25  ;;  %v3571_v3 = vadd.f32 0.00028619796, %v3570_v19  ;;  %v3219_v27 = vadd.f32 1.1283791, %v3218_v9  ;;  %v3494_v1 = vmul.f32 %v3493_v44, %v6673_v28 }
 0x89b   :  { %v3667_v12 = vmul.f32 %v3666_v23, %v6675_v48  ;;  %v3454_v23 = vmul.f32 %v3453_v49, %v6661_v61  ;;  %v3613_v24 = vadd.f32 0.0036580483, %v3612_v26  ;;  %v3623_v51 = vmul.f32 %v3622_v8, %v6686_v20 }
 0x89c   :  { %v3259_v62 = vadd.f32 1.1283791, %v3258_v5  ;;  %v3656_v36 = vmul.f32 %v3655_v15, %v6675_v48  ;;  %v3378_v49 = vmul.f32 %v3377_v60, %v6619_v35  ;;  %v3417_v14 = vadd.f32 0.18741608, %v3416_v63 }
 0x89d   :  { %v3668_v54 = vadd.f32 0.4994258, %v3667_v12  ;;  %v3299_v12 = vadd.f32 1.1283791, %v3298_v21  ;;  %v3624_v19 = vadd.f32 0.014752088, %v3623_v51  ;;  %v3572_v9 = vmul.f32 %v3571_v3, %v6707_v50 }
 0x89e   :  { %v3455_v4 = vadd.f32 0.05243302, %v3454_v23  ;;  %v6741_v59 = vmul.f32 0.5, %v6536_v38  ;;  %v3339_v26 = vadd.f32 1.1283791, %v3338_v37  ;;  %v3614_v5 = vmul.f32 %v3613_v24, %v6686_v20 }
 0x89f   :  { %v3669_v55 = vmul.f32 %v3668_v54, %v6675_v48  ;;  %v3531_v54 = vadd.f32 0.00028619796, %v3530_v39  ;;  %v3625_v44 = vmul.f32 %v3624_v19, %v6686_v20  ;;  %v6746_v15 = vmul.f32 %v3219_v27, %v6559_v30 }
 0x8a0   :  { %v6749_v21 = vmul.f32 %v3259_v62, %v6562_v46  ;;  %v3495_v60 = vadd.f32 0.05243302, %v3494_v1  ;;  %v3657_v63 = vadd.f32 0.18741608, %v3656_v36  ;;  %v3379_v8 = vadd.f32 1.1283791, %v3378_v49 }
 0x8a1   :  { %v6735_v45 = vadd.f32 1.0, %v3669_v55  ;;  %v6752_v23 = vmul.f32 0.5, %v6540_v11  ;;  %v3418_v38 = vmul.f32 %v3417_v14, %v6631_v17  ;;  %v3626_v39 = vadd.f32 0.112945676, %v3625_v44 }
 0x8a2   :  { %v6756_v37 = vmul.f32 %v3299_v12, %v6565_v2  ;;  %v3456_v3 = vmul.f32 %v3455_v4, %v6661_v61  ;;  %v3532_v30 = vmul.f32 %v3531_v54, %v6718_v25  ;;  %v3573_v27 = vadd.f32 0.0036580483, %v3572_v9 }
 0x8a3   :  { %4209 = vrcp.f32 %v6735_v45  ;;  %v6761_v46 = vmul.f32 %v3339_v26, %v6576_v0  ;;  %v6764_v55 = vmul.f32 0.5, %v6542_v16  ;;  %v3615_v24 = vadd.f32 0.05243302, %v3614_v5 }
 0x8a4   :  { %v3627_v11 = vmul.f32 %v3626_v39, %v6686_v20  ;;  %v6768_v62 = vmul.f32 0.5, %v6544_v22  ;;  %v3496_v2 = vmul.f32 %v3495_v60, %v6673_v28  ;;  %v3658_v4 = vmul.f32 %v3657_v63, %v6675_v48 }
 0x8a5   :  { %v3581_v1 = vmul.f32 3.8918573e-05, %v6707_v50  ;;  %v6774_v36 = vmul.f32 %v3379_v8, %v6587_v58  ;;  %v3419_v0 = vadd.f32 1.1283791, %v3418_v38  ;;  %v3457_v49 = vadd.f32 0.18741608, %v3456_v3 }
 0x8a6   :  { %v3628_v12 = vadd.f32 0.4994258, %v3627_v11  ;;  %v3533_v14 = vadd.f32 0.0036580483, %v3532_v30  ;;  %v3574_v19 = vmul.f32 %v3573_v27, %v6707_v50  ;;  %v6779_v22 = vmul.f32 0.5, %v6556_v7 }
 0x8a7   :  { %v3582_v54 = vadd.f32 0.001143296, %v3581_v1  ;;  %v3616_v9 = vmul.f32 %v3615_v24, %v6686_v20  ;;  %v3497_v5 = vadd.f32 0.18741608, %v3496_v2  ;;  %v3659_v58 = vadd.f32 1.1283791, %v3658_v4 }
 0x8a8   :  { %v3629_v26 = vmul.f32 %v3628_v12, %v6686_v20  ;;  %v3682_v44 = vand.u32 2147483648, %v6735_v45  ;;  %v3680_v8 = vand.u32 2147483647, %v6735_v45  ;;  %v3458_v7 = vmul.f32 %v3457_v49, %v6661_v61 }
 0x8a9   :  { %v4210_v51 = vpop.eup %4209  ;;  %v3583_v60 = vmul.f32 %v3582_v54, %v6707_v50  ;;  %v3534_v39 = vmul.f32 %v3533_v14, %v6718_v25  ;;  %v3575_v3 = vadd.f32 0.05243302, %v3574_v19  ;;  %v3617_v27 = vadd.f32 0.18741608, %v3616_v9 }
 0x8aa   :  { %v3672_v16 = vmul.f32 %v4210_v51, %v6735_v45  ;;  %vm3677_vm7 = vweird.f32 %v4210_v51  ;;  %v6786_v38 = vadd.f32 1.0, %v3629_v26  ;;  %vm3676_vm13 = vweird.f32 %v6735_v45 }
 0x8ab   :  { %v3584_v30 = vadd.f32 0.014752088, %v3583_v60  ;;  %v3498_v11 = vmul.f32 %v3497_v5, %v6673_v28  ;;  %vm3678_vm5 = vmor %vm3676_vm13, %vm3677_vm7  ;;  %v3683_v2 = vor.u32 1.1754944e-38, %v3682_v44  ;;  %v3221_v1 = vmul.f32 3.8918573e-05, %v6593_v18 }
 0x8ac   :  { %v3673_v48 = vsub.f32 1.0, %v3672_v16  ;;  %4211 = vrcp.f32 %v6786_v38  ;;  %v6796_v16 = vmul.f32 %v3419_v0, %v6608_v40  ;;  %v3660_v12 = vmul.f32 %v3659_v58, %v6658_v33 }
 0x8ad   :  { %v3585_v4 = vmul.f32 %v3584_v30, %v6707_v50  ;;  %vm3681_vm6 = vcmp.eq.f32.partialorder %v3680_v8, 8.507059e+37  ;;  %v3576_v14 = vmul.f32 %v3575_v3, %v6707_v50  ;;  %v3222_v54 = vadd.f32 0.001143296, %v3221_v1 }
 0x8ae   :  { %v3674_v63 = vmul.f32 %v4210_v51, %v3673_v48  ;;  %v3459_v9 = vadd.f32 1.1283791, %v3458_v7  ;;  %v3618_v48 = vmul.f32 %v3617_v27, %v6686_v20  ;;  %v3261_v5 = vmul.f32 3.8918573e-05, %v6595_v43 }
 0x8af   :  { %v3586_v19 = vadd.f32 0.112945676, %v3585_v4  ;;  %v3499_v44 = vadd.f32 1.1283791, %v3498_v11  ;;  %v3535_v60 = vadd.f32 0.05243302, %v3534_v39  ;;  %v3223_v0 = vmul.f32 %v3222_v54, %v6593_v18 }
 0x8b0   :  { %v3675_v24 = vadd.f32 %v4210_v51, %v3674_v63  ;;  %v3541_v63 = vmul.f32 3.8918573e-05, %v6718_v25  ;;  %v3262_v8 = vadd.f32 0.001143296, %v3261_v5  ;;  %v3577_v3 = vadd.f32 0.18741608, %v3576_v14 }
 0x8b1   :  { %v3587_v40 = vmul.f32 %v3586_v19, %v6707_v50  ;;  %v3224_v30 = vadd.f32 0.014752088, %v3223_v0  ;;  %v3619_v27 = vadd.f32 1.1283791, %v3618_v48  ;;  %v3640_v4 = vand.u32 2147483647, %v6786_v38 }
 0x8b2   :  { %v3679_v49 = vsel %vm3678_vm5, %v4210_v51, %v3675_v24  ;;  %v4212_v33 = vpop.eup %4211  ;;  %v3031_v51 = vmul.f32 0.5, %v6647_v41  ;;  %v3542_v11 = vadd.f32 0.001143296, %v3541_v63  ;;  %v3263_v39 = vmul.f32 %v3262_v8, %v6595_v43 }
 0x8b3   :  { %v3684_v45 = vsel %vm3681_vm6, %v3683_v2, %v3679_v49  ;;  %v3632_v7 = vmul.f32 %v4212_v33, %v6786_v38  ;;  %v3588_v20 = vadd.f32 0.4994258, %v3587_v40  ;;  %v3225_v41 = vmul.f32 %v3224_v30, %v6593_v18 }
 0x8b4   :  { %v3685_v26 = vmul.f32 %v3684_v45, %v3660_v12  ;;  %v3642_v49 = vand.u32 2147483648, %v6786_v38  ;;  %v3543_v14 = vmul.f32 %v3542_v11, %v6718_v25  ;;  %v3264_v45 = vadd.f32 0.014752088, %v3263_v39 }
 0x8b5   :  { %v3633_v2 = vsub.f32 1.0, %v3632_v7  ;;  %v3589_v1 = vmul.f32 %v3588_v20, %v6707_v50  ;;  %vm3637_vm10 = vweird.f32 %v4212_v33  ;;  %v3226_v48 = vadd.f32 0.112945676, %v3225_v41 }
 0x8b6   :  { %v4086_v58 = vclamps-f32 %v3685_v26, 1.0  ;;  %v3536_v26 = vmul.f32 %v3535_v60, %v6718_v25  ;;  %v3544_v5 = vadd.f32 0.014752088, %v3543_v14  ;;  %v3301_v40 = vmul.f32 3.8918573e-05, %v6603_v53 }
 0x8b7   :  { %v3634_v19 = vmul.f32 %v4212_v33, %v3633_v2  ;;  %v6813_v54 = vadd.f32 1.0, %v3589_v1  ;;  %v3265_v0 = vmul.f32 %v3264_v45, %v6595_v43  ;;  %vm3636_vm9 = vweird.f32 %v6786_v38 }
 0x8b8   :  { %v3703_v24 = vadd.f32 1.0, %v4086_v58  ;;  %vm3638_vm11 = vmor %vm3636_vm9, %vm3637_vm10  ;;  %v3643_v63 = vor.u32 1.1754944e-38, %v3642_v49  ;;  %v3545_v8 = vmul.f32 %v3544_v5, %v6718_v25  ;;  %v3302_v7 = vadd.f32 0.001143296, %v3301_v40 }
 0x8b9   :  { %v3635_v58 = vadd.f32 %v4212_v33, %v3634_v19  ;;  %4213 = vrcp.f32 %v6813_v54  ;;  %v3266_v20 = vadd.f32 0.112945676, %v3265_v0  ;;  %v3620_v60 = vmul.f32 %v3619_v27, %v6651_v42 }
 0x8ba   :  { %v3719_v12 = vmul.f32 %v3703_v24, %v3031_v51  ;;  %v3578_v51 = vmul.f32 %v3577_v3, %v6707_v50  ;;  %vm3641_vm12 = vcmp.eq.f32.partialorder %v3640_v4, 8.507059e+37  ;;  %v3227_v24 = vmul.f32 %v3226_v48, %v6593_v18 }
 0x8bb   :  { %v3639_v30 = vsel %vm3638_vm11, %v4212_v33, %v3635_v58  ;;  %v6825_v11 = vmul.f32 0.5, %v6591_v34  ;;  %v3546_v3 = vadd.f32 0.112945676, %v3545_v8  ;;  %v3303_v38 = vmul.f32 %v3302_v7, %v6603_v53 }
 0x8bc   :  { %3727 = vmatpush.msrb.mxu0 %v3719_v12  ;;  %v3644_v50 = vsel %vm3641_vm12, %v3643_v63, %v3639_v30  ;;  %v6829_v39 = vmul.f32 %v3459_v9, %v6634_v47  ;;  %v3537_v2 = vadd.f32 0.18741608, %v3536_v26  ;;  %v3030_v1 = vmul.f32 0.5, %v6625_v6 }
 0x8bd   :  { %v3645_v41 = vmul.f32 %v3644_v50, %v3620_v60  ;;  %v3579_v12 = vadd.f32 1.1283791, %v3578_v51  ;;  %v3547_v42 = vmul.f32 %v3546_v3, %v6718_v25  ;;  %v3304_v33 = vadd.f32 0.014752088, %v3303_v38 }
 0x8be   :  { %v3267_v27 = vmul.f32 %v3266_v20, %v6595_v43  ;;  %v6835_v34 = vmul.f32 %v3499_v44, %v6639_v31  ;;  %v3501_v14 = vmul.f32 3.8918573e-05, %v6673_v28  ;;  %v3228_v45 = vadd.f32 0.4994258, %v3227_v24 }
 0x8bf   :  { %v4214_v4 = vpop.eup %4213  ;;  %v4085_v49 = vclamps-f32 %v3645_v41, 1.0  ;;  %v3600_v9 = vand.u32 2147483647, %v6813_v54  ;;  %v3548_v6 = vadd.f32 0.4994258, %v3547_v42  ;;  %v3602_v26 = vand.u32 2147483648, %v6813_v54 }
 0x8c0   :  { %v3592_v47 = vmul.f32 %v4214_v4, %v6813_v54  ;;  %v3341_v19 = vmul.f32 3.8918573e-05, %v6612_v10  ;;  %v3502_v5 = vadd.f32 0.001143296, %v3501_v14  ;;  %v3305_v40 = vmul.f32 %v3304_v33, %v6603_v53 }
 0x8c1   :  { %v3702_v48 = vadd.f32 1.0, %v4085_v49  ;;  %v3549_v31 = vmul.f32 %v3548_v6, %v6718_v25  ;;  %v3268_v51 = vadd.f32 0.4994258, %v3267_v27  ;;  %v3229_v7 = vmul.f32 %v3228_v45, %v6593_v18 }
 0x8c2   :  { %v3593_v0 = vsub.f32 1.0, %v3592_v47  ;;  %v3342_v44 = vadd.f32 0.001143296, %v3341_v19  ;;  %v3503_v63 = vmul.f32 %v3502_v5, %v6673_v28  ;;  %v3306_v8 = vadd.f32 0.112945676, %v3305_v40 }
 0x8c3   :  { %v3718_v58 = vmul.f32 %v3702_v48, %v3030_v1  ;;  %vm3597_vm0 = vweird.f32 %v4214_v4  ;;  %v6846_v60 = vadd.f32 1.0, %v3549_v31  ;;  %v3538_v24 = vmul.f32 %v3537_v2, %v6718_v25 }
 0x8c4   :  { %v3594_v20 = vmul.f32 %v4214_v4, %v3593_v0  ;;  %v3343_v30 = vmul.f32 %v3342_v44, %v6612_v10  ;;  %vm3596_vm14 = vweird.f32 %v6813_v54  ;;  %v3504_v50 = vadd.f32 0.014752088, %v3503_v63 }
 0x8c5   :  { %3728 = vmatpush.msrb.mxu0 %v3718_v58  ;;  %v3307_v3 = vmul.f32 %v3306_v8, %v6603_v53  ;;  %v3603_v1 = vor.u32 1.1754944e-38, %v3602_v26  ;;  %4215 = vrcp.f32 %v6846_v60  ;;  %v3269_v18 = vmul.f32 %v3268_v51, %v6595_v43  ;;  %vm3598_vm4 = vmor %vm3596_vm14, %vm3597_vm0 }
 0x8c6   :  { %v3595_v38 = vadd.f32 %v4214_v4, %v3594_v20  ;;  %v3505_v41 = vmul.f32 %v3504_v50, %v6673_v28  ;;  %v3344_v42 = vadd.f32 0.014752088, %v3343_v30  ;;  %v6855_v27 = vadd.f32 1.0, %v3229_v7 }
 0x8c7   :  { %v3308_v33 = vadd.f32 0.4994258, %v3307_v3  ;;  %v3580_v25 = vmul.f32 %v3579_v12, %v6681_v56  ;;  %vm3601_vm15 = vcmp.eq.f32.partialorder %v3600_v9, 8.507059e+37  ;;  %v3381_v54 = vmul.f32 3.8918573e-05, %v6619_v35 }
 0x8c8   :  { %v3599_v2 = vsel %vm3598_vm4, %v4214_v4, %v3595_v38  ;;  %v3539_v49 = vadd.f32 1.1283791, %v3538_v24  ;;  %v3506_v45 = vadd.f32 0.112945676, %v3505_v41  ;;  %v3345_v47 = vmul.f32 %v3344_v42, %v6612_v10 }
 0x8c9   :  { %v3604_v14 = vsel %vm3601_vm15, %v3603_v1, %v3599_v2  ;;  %v3382_v43 = vadd.f32 0.001143296, %v3381_v54  ;;  %v3309_v19 = vmul.f32 %v3308_v33, %v6603_v53  ;;  %v3181_v48 = vmul.f32 3.8918573e-05, %v6616_v57 }
 0x8ca   :  { %v3605_v6 = vmul.f32 %v3604_v14, %v3580_v25  ;;  %v3507_v26 = vmul.f32 %v3506_v45, %v6673_v28  ;;  %v3346_v5 = vadd.f32 0.112945676, %v3345_v47  ;;  %v6863_v40 = vadd.f32 1.0, %v3269_v18 }
 0x8cb   :  { %4217 = vrcp.f32 %v6855_v27  ;;  %v4216_v56 = vpop.eup %4215  ;;  %v3461_v4 = vmul.f32 3.8918573e-05, %v6661_v61  ;;  %v3383_v9 = vmul.f32 %v3382_v43, %v6619_v35  ;;  %v6868_v0 = vadd.f32 1.0, %v3309_v19 }
 0x8cc   :  { %v4084_v12 = vclamps-f32 %v3605_v6, 1.0  ;;  %v3552_v31 = vmul.f32 %v4216_v56, %v6846_v60  ;;  %v3560_v53 = vand.u32 2147483647, %v6846_v60  ;;  %v3508_v44 = vadd.f32 0.4994258, %v3507_v26 }
 0x8cd   :  { %v3347_v51 = vmul.f32 %v3346_v5, %v6612_v10  ;;  %v3462_v63 = vadd.f32 0.001143296, %v3461_v4  ;;  %v3384_v8 = vadd.f32 0.014752088, %v3383_v9  ;;  %4219 = vrcp.f32 %v6868_v0 }
 0x8ce   :  { %v3701_v58 = vadd.f32 1.0, %v4084_v12  ;;  %v3553_v7 = vsub.f32 1.0, %v3552_v31  ;;  %v3562_v20 = vand.u32 2147483648, %v6846_v60  ;;  %v3509_v30 = vmul.f32 %v3508_v44, %v6673_v28 }
 0x8cf   :  { %v3348_v24 = vadd.f32 0.4994258, %v3347_v51  ;;  %v3463_v3 = vmul.f32 %v3462_v63, %v6661_v61  ;;  %v3421_v38 = vmul.f32 3.8918573e-05, %v6631_v17  ;;  %v3385_v1 = vmul.f32 %v3384_v8, %v6619_v35 }
 0x8d0   :  { %v3717_v50 = vmul.f32 %v3701_v58, %v6825_v11  ;;  %v3554_v41 = vmul.f32 %v4216_v56, %v3553_v7  ;;  %vm3557_vm2 = vweird.f32 %v4216_v56  ;;  %v6882_v42 = vadd.f32 1.0, %v3509_v30 }
 0x8d1   :  { %v6880_v18 = vpop.eup %4217  ;;  %v3349_v33 = vmul.f32 %v3348_v24, %v6612_v10  ;;  %v3464_v25 = vadd.f32 0.014752088, %v3463_v3  ;;  %v3422_v28 = vadd.f32 0.001143296, %v3421_v38  ;;  %v3386_v2 = vadd.f32 0.112945676, %v3385_v1 }
 0x8d2   :  { %3729 = vmatpush.msrb.mxu0 %v3717_v50  ;;  %4221 = vrcp.f32 %v6863_v40  ;;  %v3555_v11 = vadd.f32 %v4216_v56, %v3554_v41  ;;  %vm3556_vm8 = vweird.f32 %v6846_v60  ;;  %v3182_v54 = vadd.f32 0.001143296, %v3181_v48 }
 0x8d3   :  { %4223 = vrcp.f32 %v6882_v42  ;;  %v6888_v14 = vpop.eup %4219  ;;  %vm3558_vm3 = vmor %vm3556_vm8, %vm3557_vm2  ;;  %v3563_v45 = vor.u32 1.1754944e-38, %v3562_v20  ;;  %v3465_v47 = vmul.f32 %v3464_v25, %v6661_v61  ;;  %v3423_v10 = vmul.f32 %v3422_v28, %v6631_v17 }
 0x8d4   :  { %v3387_v6 = vmul.f32 %v3386_v2, %v6619_v35  ;;  %v3540_v43 = vmul.f32 %v3539_v49, %v6691_v52  ;;  %v3559_v19 = vsel %vm3558_vm3, %v4216_v56, %v3555_v11  ;;  %vm3561_vm7 = vcmp.eq.f32.partialorder %v3560_v53, 8.507059e+37 }
 0x8d5   :  { %v6894_v26 = vadd.f32 1.0, %v3349_v33  ;;  %v3564_v60 = vsel %vm3561_vm7, %v3563_v45, %v3559_v19  ;;  %v3466_v5 = vadd.f32 0.112945676, %v3465_v47  ;;  %v3424_v12 = vadd.f32 0.014752088, %v3423_v10 }
 0x8d6   :  { %v3312_v48 = vmul.f32 %v6888_v14, %v6868_v0  ;;  %v3565_v4 = vmul.f32 %v3564_v60, %v3540_v43  ;;  %v3388_v9 = vadd.f32 0.4994258, %v3387_v6  ;;  %v6900_v31 = vmul.f32 %v3182_v54, %v6616_v57 }
 0x8d7   :  { %4225 = vrcp.f32 %v6894_v26  ;;  %v3467_v52 = vmul.f32 %v3466_v5, %v6661_v61  ;;  %v3425_v49 = vmul.f32 %v3424_v12, %v6631_v17  ;;  %v3280_v56 = vand.u32 2147483647, %v6863_v40 }
 0x8d8   :  { %v6902_v44 = vpop.eup %4221  ;;  %v3282_v53 = vand.u32 2147483648, %v6863_v40  ;;  %v4083_v58 = vclamps-f32 %v3565_v4, 1.0  ;;  %v3389_v63 = vmul.f32 %v3388_v9, %v6619_v35  ;;  %v3320_v8 = vand.u32 2147483647, %v6868_v0 }
 0x8d9   :  { %v4224_v51 = vpop.eup %4223  ;;  %v6912_v7 = vmul.f32 %v6880_v18, %v6855_v27  ;;  %v3468_v30 = vadd.f32 0.4994258, %v3467_v52  ;;  %v3426_v24 = vadd.f32 0.112945676, %v3425_v49  ;;  %v3313_v50 = vsub.f32 1.0, %v3312_v48 }
 0x8da   :  { %v3512_v20 = vmul.f32 %v4224_v51, %v6882_v42  ;;  %v3700_v3 = vadd.f32 1.0, %v4083_v58  ;;  %v3520_v38 = vand.u32 2147483647, %v6882_v42  ;;  %v6916_v1 = vadd.f32 1.0, %v3389_v63 }
 0x8db   :  { %v6920_v41 = vmul.f32 %v6902_v44, %v6863_v40  ;;  %v3522_v33 = vand.u32 2147483648, %v6882_v42  ;;  %v3469_v25 = vmul.f32 %v3468_v30, %v6661_v61  ;;  %v3427_v28 = vmul.f32 %v3426_v24, %v6631_v17 }
 0x8dc   :  { %v3513_v35 = vsub.f32 1.0, %v3512_v20  ;;  %v3716_v11 = vmul.f32 %v3700_v3, %v6779_v22  ;;  %vm3517_vm13 = vweird.f32 %v4224_v51  ;;  %4227 = vrcp.f32 %v6916_v1 }
 0x8dd   :  { %v6925_v2 = vpop.eup %4225  ;;  %v3362_v54 = vand.u32 2147483648, %v6894_v26  ;;  %vm3316_vm5 = vweird.f32 %v6868_v0  ;;  %v6931_v47 = vadd.f32 1.0, %v3469_v25  ;;  %v3428_v10 = vadd.f32 0.4994258, %v3427_v28 }
 0x8de   :  { %v3514_v45 = vmul.f32 %v4224_v51, %v3513_v35  ;;  %v3314_v6 = vmul.f32 %v6888_v14, %v3313_v50  ;;  %3730 = vmatpush.msrb.mxu0 %v3716_v11  ;;  %vm3516_vm6 = vweird.f32 %v6882_v42  ;;  %vm6935_vm10 = vcmp.eq.f32.partialorder %v3520_v38, 8.507059e+37 }
 0x8df   :  { %v3352_v22 = vmul.f32 %v6925_v2, %v6894_v26  ;;  %v3360_v43 = vand.u32 2147483647, %v6894_v26  ;;  %v3523_v60 = vor.u32 1.1754944e-38, %v3522_v33  ;;  %4229 = vrcp.f32 %v6931_v47  ;;  %vm3518_vm9 = vmor %vm3516_vm6, %vm3517_vm13 }
 0x8e0   :  { %v3515_v19 = vadd.f32 %v4224_v51, %v3514_v45  ;;  %v3400_v5 = vand.u32 2147483647, %v6916_v1  ;;  %v3429_v12 = vmul.f32 %v3428_v10, %v6631_v17  ;;  %vm3356_vm11 = vweird.f32 %v6894_v26 }
 0x8e1   :  { %v3353_v42 = vsub.f32 1.0, %v3352_v22  ;;  %vm3317_vm12 = vweird.f32 %v6888_v14  ;;  %v3402_v4 = vand.u32 2147483648, %v6916_v1  ;;  %v3363_v9 = vor.u32 1.1754944e-38, %v3362_v54 }
 0x8e2   :  { %v3519_v48 = vsel %vm3518_vm9, %v4224_v51, %v3515_v19  ;;  %v3315_v52 = vadd.f32 %v6888_v14, %v3314_v6  ;;  %v4228_v49 = vpop.eup %4227  ;;  %v3480_v63 = vand.u32 2147483647, %v6931_v47  ;;  %v6953_v20 = vadd.f32 1.0, %v3429_v12  ;;  %vm6976_vm8 = vmor %vm3316_vm5, %vm3317_vm12 }
 0x8e3   :  { %v3524_v58 = vsel %vm6935_vm10, %v3523_v60, %v3519_v48  ;;  %v3354_v17 = vmul.f32 %v6925_v2, %v3353_v42  ;;  %vm6956_vm0 = vcmp.eq.f32.partialorder %v3360_v43, 8.507059e+37  ;;  %v3392_v24 = vmul.f32 %v4228_v49, %v6916_v1 }
 0x8e4   :  { %v3525_v51 = vmul.f32 %v3524_v58, %v6835_v34  ;;  %vm3396_vm14 = vweird.f32 %v6916_v1  ;;  %vm6963_vm4 = vcmp.eq.f32.partialorder %v3400_v5, 8.507059e+37  ;;  %vm3476_vm15 = vweird.f32 %v6931_v47 }
 0x8e5   :  { %v3482_v3 = vand.u32 2147483648, %v6931_v47  ;;  %4231 = vrcp.f32 %v6953_v20  ;;  %vm3357_vm2 = vweird.f32 %v6925_v2  ;;  %v4230_v38 = vpop.eup %4229  ;;  %v3393_v33 = vsub.f32 1.0, %v3392_v24 }
 0x8e6   :  { %v4082_v35 = vclamps-f32 %v3525_v51, 1.0  ;;  %v3355_v34 = vadd.f32 %v6925_v2, %v3354_v17  ;;  %v3322_v28 = vand.u32 2147483648, %v6868_v0  ;;  %v3472_v11 = vmul.f32 %v4230_v38, %v6931_v47  ;;  %vm6994_vm5 = vmor %vm3356_vm11, %vm3357_vm2 }
 0x8e7   :  { %vm6982_vm3 = vcmp.eq.f32.partialorder %v3480_v63, 8.507059e+37  ;;  %v3403_v45 = vor.u32 1.1754944e-38, %v3402_v4  ;;  %v3319_v10 = vsel %vm6976_vm8, %v6888_v14, %v3315_v52  ;;  %vm3276_vm7 = vweird.f32 %v6863_v40 }
 0x8e8   :  { %v3699_v6 = vadd.f32 1.0, %v4082_v35  ;;  %v3394_v61 = vmul.f32 %v4228_v49, %v3393_v33  ;;  %vm3397_vm13 = vweird.f32 %v4228_v49  ;;  %vm7000_vm6 = vcmp.eq.f32.partialorder %v3320_v8, 8.507059e+37 }
 0x8e9   :  { %v3473_v14 = vsub.f32 1.0, %v3472_v11  ;;  %v3483_v19 = vor.u32 1.1754944e-38, %v3482_v3  ;;  %v3359_v60 = vsel %vm6994_vm5, %v6925_v2, %v3355_v34  ;;  %v3273_v5 = vsub.f32 1.0, %v6920_v41  ;;  %vm3398_vm9 = vmor %vm3396_vm14, %vm3397_vm13 }
 0x8ea   :  { %v3715_v26 = vmul.f32 %v3699_v6, %v6768_v62  ;;  %v3440_v12 = vand.u32 2147483647, %v6953_v20  ;;  %v3395_v42 = vadd.f32 %v4228_v49, %v3394_v61  ;;  %v3323_v48 = vor.u32 1.1754944e-38, %v3322_v28 }
 0x8eb   :  { %v4232_v4 = vpop.eup %4231  ;;  %v3474_v0 = vmul.f32 %v4230_v38, %v3473_v14  ;;  %vm3477_vm10 = vweird.f32 %v4230_v38  ;;  %v3442_v8 = vand.u32 2147483648, %v6953_v20  ;;  %v3274_v52 = vmul.f32 %v6902_v44, %v3273_v5 }
 0x8ec   :  { %vm7017_vm11 = vcmp.eq.f32.partialorder %v3280_v56, 8.507059e+37  ;;  %3731 = vmatpush.msrb.mxu0 %v3715_v26  ;;  %v3432_v62 = vmul.f32 %v4232_v4, %v6953_v20  ;;  %v3399_v2 = vsel %vm3398_vm9, %v4228_v49, %v3395_v42  ;;  %v3364_v58 = vsel %vm6956_vm0, %v3363_v9, %v3359_v60  ;;  %vm3478_vm14 = vmor %vm3476_vm15, %vm3477_vm10 }
 0x8ed   :  { %v3324_v63 = vsel %vm7000_vm6, %v3323_v48, %v3319_v10  ;;  %v3475_v1 = vadd.f32 %v4230_v38, %v3474_v0  ;;  %v3404_v17 = vsel %vm6963_vm4, %v3403_v45, %v3399_v2  ;;  %v3275_v51 = vadd.f32 %v6902_v44, %v3274_v52  ;;  %v7423_v52 = vld [vmem:[#allocation12_spill] sm:$0xff] }
 0x8ee   :  { %vm3277_vm12 = vweird.f32 %v6902_v44  ;;  %v3433_v56 = vsub.f32 1.0, %v3432_v62  ;;  %vm3436_vm2 = vweird.f32 %v6953_v20  ;;  %vm7033_vm8 = vcmp.eq.f32.partialorder %v3440_v12, 8.507059e+37 }
 0x8ef   :  { %v3233_v9 = vsub.f32 1.0, %v6912_v7  ;;  %v3479_v30 = vsel %vm3478_vm14, %v4230_v38, %v3475_v1  ;;  %v3443_v24 = vor.u32 1.1754944e-38, %v3442_v8  ;;  %v3365_v50 = vmul.f32 %v3364_v58, %v6761_v46  ;;  %vm7045_vm4 = vmor %vm3276_vm7, %vm3277_vm12 }
 0x8f0   :  { %v3325_v3 = vmul.f32 %v3324_v63, %v6756_v37  ;;  %v3484_v35 = vsel %vm6982_vm3, %v3483_v19, %v3479_v30  ;;  %v3434_v47 = vmul.f32 %v4232_v4, %v3433_v56  ;;  %vm3437_vm0 = vweird.f32 %v4232_v4 }
 0x8f1   :  { %v3405_v33 = vmul.f32 %v3404_v17, %v6774_v36  ;;  %v3485_v7 = vmul.f32 %v3484_v35, %v6829_v39  ;;  %v3279_v46 = vsel %vm7045_vm4, %v6902_v44, %v3275_v51  ;;  %v3234_v37 = vmul.f32 %v6880_v18, %v3233_v9  ;;  %vm3438_vm7 = vmor %vm3436_vm2, %vm3437_vm0  ;;  %v7424_v51 = vld [vmem:[#allocation18_spill] sm:$0xff]  ;;  %v7425_v35 = vld [vmem:[#allocation17_spill] sm:$0xff] }
 0x8f2   :  { %vm3237_vm15 = vweird.f32 %v6880_v18  ;;  %v3435_v38 = vadd.f32 %v4232_v4, %v3434_v47  ;;  %v3283_v36 = vor.u32 1.1754944e-38, %v3282_v53  ;;  %vm3236_vm3 = vweird.f32 %v6855_v27 }
 0x8f3   :  { %v3240_v25 = vand.u32 2147483647, %v6855_v27  ;;  %v4081_v28 = vclamps-f32 %v3485_v7, 1.0  ;;  %v3235_v39 = vadd.f32 %v6880_v18, %v3234_v37  ;;  %v3242_v44 = vand.u32 2147483648, %v6855_v27  ;;  %vm3238_vm13 = vmor %vm3236_vm3, %vm3237_vm15  ;;  %v7426_v7 = vld [vmem:[#allocation23_spill] sm:$0xff] }
 0x8f4   :  { %v3184_v11 = vadd.f32 0.014752088, %v6900_v31  ;;  %v3439_v54 = vsel %vm3438_vm7, %v4232_v4, %v3435_v38  ;;  %v4079_v45 = vclamps-f32 %v3405_v33, 1.0  ;;  %v4077_v10 = vclamps-f32 %v3325_v3, 1.0 }
 0x8f5   :  { %v3284_v40 = vsel %vm7017_vm11, %v3283_v36, %v3279_v46  ;;  %v3698_v53 = vadd.f32 1.0, %v4081_v28  ;;  %v3444_v6 = vsel %vm7033_vm8, %v3443_v24, %v3439_v54  ;;  %v3239_v20 = vsel %vm3238_vm13, %v6880_v18, %v3235_v39  ;;  %v7428_v54 = vld [vmem:[#allocation21_spill] sm:$0xff] }
 0x8f6   :  { %v3243_v61 = vor.u32 1.1754944e-38, %v3242_v44  ;;  %v3445_v22 = vmul.f32 %v3444_v6, %v6796_v16  ;;  %vm3241_vm5 = vcmp.eq.f32.partialorder %v3240_v25, 8.507059e+37  ;;  %v3185_v27 = vmul.f32 %v3184_v11, %v6616_v57  ;;  %v7427_v25 = vld [vmem:[#allocation16_spill] sm:$0xff] }
 0x8f7   :  { %v3141_v31 = vmul.f32 3.8918573e-05, %v6614_v32  ;;  %v3714_v43 = vmul.f32 %v3698_v53, %v6764_v55  ;;  %v3101_v19 = vmul.f32 3.8918573e-05, %v6569_v29  ;;  %v3061_v60 = vmul.f32 3.8918573e-05, %v6567_v13 }
 0x8f8   :  { %v3244_v14 = vsel %vm3241_vm5, %v3243_v61, %v3239_v20  ;;  %v4080_v5 = vclamps-f32 %v3445_v22, 1.0  ;;  %v4078_v26 = vclamps-f32 %v3365_v50, 1.0  ;;  %v3285_v12 = vmul.f32 %v3284_v40, %v6749_v21  ;;  %v7429_v53 = vld [vmem:[#allocation8_spill] sm:$0xff] }
 0x8f9   :  { %v3186_v18 = vadd.f32 0.112945676, %v3185_v27  ;;  %3732 = vmatpush.msrb.mxu0 %v3714_v43  ;;  %v3142_v42 = vadd.f32 0.001143296, %v3141_v31  ;;  %v3102_v16 = vadd.f32 0.001143296, %v3101_v19  ;;  %v3245_v8 = vmul.f32 %v3244_v14, %v6746_v15 }
 0x8fa   :  { %v3062_v48 = vadd.f32 0.001143296, %v3061_v60  ;;  %v3697_v4 = vadd.f32 1.0, %v4080_v5  ;;  %v3696_v0 = vadd.f32 1.0, %v4079_v45  ;;  %v3024_v41 = vmul.f32 0.5, %v7423_v52  ;;  %v7430_v27 = vld [vmem:[#allocation19_spill] sm:$0xff] }
 0x8fb   :  { %v3187_v55 = vmul.f32 %v3186_v18, %v6616_v57  ;;  %v3143_v62 = vmul.f32 %v3142_v42, %v6614_v32  ;;  %v3103_v2 = vmul.f32 %v3102_v16, %v6569_v29  ;;  %v3695_v63 = vadd.f32 1.0, %v4078_v26 }
 0x8fc   :  { %v3063_v58 = vmul.f32 %v3062_v48, %v6567_v13  ;;  %v3713_v21 = vmul.f32 %v3697_v4, %v6752_v23  ;;  %v4076_v1 = vclamps-f32 %v3285_v12, 1.0  ;;  %v3056_v56 = vmul.f32 %v7424_v51, %v6567_v13 }
 0x8fd   :  { %v3188_v17 = vadd.f32 0.4994258, %v3187_v55  ;;  %v3144_v49 = vadd.f32 0.014752088, %v3143_v62  ;;  %v3104_v15 = vadd.f32 0.014752088, %v3103_v2  ;;  %v3712_v30 = vmul.f32 %v3696_v0, %v3024_v41 }
 0x8fe   :  { %v3064_v9 = vadd.f32 0.014752088, %v3063_v58  ;;  %3733 = vmatpush.msrb.mxu0 %v3713_v21  ;;  %v3694_v24 = vadd.f32 1.0, %v4077_v10  ;;  %v4075_v50 = vclamps-f32 %v3245_v8, 1.0  ;;  %v3176_v47 = vmul.f32 %v7425_v35, %v6616_v57  ;;  %v7433_v35 = vld [vmem:[#allocation15_spill] sm:$0xff] }
 0x8ff   :  { %v3189_v3 = vmul.f32 %v3188_v17, %v6616_v57  ;;  %v3145_v23 = vmul.f32 %v3144_v49, %v6614_v32  ;;  %v3105_v33 = vmul.f32 %v3104_v15, %v6569_v29  ;;  %v3022_v46 = vmul.f32 0.5, %v7426_v7 }
 0x900   :  { %v3065_v34 = vmul.f32 %v3064_v9, %v6567_v13  ;;  %3734 = vmatpush.msrb.mxu0 %v3712_v30  ;;  %v3711_v37 = vmul.f32 %v3695_v63, %v6741_v59  ;;  %v3693_v38 = vadd.f32 1.0, %v4076_v1  ;;  %v3096_v28 = vmul.f32 %v7427_v25, %v6569_v29  ;;  %v7432_v30 = vld [vmem:[#allocation9_spill] sm:$0xff] }
 0x901   :  { %v3190_v36 = vadd.f32 1.0, %v3189_v3  ;;  %v3146_v39 = vadd.f32 0.112945676, %v3145_v23  ;;  %v3106_v44 = vadd.f32 0.112945676, %v3105_v33  ;;  %v3021_v45 = vmul.f32 0.5, %v7428_v54 }
 0x902   :  { %v3066_v11 = vadd.f32 0.112945676, %v3065_v34  ;;  %3735 = vmatpush.msrb.mxu0 %v3711_v37  ;;  %v3710_v10 = vmul.f32 %v3694_v24, %v3022_v46  ;;  %v3692_v40 = vadd.f32 1.0, %v4075_v50  ;;  %v3136_v6 = vmul.f32 %v7429_v53, %v6614_v32  ;;  %v7434_v23 = vld [vmem:[#allocation10_spill] sm:$0xff] }
 0x903   :  { %4233 = vrcp.f32 %v3190_v36  ;;  %v3147_v20 = vmul.f32 %v3146_v39, %v6614_v32  ;;  %v3107_v59 = vmul.f32 %v3106_v44, %v6569_v29  ;;  %v3177_v22 = vadd.f32 0.18741608, %v3176_v47  ;;  %v7435_v37 = vld [vmem:[#allocation14_spill] sm:$0xff] }
 0x904   :  { %v3067_v61 = vmul.f32 %v3066_v11, %v6567_v13  ;;  %v3020_v31 = vmul.f32 0.5, %v7430_v27  ;;  %3736 = vmatpush.msrb.mxu0 %v3710_v10  ;;  %v3709_v43 = vmul.f32 %v3693_v38, %v3021_v45  ;;  %v3057_v5 = vadd.f32 0.18741608, %v3056_v56 }
 0x905   :  { %v3148_v14 = vadd.f32 0.4994258, %v3147_v20  ;;  %v3108_v19 = vadd.f32 0.4994258, %v3107_v59  ;;  %v3097_v26 = vadd.f32 0.18741608, %v3096_v28  ;;  %v3178_v0 = vmul.f32 %v3177_v22, %v6616_v57 }
 0x906   :  { %v3068_v60 = vadd.f32 0.4994258, %v3067_v61  ;;  %3737 = vmatpush.msrb.mxu0 %v3709_v43  ;;  %v3708_v12 = vmul.f32 %v3692_v40, %v3020_v31  ;;  %v3137_v18 = vadd.f32 0.18741608, %v3136_v6  ;;  %v3058_v41 = vmul.f32 %v3057_v5, %v6567_v13 }
 0x907   :  { %v3149_v42 = vmul.f32 %v3148_v14, %v6614_v32  ;;  %v3109_v16 = vmul.f32 %v3108_v19, %v6569_v29  ;;  %v3098_v62 = vmul.f32 %v3097_v26, %v6569_v29  ;;  %v3179_v63 = vadd.f32 1.1283791, %v3178_v0 }
 0x908   :  { %v3069_v48 = vmul.f32 %v3068_v60, %v6567_v13  ;;  %3738 = vmatpush.msrb.mxu0 %v3708_v12  ;;  %v3138_v58 = vmul.f32 %v3137_v18, %v6614_v32  ;;  %v3202_v1 = vand.u32 2147483648, %v3190_v36  ;;  %v3200_v17 = vand.u32 2147483647, %v3190_v36  ;;  %v7431_v32 = vld [vmem:[#allocation7_spill] sm:$0xff] }
 0x909   :  { %v4234_v4 = vpop.eup %4233  ;;  %v3150_v55 = vadd.f32 1.0, %v3149_v42  ;;  %v7106_v52 = vadd.f32 1.0, %v3109_v16  ;;  %v3059_v51 = vadd.f32 1.1283791, %v3058_v41  ;;  %v3099_v56 = vadd.f32 1.1283791, %v3098_v62 }
 0x90a   :  { %v3192_v8 = vmul.f32 %v4234_v4, %v3190_v36  ;;  %v7110_v2 = vadd.f32 1.0, %v3069_v48  ;;  %vm3197_vm6 = vweird.f32 %v4234_v4  ;;  %v3139_v13 = vadd.f32 1.1283791, %v3138_v58  ;;  %v7436_v62 = vld [vmem:[#allocation22_spill] sm:$0xff] }
 0x90b   :  { %4235 = vrcp.f32 %v3150_v55  ;;  %vm3196_vm10 = vweird.f32 %v3190_v36  ;;  %v3203_v29 = vor.u32 1.1754944e-38, %v3202_v1  ;;  %v3019_v9 = vmul.f32 0.5, %v7431_v32  ;;  %v7437_v1 = vld [vmem:[#allocation11_spill] sm:$0xff]  ;;  %v3725_v32 = vpop.permute.xlu0 %3724 }
 0x90c   :  { %v3193_v21 = vsub.f32 1.0, %v3192_v8  ;;  %4237 = vrcp.f32 %v7106_v52  ;;  %vm3198_vm9 = vmor %vm3196_vm10, %vm3197_vm6  ;;  %v3180_v24 = vmul.f32 %v3179_v63, %v7432_v30  ;;  %vm3201_vm11 = vcmp.eq.f32.partialorder %v3200_v17, 8.507059e+37 }
 0x90d   :  { %4239 = vrcp.f32 %v7110_v2  ;;  %v3060_v47 = vmul.f32 %v3059_v51, %v7433_v35  ;;  %v3100_v33 = vmul.f32 %v3099_v56, %v7434_v23  ;;  %v3140_v38 = vmul.f32 %v3139_v13, %v7435_v37  ;;  %v7438_v56 = vld [vmem:[#allocation13_spill] sm:$0xff] }
 0x90e   :  { %v3194_v57 = vmul.f32 %v4234_v4, %v3193_v21  ;;  %vm3156_vm12 = vweird.f32 %v3150_v55  ;;  %v3160_v39 = vand.u32 2147483647, %v3150_v55  ;;  %v3162_v44 = vand.u32 2147483648, %v3150_v55 }
 0x90f   :  { %vm3116_vm14 = vweird.f32 %v7106_v52  ;;  %v3120_v10 = vand.u32 2147483647, %v7106_v52  ;;  %v3122_v53 = vand.u32 2147483648, %v7106_v52  ;;  %v3082_v61 = vand.u32 2147483648, %v7110_v2 }
 0x910   :  { %v3195_v49 = vadd.f32 %v4234_v4, %v3194_v57  ;;  %v3080_v31 = vand.u32 2147483647, %v7110_v2  ;;  %vm3161_vm15 = vcmp.eq.f32.partialorder %v3160_v39, 8.507059e+37  ;;  %v3163_v14 = vor.u32 1.1754944e-38, %v3162_v44 }
 0x911   :  { %v4236_v15 = vpop.eup %4235  ;;  %v3123_v5 = vor.u32 1.1754944e-38, %v3122_v53  ;;  %vm3076_vm7 = vweird.f32 %v7110_v2  ;;  %vm3121_vm13 = vcmp.eq.f32.partialorder %v3120_v10, 8.507059e+37  ;;  %v3083_v42 = vor.u32 1.1754944e-38, %v3082_v61 }
 0x912   :  { %v3199_v50 = vsel %vm3198_vm9, %v4234_v4, %v3195_v49  ;;  %v4238_v3 = vpop.eup %4237  ;;  %v3152_v7 = vmul.f32 %v4236_v15, %v3150_v55  ;;  %vm3157_vm2 = vweird.f32 %v4236_v15  ;;  %vm3081_vm6 = vcmp.eq.f32.partialorder %v3080_v31, 8.507059e+37 }
 0x913   :  { %v3204_v34 = vsel %vm3201_vm11, %v3203_v29, %v3199_v50  ;;  %v4240_v46 = vpop.eup %4239  ;;  %v3112_v25 = vmul.f32 %v4238_v3, %v7106_v52  ;;  %vm3117_vm8 = vweird.f32 %v4238_v3  ;;  %vm3158_vm4 = vmor %vm3156_vm12, %vm3157_vm2  ;;  %v3018_v58 = vmul.f32 0.5, %v7436_v62  ;;  %v7440_v62 = vld [vmem:[#allocation20_spill] sm:$0xff] }
 0x914   :  { %v3205_v36 = vmul.f32 %v3204_v34, %v3180_v24  ;;  %v3153_v28 = vsub.f32 1.0, %v3152_v7  ;;  %v3072_v11 = vmul.f32 %v4240_v46, %v7110_v2  ;;  %vm3077_vm0 = vweird.f32 %v4240_v46  ;;  %vm3118_vm3 = vmor %vm3116_vm14, %vm3117_vm8 }
 0x915   :  { %v3113_v45 = vsub.f32 1.0, %v3112_v25  ;;  %vm3078_vm5 = vmor %vm3076_vm7, %vm3077_vm0  ;;  %v3017_v57 = vmul.f32 0.5, %v7437_v1  ;;  %v3016_v13 = vmul.f32 0.5, %v7438_v56 }
 0x916   :  { %v4074_v54 = vclamps-f32 %v3205_v36, 1.0  ;;  %v3154_v40 = vmul.f32 %v4236_v15, %v3153_v28  ;;  %v3073_v6 = vsub.f32 1.0, %v3072_v11 }
 0x917   :  { %v3114_v59 = vmul.f32 %v4238_v3, %v3113_v45 }
 0x918   :  { %v3691_v20 = vadd.f32 1.0, %v4074_v54  ;;  %v3155_v22 = vadd.f32 %v4236_v15, %v3154_v40  ;;  %v3074_v27 = vmul.f32 %v4240_v46, %v3073_v6 }
 0x919   :  { %v3115_v19 = vadd.f32 %v4238_v3, %v3114_v59 }
 0x91a   :  { %v3707_v43 = vmul.f32 %v3691_v20, %v3019_v9  ;;  %v3159_v60 = vsel %vm3158_vm4, %v4236_v15, %v3155_v22  ;;  %v3075_v26 = vadd.f32 %v4240_v46, %v3074_v27  ;;  %v4087_v15 = vld [vmem:[%s7150_s2 + $0x18] sm:$0xff] }
 0x91b   :  { %v3164_v12 = vsel %vm3161_vm15, %v3163_v14, %v3159_v60  ;;  %v3119_v18 = vsel %vm3118_vm3, %v4238_v3, %v3115_v19 }
 0x91c   :  { %3739 = vmatpush.msrb.mxu0 %v3707_v43  ;;  %v3165_v16 = vmul.f32 %v3164_v12, %v3140_v38  ;;  %v3124_v48 = vsel %vm3121_vm13, %v3123_v5, %v3119_v18  ;;  %v3079_v4 = vsel %vm3078_vm5, %v4240_v46, %v3075_v26 }
 0x91d   :  { %v3125_v0 = vmul.f32 %v3124_v48, %v3100_v33  ;;  %v3084_v8 = vsel %vm3081_vm6, %v3083_v42, %v3079_v4 }
 0x91e   :  { %v4073_v55 = vclamps-f32 %v3165_v16, 1.0  ;;  %v3085_v52 = vmul.f32 %v3084_v8, %v3060_v47  ;;  %v7439_v16 = vld [vmem:[#allocation24_spill] sm:$0xff] }
 0x91f   :  { %v4072_v41 = vclamps-f32 %v3125_v0, 1.0 }
 0x920   :  { %v3690_v21 = vadd.f32 1.0, %v4073_v55  ;;  %v4071_v2 = vclamps-f32 %v3085_v52, 1.0 }
 0x921   :  { %v3689_v63 = vadd.f32 1.0, %v4072_v41 }
 0x922   :  { %v3706_v17 = vmul.f32 %v3690_v21, %v3018_v58  ;;  %v3688_v51 = vadd.f32 1.0, %v4071_v2 }
 0x923   :  { %v3705_v49 = vmul.f32 %v3689_v63, %v3017_v57 }
 0x924   :  { %3740 = vmatpush.msrb.mxu0 %v3706_v17  ;;  %v3704_v29 = vmul.f32 %v3688_v51, %v3016_v13 }
 0x926   :  { %3741 = vmatpush.msrb.mxu0 %v3705_v49 }
 0x928   :  { %3742 = vmatpush.msrb.mxu0 %v3704_v29 }
 0x929   :  { %3743 = vmatmul.f32.vlgmr.msrb.gmra.mxu0 %v4087_v15 }
 0x9a6   :  { %v3744_v9 = vpop.f32.mrf.mxu0 }
 0x9a7   :  { %v3745_v30 = vadd.f32 %v3744_v9, %v3725_v32 }
 0x9a9   :  { %v3748_v24 = vmul.f32 0.70710677, %v3745_v30  ;;  %v3747_v12 = vmul.f32 0.5, %v3745_v30 }
 0x9ab   :  { %v3749_v50 = vmul.f32 %v3748_v24, %v3748_v24 }
 0x9ad   :  { %v3750_v3 = vmin.f32 %v3749_v50, 16.0 }
 0x9af   :  { %v3751_v35 = vmul.f32 2.1237322e-06, %v3750_v3  ;;  %v3762_v47 = vmul.f32 3.8918573e-05, %v3750_v3 }
 0x9b1   :  { %v3752_v23 = vadd.f32 0.00028619796, %v3751_v35  ;;  %v3763_v33 = vadd.f32 0.001143296, %v3762_v47  ;;  %v3823_v35 = vpop.permute.xlu1 %3822 }
 0x9b3   :  { %v3753_v34 = vmul.f32 %v3752_v23, %v3750_v3  ;;  %v3764_v7 = vmul.f32 %v3763_v33, %v3750_v3  ;;  %v3829_v23 = vpop.permute.xlu2 %3828 }
 0x9b5   :  { %v3765_v46 = vadd.f32 0.014752088, %v3764_v7  ;;  %v3754_v37 = vadd.f32 0.0036580483, %v3753_v34  ;;  %v3832_v34 = vld [vmem:[%s7152_s4] sm:$0x1] }
 0x9b7   :  { %v3766_v38 = vmul.f32 %v3765_v46, %v3750_v3  ;;  %v3755_v25 = vmul.f32 %v3754_v37, %v3750_v3 }
 0x9b9   :  { %v3767_v36 = vadd.f32 0.112945676, %v3766_v38  ;;  %v3756_v44 = vadd.f32 0.05243302, %v3755_v25 }
 0x9bb   :  { %v3768_v28 = vmul.f32 %v3767_v36, %v3750_v3  ;;  %v3757_v45 = vmul.f32 %v3756_v44, %v3750_v3 }
 0x9bd   :  { %v3769_v39 = vadd.f32 0.4994258, %v3768_v28  ;;  %v3758_v10 = vadd.f32 0.18741608, %v3757_v45 }
 0x9bf   :  { %v3770_v11 = vmul.f32 %v3769_v39, %v3750_v3  ;;  %v3759_v53 = vmul.f32 %v3758_v10, %v3750_v3 }
 0x9c1   :  { %v3771_v54 = vadd.f32 1.0, %v3770_v11  ;;  %v3760_v61 = vadd.f32 1.1283791, %v3759_v53 }
 0x9c3   :  { %4241 = vrcp.f32 %v3771_v54  ;;  %v3783_v59 = vand.u32 2147483648, %v3771_v54  ;;  %v3781_v27 = vand.u32 2147483647, %v3771_v54  ;;  %vm3777_vm9 = vweird.f32 %v3771_v54 }
 0x9c4   :  { %v3761_v14 = vmul.f32 %v3760_v61, %v3748_v24 }
 0x9c5   :  { %v3784_v43 = vor.u32 1.1754944e-38, %v3783_v59  ;;  %vm3782_vm12 = vcmp.eq.f32.partialorder %v3781_v27, 8.507059e+37 }
 0x9c9   :  { %v4242_v40 = vpop.eup %4241 }
 0x9ca   :  { %v3773_v6 = vmul.f32 %v4242_v40, %v3771_v54  ;;  %vm3778_vm10 = vweird.f32 %v4242_v40 }
 0x9cb   :  { %vm3779_vm11 = vmor %vm3777_vm9, %vm3778_vm10 }
 0x9cc   :  { %v3774_v20 = vsub.f32 1.0, %v3773_v6 }
 0x9ce   :  { %v3775_v22 = vmul.f32 %v4242_v40, %v3774_v20 }
 0x9d0   :  { %v3776_v31 = vadd.f32 %v4242_v40, %v3775_v22 }
 0x9d2   :  { %v3780_v19 = vsel %vm3779_vm11, %v4242_v40, %v3776_v31 }
 0x9d3   :  { %v3785_v60 = vsel %vm3782_vm12, %v3784_v43, %v3780_v19 }
 0x9d4   :  { %v3786_v5 = vmul.f32 %v3785_v60, %v3761_v14 }
 0x9d6   :  { %v4088_v26 = vclamps-f32 %v3786_v5, 1.0 }
 0x9d8   :  { %v3789_v18 = vadd.f32 1.0, %v4088_v26 }
 0x9da   :  { %v3790_v42 = vmul.f32 %v3789_v18, %v3747_v12 }
 0x9dc   :  { %v3791_v48 = vadd.f32 %v3790_v42, %v7439_v16 }
 0x9de   :  { %v3792_v4 = vrot.slane %v3791_v48, 4 }
 0x9e0   :  { %v3793_v0 = vadd.f32 %v3792_v4, %v3791_v48 }
 0x9e2   :  { %v3794_v8 = vrot.slane %v3793_v0, 2 }
 0x9e4   :  { %v3795_v55 = vadd.f32 %v3794_v8, %v3793_v0 }
 0x9e6   :  { %v3796_v52 = vrot.slane %v3795_v55, 1 }
 0x9e8   :  { %v3797_v41 = vadd.f32 %v3796_v52, %v3795_v55 }
 0x9ea   :  { %v3798_v58 = vmul.f32 %v3797_v41, %v7440_v62 }
 0x9ec   :  { %v3799_v21 = vsub.f32 %v3791_v48, %v3798_v58 }
 0x9ee   :  { %v3800_v2 = vmul.f32 %v3799_v21, %v3799_v21 }
 0x9f0   :  { %v3801_v63 = vrot.slane %v3800_v2, 4 }
 0x9f2   :  { %v3802_v1 = vadd.f32 %v3801_v63, %v3800_v2 }
 0x9f4   :  { %v3803_v57 = vrot.slane %v3802_v1, 2 }
 0x9f6   :  { %v3804_v17 = vadd.f32 %v3803_v57, %v3802_v1 }
 0x9f8   :  { %v3805_v51 = vrot.slane %v3804_v17, 1 }
 0x9fa   :  { %v3806_v56 = vadd.f32 %v3805_v51, %v3804_v17 }
 0x9fc   :  { %v3807_v13 = vmul.f32 %v3806_v56, %v7440_v62 }
 0x9fe   :  { %v3808_v49 = vadd.f32 1e-05, %v3807_v13 }
 0xa00   :  { %4243 = vrsqrt.f32 %v3808_v49  ;;  %vm3815_vm2 = vweird.f32 %v3808_v49 }
 0xa06   :  { %v4244_v29 = vpop.eup %4243 }
 0xa07   :  { %v3810_v15 = vmul.f32 %v4244_v29, %v3808_v49  ;;  %vm3816_vm14 = vweird.f32 %v4244_v29 }
 0xa08   :  { %vm3817_vm8 = vmor %vm3815_vm2, %vm3816_vm14 }
 0xa09   :  { %v3811_v32 = vmul.f32 %v4244_v29, %v3810_v15 }
 0xa0b   :  { %v3812_v9 = vmul.f32 0.5, %v3811_v32 }
 0xa0d   :  { %v3813_v30 = vsub.f32 1.5, %v3812_v9 }
 0xa0f   :  { %v3814_v24 = vmul.f32 %v4244_v29, %v3813_v30 }
 0xa11   :  { %v3818_v50 = vsel %vm3817_vm8, %v4244_v29, %v3814_v24 }
 0xa12   :  { %v3819_v3 = vmul.f32 %v3818_v50, %v3799_v21 }
 0xa14   :  { %v3825_v47 = vmul.f32 %v3823_v35, %v3819_v3 }
 0xa16   :  { %v3831_v33 = vadd.f32 %v3829_v23, %v3825_v47 }
 0xa18   :  { %3851 = vmatpush.msra.mxu2 %v3831_v33 }
 0xa19   :  { %4090 = vmatmul.msk.f32.vlgmr.msra.gmra.mxu2 %vm46_vm1, %v3832_v34 }
 0xa9c   :  { %v3853_v7 = vpop.f32.mrf.mxu2 }
 0xa9d   :  { %v4091_v46 = vmul.f32 -1.442695, %v3853_v7 }
 0xa9f   :  { %4245 = vpow2.f32 %v4091_v46 }
 0xaa5   :  { %v4246_v37 = vpop.eup %4245 }
 0xaa6   :  { %v3859_v38 = vadd.f32 1.0, %v4246_v37 }
 0xaa8   :  { %4247 = vrcp.f32 %v3859_v38  ;;  %v3871_v39 = vand.u32 2147483648, %v3859_v38  ;;  %v3869_v11 = vand.u32 2147483647, %v3859_v38  ;;  %vm3865_vm1 = vweird.f32 %v3859_v38 }
 0xaaa   :  { %v3872_v45 = vor.u32 1.1754944e-38, %v3871_v39  ;;  %vm3870_vm15 = vcmp.eq.f32.partialorder %v3869_v11, 8.507059e+37 }
 0xaae   :  { %v4248_v36 = vpop.eup %4247 }
 0xaaf   :  { %v3861_v25 = vmul.f32 %v4248_v36, %v3859_v38  ;;  %vm3866_vm0 = vweird.f32 %v4248_v36 }
 0xab0   :  { %vm3867_vm4 = vmor %vm3865_vm1, %vm3866_vm0 }
 0xab1   :  { %v3862_v28 = vsub.f32 1.0, %v3861_v25 }
 0xab3   :  { %v3863_v44 = vmul.f32 %v4248_v36, %v3862_v28 }
 0xab5   :  { %v3864_v54 = vadd.f32 %v4248_v36, %v3863_v44 }
 0xab7   :  { %v3868_v10 = vsel %vm3867_vm4, %v4248_v36, %v3864_v54 }
 0xab8   :  { %v3873_v40 = vsel %vm3870_vm15, %v3872_v45, %v3868_v10 }
 0xab9   :  { %3875 = vst [vmem:[#allocation2] sm:$0x1] %v3873_v40 }
 0xaba   :  { %3886 = dma.vmem_to_hbm [thread:$0]  %s3882_s25, 16, %s3884_s27, [#allocation3]  }
 0xabb   :  { %4274 = dma.done.wait [#allocation3], 16  }
 0xabc   :  { %4275 = vsyncadd [#allocation3], 4294967280 }
 0xabd   :  { %3891 = vsyncpa [#allocation3], 1 }

</bundles_post_ra>
